<compile_context>
chip_gen: v7x
topology: tpu7x:2x2x1
jax: 0.10.0
libtpu: 0.0.40
codegen_flags: <defaults>
</compile_context>

<pallas_src>
import functools

import jax
import jax.numpy as jnp
from jax.experimental import pallas as pl
from jax.experimental.pallas import tpu as pltpu


# ----------------------------- Pallas kernel -------------------------------- #

def _msfcs_kernel(x_ref, mask_ref,
                  wA_ref, bA_ref,
                  w2_ref, b2_ref,
                  w7c_ref, b7c_ref,
                  out_ref, stack2_ref, stack3_ref, *, deltas):
    """One lane-batched slab of images per grid step.

    x_ref:      (1, C_in, HWb) f32   input, channel-major, lane-batched spatial.
    mask_ref:   (9, HWb)       f32   0/1 border-validity mask per 3x3 tap.
    wA_ref:     (72, 9*C_in)   bf16  K-stacked fused first layer,
                                     rows = [b1x1(4)|b3x3(4)|b5x5a(32)|b7x7a(32)].
    w2_ref:     (36, 9*64)     bf16  fused second layer (block-structured:
                                     rows 0:4 = b5x5 conv-b, rows 4:36 = b7x7 conv-b).
    w7c_ref:    (4, 9*32)      bf16  third layer (b7x7 conv-c).
    bA/b2/b7c:  (*, 1)         f32   folded biases.
    out_ref:    (1, 16, HWb)   f32   [b1x1 | b3x3 | b5x5 | b7x7].
    stack2_ref: (576, HWb)     bf16  VMEM scratch: second-layer tap stack.
    stack3_ref: (288, HWb)     bf16  VMEM scratch: third-layer tap stack.
    """
    hw = x_ref.shape[-1]
    masks = mask_ref[...]                          # (9, HWb)

    def shifted(feat, t):
        # Tap t of a 3x3 "same" conv: roll the flattened spatial axis by
        # deltas[t] (XLU slot, otherwise idle) and zero the wrapped border
        # positions with the precomputed mask (VPU).
        d = deltas[t]
        if d == 0:
            return feat
        rolled = pltpu.roll(feat, shift=(-d) % hw, axis=feat.ndim - 1)
        return rolled * masks[t:t + 1, :]

    x = x_ref[0]                                   # (C_in, HWb) f32

    # ---- first layer (+1x1 branch): one K-stacked bf16 matmul, K = 9*C_in.
    xs = jnp.concatenate([shifted(x, t) for t in range(9)],
                         axis=0).astype(jnp.bfloat16)           # (9*C_in, HWb)
    a = jnp.maximum(
        jnp.dot(wA_ref[...], xs, preferred_element_type=jnp.float32)
        + bA_ref[...], 0.0)                                      # (72, HWb) f32

    # [branch1x1 | branch3x3]: aligned 8-row store, done with these rows now.
    out_ref[0, 0:8, :] = a[0:8, :]

    # ---- fused second layer: b5x5 conv-b and b7x7 conv-b share one tap stack.
    a2 = a[8:72, :]                                # (64, HWb): [t5(32) | t7(32)]
    for t in range(9):
        stack2_ref[pl.ds(64 * t, 64), :] = shifted(a2, t).astype(jnp.bfloat16)
    y2 = jnp.maximum(
        jnp.dot(w2_ref[...], stack2_ref[...], preferred_element_type=jnp.float32)
        + b2_ref[...], 0.0)                        # (36, HWb): [out5(4) | t7b(32)]

    # ---- third layer (b7x7 conv-c); separate scratch slot (no WAR on stack2).
    t7b = y2[4:36, :]
    for t in range(9):
        stack3_ref[pl.ds(32 * t, 32), :] = shifted(t7b, t).astype(jnp.bfloat16)
    out7 = jnp.maximum(
        jnp.dot(w7c_ref[...], stack3_ref[...], preferred_element_type=jnp.float32)
        + b7c_ref[...], 0.0)                       # (4, HWb)

    # [branch5x5 | branch7x7]: one aligned 8-row store.
    out_ref[0, 8:16, :] = jnp.concatenate([y2[0:4, :], out7], axis=0)


# ------------------------------ JAX glue ------------------------------------ #

def build_tap_masks(H, W):
    """mask[t, p] = 1 iff output flat-index p has an in-bounds source for tap t."""
    p = jnp.arange(H * W)
    i, j = p // W, p % W
    rows = []
    for oy in (-1, 0, 1):            # tap order matches deltas / taps()
        for ox in (-1, 0, 1):
            valid = (i + oy >= 0) & (i + oy < H) & (j + ox >= 0) & (j + ox < W)
            rows.append(valid.astype(jnp.float32))
    return jnp.stack(rows, axis=0)   # (9, HW)


def make_folded_params(key, c_in, eps=1e-5):
    """Deterministic conv+BN params, BN folded into (weight, bias) per layer."""
    specs = [  # (out_ch, in_ch, ksize) in forward order
        (4, c_in, 1),   # branch1x1
        (4, c_in, 3),   # branch3x3
        (32, c_in, 3),  # branch5x5 conv a
        (4, 32, 3),     # branch5x5 conv b
        (32, c_in, 3),  # branch7x7 conv a
        (32, 32, 3),    # branch7x7 conv b
        (4, 32, 3),     # branch7x7 conv c
    ]
    folded = []
    for idx, (o, c, k) in enumerate(specs):
        ks = jax.random.split(jax.random.fold_in(key, idx), 6)
        w = 0.15 * jax.random.normal(ks[0], (o, c, k, k), jnp.float32)
        b = 0.05 * jax.random.normal(ks[1], (o,), jnp.float32)
        gamma = 1.0 + 0.1 * jax.random.normal(ks[2], (o,), jnp.float32)
        beta = 0.05 * jax.random.normal(ks[3], (o,), jnp.float32)
        mean = 0.05 * jax.random.normal(ks[4], (o,), jnp.float32)
        var = 1.0 + 0.1 * jax.random.uniform(ks[5], (o,), jnp.float32)
        scale = gamma / jnp.sqrt(var + eps)
        folded.append((w * scale[:, None, None, None],
                       (b - mean) * scale + beta))
    return folded


def to_kernel_params(folded, c_in):
    """Rearrange the folded conv+BN params into the kernel's fused/K-stacked layout."""
    (w1, b1), (w3, b3), (w5a, b5a), (w5b, b5b), \
        (w7a, b7a), (w7b, b7b), (w7c, b7c) = folded

    def taps(w):       # (O, C, 3, 3) -> (9, O, C); tap index t = (oy+1)*3 + (ox+1)
        return jnp.transpose(w, (2, 3, 0, 1)).reshape(9, w.shape[0], w.shape[1])

    def k_stack(t9):   # (9, O, C) -> (O, 9*C); K order = [tap0 ch | tap1 ch | ...]
        return jnp.transpose(t9, (1, 0, 2)).reshape(t9.shape[1], 9 * t9.shape[2])

    # Fused first layer: rows [b1x1(4) | b3x3(4) | b5x5a(32) | b7x7a(32)] = 72.
    # The 1x1 branch lives only on the centre tap (shift = identity), so exact.
    w1_taps = jnp.zeros((9, 4, c_in), jnp.float32).at[4].set(w1.reshape(4, c_in))
    wA = k_stack(jnp.concatenate([w1_taps, taps(w3), taps(w5a), taps(w7a)], axis=1))
    bA = jnp.concatenate([b1, b3, b5a, b7a])[:, None]          # (72, 1)

    # Fused second layer: block-structured (36, 9*64) matching the kernel's
    # per-tap [t5(32) | t7(32)] stacking; off-blocks are exact zeros.
    blk = jnp.zeros((9, 36, 64), jnp.float32)
    blk = blk.at[:, 0:4, 0:32].set(taps(w5b))
    blk = blk.at[:, 4:36, 32:64].set(taps(w7b))
    w2 = k_stack(blk)                                          # (36, 576)
    b2 = jnp.concatenate([b5b, b7b])[:, None]                  # (36, 1)

    w7c_k = k_stack(taps(w7c))                                 # (4, 288)

    bf = lambda w: w.astype(jnp.bfloat16)
    return [bf(wA), bA, bf(w2), b2, bf(w7c_k), b7c[:, None]]


def multi_scale_forward(x_nchw, kernel_params, perm, images_per_step=None):
    N, C_in, H, W = x_nchw.shape
    HW = H * W
    if images_per_step is None:
        # Keep >= 2 grid steps so both v7x TensorCores get work; pass
        # images_per_step=N to fold the whole batch on single-TC v5e/v6e.
        images_per_step = max(1, N // 2)
    B = images_per_step
    steps = pl.cdiv(N, B)
    N_pad = steps * B
    HWb = B * HW

    x = x_nchw.astype(jnp.float32).reshape(N, C_in, HW)
    if N_pad != N:
        x = jnp.concatenate(
            [x, jnp.zeros((N_pad - N, C_in, HW), jnp.float32)], axis=0)
    # Lane-batched layout: (steps, C_in, B*HW), images concatenated along lanes.
    x = x.reshape(steps, B, C_in, HW).transpose(0, 2, 1, 3).reshape(steps, C_in, HWb)

    masks = jnp.tile(build_tap_masks(H, W), (1, B))            # (9, B*HW)
    deltas = tuple(oy * W + ox for oy in (-1, 0, 1) for ox in (-1, 0, 1))

    def const_spec(shape):
        nd = len(shape)
        return pl.BlockSpec(shape, lambda n, _nd=nd: (0,) * _nd)

    in_specs = [pl.BlockSpec((1, C_in, HWb), lambda n: (n, 0, 0)),
                const_spec(masks.shape)]
    in_specs += [const_spec(p.shape) for p in kernel_params]

    out = pl.pallas_call(
        functools.partial(_msfcs_kernel, deltas=deltas),
        out_shape=jax.ShapeDtypeStruct((steps, 16, HWb), jnp.float32),
        grid=(steps,),
        in_specs=in_specs,
        out_specs=pl.BlockSpec((1, 16, HWb), lambda n: (n, 0, 0)),
        scratch_shapes=[pltpu.VMEM((9 * 64, HWb), jnp.bfloat16),
                        pltpu.VMEM((9 * 32, HWb), jnp.bfloat16)],
        compiler_params=pltpu.CompilerParams(
            dimension_semantics=("parallel",)),   # batch slabs independent
    )(x, masks, *kernel_params)

    y = (out.reshape(steps, 16, B, HW).transpose(0, 2, 1, 3)
            .reshape(N_pad, 16, H, W)[:N])
    # "ChannelShuffle" from the PyTorch module permutes the LAST axis (width).
    return jnp.take(y, perm, axis=-1)


# --------------------------- pure-JAX reference ------------------------------ #

def _conv_bn_relu_ref(x, w, b, pad):
    y = jax.lax.conv_general_dilated(
        x, w, (1, 1), [(pad, pad), (pad, pad)],
        dimension_numbers=("NCHW", "OIHW", "NCHW"),
        precision=jax.lax.Precision.HIGHEST)
    return jax.nn.relu(y + b[None, :, None, None])


def reference_forward(x, folded, perm):
    """Pure-JAX reference using the kernel's precision policy (bf16 conv
    operands, f32 accumulation) so the check isolates structural correctness."""
    def q(v):
        return v.astype(jnp.bfloat16).astype(jnp.float32)

    (w1, b1), (w3, b3), (w5a, b5a), (w5b, b5b), \
        (w7a, b7a), (w7b, b7b), (w7c, b7c) = folded
    xq = q(x)
    br1 = _conv_bn_relu_ref(xq, q(w1), b1, 0)
    br3 = _conv_bn_relu_ref(xq, q(w3), b3, 1)
    t = _conv_bn_relu_ref(xq, q(w5a), b5a, 1)
    br5 = _conv_bn_relu_ref(q(t), q(w5b), b5b, 1)
    t = _conv_bn_relu_ref(xq, q(w7a), b7a, 1)
    t = _conv_bn_relu_ref(q(t), q(w7b), b7b, 1)
    br7 = _conv_bn_relu_ref(q(t), q(w7c), b7c, 1)
    y = jnp.concatenate([br1, br3, br5, br7], axis=1)
    return jnp.take(y, perm, axis=-1)


# --------------------------------- main -------------------------------------- #

if __name__ == "__main__":
    key = jax.random.PRNGKey(0)
    k_x, k_perm, k_param = jax.random.split(key, 3)

    N, C_in, H, W = 4, 4, 16, 16
    x = jax.random.normal(k_x, (N, C_in, H, W), jnp.float32)

    folded = make_folded_params(k_param, C_in)
    kparams = to_kernel_params(folded, C_in)
    perm = jax.random.permutation(k_perm, W)   # deterministic stand-in for torch.randperm

    y = multi_scale_forward(x, kparams, perm)
    y = jax.block_until_ready(y)

    assert y.shape == (N, 16, H, W), y.shape
    y_ref = reference_forward(x, folded, perm)
    if not bool(jnp.allclose(y, y_ref, atol=5e-3, rtol=5e-3)):
        raise AssertionError(
            f"mismatch vs reference: max abs diff = {float(jnp.max(jnp.abs(y - y_ref)))}")

    print("KERNEL_OK")
</pallas_src>

<mosaic_0001>
module attributes {stable_mosaic.version = 11 : i64} {
  func.func @_msfcs_kernel(%arg0: i32, %arg1: memref<1x4x512xf32, #tpu.memory_space<vmem>>, %arg2: memref<9x512xf32, #tpu.memory_space<vmem>>, %arg3: memref<72x36xbf16, #tpu.memory_space<vmem>>, %arg4: memref<72x1xf32, #tpu.memory_space<vmem>>, %arg5: memref<36x576xbf16, #tpu.memory_space<vmem>>, %arg6: memref<36x1xf32, #tpu.memory_space<vmem>>, %arg7: memref<4x288xbf16, #tpu.memory_space<vmem>>, %arg8: memref<4x1xf32, #tpu.memory_space<vmem>>, %arg9: memref<1x16x512xf32, #tpu.memory_space<vmem>>, %arg10: memref<576x512xbf16, #tpu.memory_space<vmem>>, %arg11: memref<288x512xbf16, #tpu.memory_space<vmem>>) attributes {dimension_semantics = [#tpu.dimension_semantics<parallel>], iteration_bounds = array<i64: 2>, scalar_prefetch = 0 : i64, scratch_operands = 2 : i64, tpu.core_type = #tpu.core_type<tc>, window_params = [{transform_indices = @transform_0, window_bounds = array<i64: 1, 4, 512>}, {pipeline_mode = #tpu.pipeline_mode<synchronous>, transform_indices = @transform_1, window_bounds = array<i64: 9, 512>}, {pipeline_mode = #tpu.pipeline_mode<synchronous>, transform_indices = @transform_2, window_bounds = array<i64: 72, 36>}, {pipeline_mode = #tpu.pipeline_mode<synchronous>, transform_indices = @transform_3, window_bounds = array<i64: 72, 1>}, {pipeline_mode = #tpu.pipeline_mode<synchronous>, transform_indices = @transform_4, window_bounds = array<i64: 36, 576>}, {pipeline_mode = #tpu.pipeline_mode<synchronous>, transform_indices = @transform_5, window_bounds = array<i64: 36, 1>}, {pipeline_mode = #tpu.pipeline_mode<synchronous>, transform_indices = @transform_6, window_bounds = array<i64: 4, 288>}, {pipeline_mode = #tpu.pipeline_mode<synchronous>, transform_indices = @transform_7, window_bounds = array<i64: 4, 1>}, {transform_indices = @transform_8, window_bounds = array<i64: 1, 16, 512>}]} {
    %c0 = arith.constant 0 : index
    %c0_0 = arith.constant 0 : index
    %0 = vector.load %arg2[%c0, %c0_0] : memref<9x512xf32, #tpu.memory_space<vmem>>, vector<9x512xf32>
    %c0_1 = arith.constant 0 : index
    %c0_2 = arith.constant 0 : index
    %c0_3 = arith.constant 0 : index
    %1 = vector.load %arg1[%c0_1, %c0_2, %c0_3] : memref<1x4x512xf32, #tpu.memory_space<vmem>>, vector<1x4x512xf32>
    %2 = vector.shape_cast %1 : vector<1x4x512xf32> to vector<4x512xf32>
    %c17_i32 = arith.constant 17 : i32
    %3 = tpu.dynamic_rotate %2 by %c17_i32 dim 1 : vector<4x512xf32>, i32 -> vector<4x512xf32>
    %4 = vector.extract_strided_slice %0 {offsets = [0, 0], sizes = [1, 512], strides = [1, 1]} : vector<9x512xf32> to vector<1x512xf32>
    %5 = vector.broadcast %4 : vector<1x512xf32> to vector<4x512xf32>
    %6 = arith.mulf %3, %5 : vector<4x512xf32>
    %c16_i32 = arith.constant 16 : i32
    %7 = tpu.dynamic_rotate %2 by %c16_i32 dim 1 : vector<4x512xf32>, i32 -> vector<4x512xf32>
    %8 = vector.extract_strided_slice %0 {offsets = [1, 0], sizes = [1, 512], strides = [1, 1]} : vector<9x512xf32> to vector<1x512xf32>
    %9 = vector.broadcast %8 : vector<1x512xf32> to vector<4x512xf32>
    %10 = arith.mulf %7, %9 : vector<4x512xf32>
    %c15_i32 = arith.constant 15 : i32
    %11 = tpu.dynamic_rotate %2 by %c15_i32 dim 1 : vector<4x512xf32>, i32 -> vector<4x512xf32>
    %12 = vector.extract_strided_slice %0 {offsets = [2, 0], sizes = [1, 512], strides = [1, 1]} : vector<9x512xf32> to vector<1x512xf32>
    %13 = vector.broadcast %12 : vector<1x512xf32> to vector<4x512xf32>
    %14 = arith.mulf %11, %13 : vector<4x512xf32>
    %c1_i32 = arith.constant 1 : i32
    %15 = tpu.dynamic_rotate %2 by %c1_i32 dim 1 : vector<4x512xf32>, i32 -> vector<4x512xf32>
    %16 = vector.extract_strided_slice %0 {offsets = [3, 0], sizes = [1, 512], strides = [1, 1]} : vector<9x512xf32> to vector<1x512xf32>
    %17 = vector.broadcast %16 : vector<1x512xf32> to vector<4x512xf32>
    %18 = arith.mulf %15, %17 : vector<4x512xf32>
    %c511_i32 = arith.constant 511 : i32
    %19 = tpu.dynamic_rotate %2 by %c511_i32 dim 1 : vector<4x512xf32>, i32 -> vector<4x512xf32>
    %20 = vector.extract_strided_slice %0 {offsets = [5, 0], sizes = [1, 512], strides = [1, 1]} : vector<9x512xf32> to vector<1x512xf32>
    %21 = vector.broadcast %20 : vector<1x512xf32> to vector<4x512xf32>
    %22 = arith.mulf %19, %21 : vector<4x512xf32>
    %c497_i32 = arith.constant 497 : i32
    %23 = tpu.dynamic_rotate %2 by %c497_i32 dim 1 : vector<4x512xf32>, i32 -> vector<4x512xf32>
    %24 = vector.extract_strided_slice %0 {offsets = [6, 0], sizes = [1, 512], strides = [1, 1]} : vector<9x512xf32> to vector<1x512xf32>
    %25 = vector.broadcast %24 : vector<1x512xf32> to vector<4x512xf32>
    %26 = arith.mulf %23, %25 : vector<4x512xf32>
    %c496_i32 = arith.constant 496 : i32
    %27 = tpu.dynamic_rotate %2 by %c496_i32 dim 1 : vector<4x512xf32>, i32 -> vector<4x512xf32>
    %28 = vector.extract_strided_slice %0 {offsets = [7, 0], sizes = [1, 512], strides = [1, 1]} : vector<9x512xf32> to vector<1x512xf32>
    %29 = vector.broadcast %28 : vector<1x512xf32> to vector<4x512xf32>
    %30 = arith.mulf %27, %29 : vector<4x512xf32>
    %c495_i32 = arith.constant 495 : i32
    %31 = tpu.dynamic_rotate %2 by %c495_i32 dim 1 : vector<4x512xf32>, i32 -> vector<4x512xf32>
    %32 = vector.extract_strided_slice %0 {offsets = [8, 0], sizes = [1, 512], strides = [1, 1]} : vector<9x512xf32> to vector<1x512xf32>
    %33 = vector.broadcast %32 : vector<1x512xf32> to vector<4x512xf32>
    %34 = arith.mulf %31, %33 : vector<4x512xf32>
    %35 = tpu.concatenate %6, %10, %14, %18, %2, %22, %26, %30, %34 in 0 : vector<4x512xf32>, vector<4x512xf32>, vector<4x512xf32>, vector<4x512xf32>, vector<4x512xf32>, vector<4x512xf32>, vector<4x512xf32>, vector<4x512xf32>, vector<4x512xf32> -> vector<36x512xf32>
    %36 = arith.truncf %35 : vector<36x512xf32> to vector<36x512xbf16>
    %c0_4 = arith.constant 0 : index
    %c0_5 = arith.constant 0 : index
    %37 = vector.load %arg3[%c0_4, %c0_5] : memref<72x36xbf16, #tpu.memory_space<vmem>>, vector<72x36xbf16>
    %cst = arith.constant dense<0.000000e+00> : vector<72x512xf32>
    %38 = tpu.matmul %37, %36, %cst {dimension_numbers = #tpu.dot_dimension_numbers<[1], [0], [0], [1], [0, 0, 1, 1], [], []>} : vector<72x36xbf16>, vector<36x512xbf16>, vector<72x512xf32> -> vector<72x512xf32>
    %c0_6 = arith.constant 0 : index
    %c0_7 = arith.constant 0 : index
    %39 = vector.load %arg4[%c0_6, %c0_7] : memref<72x1xf32, #tpu.memory_space<vmem>>, vector<72x1xf32>
    %40 = vector.broadcast %39 : vector<72x1xf32> to vector<72x512xf32>
    %41 = arith.addf %38, %40 : vector<72x512xf32>
    %cst_8 = arith.constant 0.000000e+00 : f32
    %42 = vector.broadcast %cst_8 : f32 to vector<72x512xf32>
    %43 = arith.maximumf %41, %42 : vector<72x512xf32>
    %44 = vector.extract_strided_slice %43 {offsets = [0, 0], sizes = [8, 512], strides = [1, 1]} : vector<72x512xf32> to vector<8x512xf32>
    %c0_9 = arith.constant 0 : index
    %c0_10 = arith.constant 0 : index
    %c0_11 = arith.constant 0 : index
    %45 = vector.load %arg9[%c0_9, %c0_10, %c0_11] : memref<1x16x512xf32, #tpu.memory_space<vmem>>, vector<1x8x512xf32>
    %46 = vector.shape_cast %45 : vector<1x8x512xf32> to vector<8x512xf32>
    %47 = vector.shape_cast %44 : vector<8x512xf32> to vector<1x8x512xf32>
    tpu.vector_store %arg9[%c0_9, %c0_10, %c0_11], %47 {strides = array<i32>} : memref<1x16x512xf32, #tpu.memory_space<vmem>>, vector<1x8x512xf32>,
    %48 = vector.extract_strided_slice %43 {offsets = [8, 0], sizes = [64, 512], strides = [1, 1]} : vector<72x512xf32> to vector<64x512xf32>
    %c17_i32_12 = arith.constant 17 : i32
    %49 = tpu.dynamic_rotate %48 by %c17_i32_12 dim 1 : vector<64x512xf32>, i32 -> vector<64x512xf32>
    %50 = vector.extract_strided_slice %0 {offsets = [0, 0], sizes = [1, 512], strides = [1, 1]} : vector<9x512xf32> to vector<1x512xf32>
    %51 = vector.broadcast %50 : vector<1x512xf32> to vector<64x512xf32>
    %52 = arith.mulf %49, %51 : vector<64x512xf32>
    %53 = arith.truncf %52 : vector<64x512xf32> to vector<64x512xbf16>
    %c0_13 = arith.constant 0 : index
    %c0_14 = arith.constant 0 : index
    %54 = vector.load %arg10[%c0_13, %c0_14] : memref<576x512xbf16, #tpu.memory_space<vmem>>, vector<64x512xbf16>
    tpu.vector_store %arg10[%c0_13, %c0_14], %53 {strides = array<i32>} : memref<576x512xbf16, #tpu.memory_space<vmem>>, vector<64x512xbf16>,
    %c16_i32_15 = arith.constant 16 : i32
    %55 = tpu.dynamic_rotate %48 by %c16_i32_15 dim 1 : vector<64x512xf32>, i32 -> vector<64x512xf32>
    %56 = vector.extract_strided_slice %0 {offsets = [1, 0], sizes = [1, 512], strides = [1, 1]} : vector<9x512xf32> to vector<1x512xf32>
    %57 = vector.broadcast %56 : vector<1x512xf32> to vector<64x512xf32>
    %58 = arith.mulf %55, %57 : vector<64x512xf32>
    %59 = arith.truncf %58 : vector<64x512xf32> to vector<64x512xbf16>
    %c64 = arith.constant 64 : index
    %c0_16 = arith.constant 0 : index
    %60 = vector.load %arg10[%c64, %c0_16] : memref<576x512xbf16, #tpu.memory_space<vmem>>, vector<64x512xbf16>
    tpu.vector_store %arg10[%c64, %c0_16], %59 {strides = array<i32>} : memref<576x512xbf16, #tpu.memory_space<vmem>>, vector<64x512xbf16>,
    %c15_i32_17 = arith.constant 15 : i32
    %61 = tpu.dynamic_rotate %48 by %c15_i32_17 dim 1 : vector<64x512xf32>, i32 -> vector<64x512xf32>
    %62 = vector.extract_strided_slice %0 {offsets = [2, 0], sizes = [1, 512], strides = [1, 1]} : vector<9x512xf32> to vector<1x512xf32>
    %63 = vector.broadcast %62 : vector<1x512xf32> to vector<64x512xf32>
    %64 = arith.mulf %61, %63 : vector<64x512xf32>
    %65 = arith.truncf %64 : vector<64x512xf32> to vector<64x512xbf16>
    %c128 = arith.constant 128 : index
    %c0_18 = arith.constant 0 : index
    %66 = vector.load %arg10[%c128, %c0_18] : memref<576x512xbf16, #tpu.memory_space<vmem>>, vector<64x512xbf16>
    tpu.vector_store %arg10[%c128, %c0_18], %65 {strides = array<i32>} : memref<576x512xbf16, #tpu.memory_space<vmem>>, vector<64x512xbf16>,
    %c1_i32_19 = arith.constant 1 : i32
    %67 = tpu.dynamic_rotate %48 by %c1_i32_19 dim 1 : vector<64x512xf32>, i32 -> vector<64x512xf32>
    %68 = vector.extract_strided_slice %0 {offsets = [3, 0], sizes = [1, 512], strides = [1, 1]} : vector<9x512xf32> to vector<1x512xf32>
    %69 = vector.broadcast %68 : vector<1x512xf32> to vector<64x512xf32>
    %70 = arith.mulf %67, %69 : vector<64x512xf32>
    %71 = arith.truncf %70 : vector<64x512xf32> to vector<64x512xbf16>
    %c192 = arith.constant 192 : index
    %c0_20 = arith.constant 0 : index
    %72 = vector.load %arg10[%c192, %c0_20] : memref<576x512xbf16, #tpu.memory_space<vmem>>, vector<64x512xbf16>
    tpu.vector_store %arg10[%c192, %c0_20], %71 {strides = array<i32>} : memref<576x512xbf16, #tpu.memory_space<vmem>>, vector<64x512xbf16>,
    %73 = arith.truncf %48 : vector<64x512xf32> to vector<64x512xbf16>
    %c256 = arith.constant 256 : index
    %c0_21 = arith.constant 0 : index
    %74 = vector.load %arg10[%c256, %c0_21] : memref<576x512xbf16, #tpu.memory_space<vmem>>, vector<64x512xbf16>
    tpu.vector_store %arg10[%c256, %c0_21], %73 {strides = array<i32>} : memref<576x512xbf16, #tpu.memory_space<vmem>>, vector<64x512xbf16>,
    %c511_i32_22 = arith.constant 511 : i32
    %75 = tpu.dynamic_rotate %48 by %c511_i32_22 dim 1 : vector<64x512xf32>, i32 -> vector<64x512xf32>
    %76 = vector.extract_strided_slice %0 {offsets = [5, 0], sizes = [1, 512], strides = [1, 1]} : vector<9x512xf32> to vector<1x512xf32>
    %77 = vector.broadcast %76 : vector<1x512xf32> to vector<64x512xf32>
    %78 = arith.mulf %75, %77 : vector<64x512xf32>
    %79 = arith.truncf %78 : vector<64x512xf32> to vector<64x512xbf16>
    %c320 = arith.constant 320 : index
    %c0_23 = arith.constant 0 : index
    %80 = vector.load %arg10[%c320, %c0_23] : memref<576x512xbf16, #tpu.memory_space<vmem>>, vector<64x512xbf16>
    tpu.vector_store %arg10[%c320, %c0_23], %79 {strides = array<i32>} : memref<576x512xbf16, #tpu.memory_space<vmem>>, vector<64x512xbf16>,
    %c497_i32_24 = arith.constant 497 : i32
    %81 = tpu.dynamic_rotate %48 by %c497_i32_24 dim 1 : vector<64x512xf32>, i32 -> vector<64x512xf32>
    %82 = vector.extract_strided_slice %0 {offsets = [6, 0], sizes = [1, 512], strides = [1, 1]} : vector<9x512xf32> to vector<1x512xf32>
    %83 = vector.broadcast %82 : vector<1x512xf32> to vector<64x512xf32>
    %84 = arith.mulf %81, %83 : vector<64x512xf32>
    %85 = arith.truncf %84 : vector<64x512xf32> to vector<64x512xbf16>
    %c384 = arith.constant 384 : index
    %c0_25 = arith.constant 0 : index
    %86 = vector.load %arg10[%c384, %c0_25] : memref<576x512xbf16, #tpu.memory_space<vmem>>, vector<64x512xbf16>
    tpu.vector_store %arg10[%c384, %c0_25], %85 {strides = array<i32>} : memref<576x512xbf16, #tpu.memory_space<vmem>>, vector<64x512xbf16>,
    %c496_i32_26 = arith.constant 496 : i32
    %87 = tpu.dynamic_rotate %48 by %c496_i32_26 dim 1 : vector<64x512xf32>, i32 -> vector<64x512xf32>
    %88 = vector.extract_strided_slice %0 {offsets = [7, 0], sizes = [1, 512], strides = [1, 1]} : vector<9x512xf32> to vector<1x512xf32>
    %89 = vector.broadcast %88 : vector<1x512xf32> to vector<64x512xf32>
    %90 = arith.mulf %87, %89 : vector<64x512xf32>
    %91 = arith.truncf %90 : vector<64x512xf32> to vector<64x512xbf16>
    %c448 = arith.constant 448 : index
    %c0_27 = arith.constant 0 : index
    %92 = vector.load %arg10[%c448, %c0_27] : memref<576x512xbf16, #tpu.memory_space<vmem>>, vector<64x512xbf16>
    tpu.vector_store %arg10[%c448, %c0_27], %91 {strides = array<i32>} : memref<576x512xbf16, #tpu.memory_space<vmem>>, vector<64x512xbf16>,
    %c495_i32_28 = arith.constant 495 : i32
    %93 = tpu.dynamic_rotate %48 by %c495_i32_28 dim 1 : vector<64x512xf32>, i32 -> vector<64x512xf32>
    %94 = vector.extract_strided_slice %0 {offsets = [8, 0], sizes = [1, 512], strides = [1, 1]} : vector<9x512xf32> to vector<1x512xf32>
    %95 = vector.broadcast %94 : vector<1x512xf32> to vector<64x512xf32>
    %96 = arith.mulf %93, %95 : vector<64x512xf32>
    %97 = arith.truncf %96 : vector<64x512xf32> to vector<64x512xbf16>
    %c512 = arith.constant 512 : index
    %c0_29 = arith.constant 0 : index
    %98 = vector.load %arg10[%c512, %c0_29] : memref<576x512xbf16, #tpu.memory_space<vmem>>, vector<64x512xbf16>
    tpu.vector_store %arg10[%c512, %c0_29], %97 {strides = array<i32>} : memref<576x512xbf16, #tpu.memory_space<vmem>>, vector<64x512xbf16>,
    %c0_30 = arith.constant 0 : index
    %c0_31 = arith.constant 0 : index
    %99 = vector.load %arg5[%c0_30, %c0_31] : memref<36x576xbf16, #tpu.memory_space<vmem>>, vector<36x576xbf16>
    %c0_32 = arith.constant 0 : index
    %c0_33 = arith.constant 0 : index
    %100 = vector.load %arg10[%c0_32, %c0_33] : memref<576x512xbf16, #tpu.memory_space<vmem>>, vector<576x512xbf16>
    %cst_34 = arith.constant dense<0.000000e+00> : vector<36x512xf32>
    %101 = tpu.matmul %99, %100, %cst_34 {dimension_numbers = #tpu.dot_dimension_numbers<[1], [0], [0], [1], [0, 0, 1, 1], [], []>} : vector<36x576xbf16>, vector<576x512xbf16>, vector<36x512xf32> -> vector<36x512xf32>
    %c0_35 = arith.constant 0 : index
    %c0_36 = arith.constant 0 : index
    %102 = vector.load %arg6[%c0_35, %c0_36] : memref<36x1xf32, #tpu.memory_space<vmem>>, vector<36x1xf32>
    %103 = vector.broadcast %102 : vector<36x1xf32> to vector<36x512xf32>
    %104 = arith.addf %101, %103 : vector<36x512xf32>
    %cst_37 = arith.constant 0.000000e+00 : f32
    %105 = vector.broadcast %cst_37 : f32 to vector<36x512xf32>
    %106 = arith.maximumf %104, %105 : vector<36x512xf32>
    %107 = vector.extract_strided_slice %106 {offsets = [4, 0], sizes = [32, 512], strides = [1, 1]} : vector<36x512xf32> to vector<32x512xf32>
    %c17_i32_38 = arith.constant 17 : i32
    %108 = tpu.dynamic_rotate %107 by %c17_i32_38 dim 1 : vector<32x512xf32>, i32 -> vector<32x512xf32>
    %109 = vector.extract_strided_slice %0 {offsets = [0, 0], sizes = [1, 512], strides = [1, 1]} : vector<9x512xf32> to vector<1x512xf32>
    %110 = vector.broadcast %109 : vector<1x512xf32> to vector<32x512xf32>
    %111 = arith.mulf %108, %110 : vector<32x512xf32>
    %112 = arith.truncf %111 : vector<32x512xf32> to vector<32x512xbf16>
    %c0_39 = arith.constant 0 : index
    %c0_40 = arith.constant 0 : index
    %113 = vector.load %arg11[%c0_39, %c0_40] : memref<288x512xbf16, #tpu.memory_space<vmem>>, vector<32x512xbf16>
    tpu.vector_store %arg11[%c0_39, %c0_40], %112 {strides = array<i32>} : memref<288x512xbf16, #tpu.memory_space<vmem>>, vector<32x512xbf16>,
    %c16_i32_41 = arith.constant 16 : i32
    %114 = tpu.dynamic_rotate %107 by %c16_i32_41 dim 1 : vector<32x512xf32>, i32 -> vector<32x512xf32>
    %115 = vector.extract_strided_slice %0 {offsets = [1, 0], sizes = [1, 512], strides = [1, 1]} : vector<9x512xf32> to vector<1x512xf32>
    %116 = vector.broadcast %115 : vector<1x512xf32> to vector<32x512xf32>
    %117 = arith.mulf %114, %116 : vector<32x512xf32>
    %118 = arith.truncf %117 : vector<32x512xf32> to vector<32x512xbf16>
    %c32 = arith.constant 32 : index
    %c0_42 = arith.constant 0 : index
    %119 = vector.load %arg11[%c32, %c0_42] : memref<288x512xbf16, #tpu.memory_space<vmem>>, vector<32x512xbf16>
    tpu.vector_store %arg11[%c32, %c0_42], %118 {strides = array<i32>} : memref<288x512xbf16, #tpu.memory_space<vmem>>, vector<32x512xbf16>,
    %c15_i32_43 = arith.constant 15 : i32
    %120 = tpu.dynamic_rotate %107 by %c15_i32_43 dim 1 : vector<32x512xf32>, i32 -> vector<32x512xf32>
    %121 = vector.extract_strided_slice %0 {offsets = [2, 0], sizes = [1, 512], strides = [1, 1]} : vector<9x512xf32> to vector<1x512xf32>
    %122 = vector.broadcast %121 : vector<1x512xf32> to vector<32x512xf32>
    %123 = arith.mulf %120, %122 : vector<32x512xf32>
    %124 = arith.truncf %123 : vector<32x512xf32> to vector<32x512xbf16>
    %c64_44 = arith.constant 64 : index
    %c0_45 = arith.constant 0 : index
    %125 = vector.load %arg11[%c64_44, %c0_45] : memref<288x512xbf16, #tpu.memory_space<vmem>>, vector<32x512xbf16>
    tpu.vector_store %arg11[%c64_44, %c0_45], %124 {strides = array<i32>} : memref<288x512xbf16, #tpu.memory_space<vmem>>, vector<32x512xbf16>,
    %c1_i32_46 = arith.constant 1 : i32
    %126 = tpu.dynamic_rotate %107 by %c1_i32_46 dim 1 : vector<32x512xf32>, i32 -> vector<32x512xf32>
    %127 = vector.extract_strided_slice %0 {offsets = [3, 0], sizes = [1, 512], strides = [1, 1]} : vector<9x512xf32> to vector<1x512xf32>
    %128 = vector.broadcast %127 : vector<1x512xf32> to vector<32x512xf32>
    %129 = arith.mulf %126, %128 : vector<32x512xf32>
    %130 = arith.truncf %129 : vector<32x512xf32> to vector<32x512xbf16>
    %c96 = arith.constant 96 : index
    %c0_47 = arith.constant 0 : index
    %131 = vector.load %arg11[%c96, %c0_47] : memref<288x512xbf16, #tpu.memory_space<vmem>>, vector<32x512xbf16>
    tpu.vector_store %arg11[%c96, %c0_47], %130 {strides = array<i32>} : memref<288x512xbf16, #tpu.memory_space<vmem>>, vector<32x512xbf16>,
    %132 = arith.truncf %107 : vector<32x512xf32> to vector<32x512xbf16>
    %c128_48 = arith.constant 128 : index
    %c0_49 = arith.constant 0 : index
    %133 = vector.load %arg11[%c128_48, %c0_49] : memref<288x512xbf16, #tpu.memory_space<vmem>>, vector<32x512xbf16>
    tpu.vector_store %arg11[%c128_48, %c0_49], %132 {strides = array<i32>} : memref<288x512xbf16, #tpu.memory_space<vmem>>, vector<32x512xbf16>,
    %c511_i32_50 = arith.constant 511 : i32
    %134 = tpu.dynamic_rotate %107 by %c511_i32_50 dim 1 : vector<32x512xf32>, i32 -> vector<32x512xf32>
    %135 = vector.extract_strided_slice %0 {offsets = [5, 0], sizes = [1, 512], strides = [1, 1]} : vector<9x512xf32> to vector<1x512xf32>
    %136 = vector.broadcast %135 : vector<1x512xf32> to vector<32x512xf32>
    %137 = arith.mulf %134, %136 : vector<32x512xf32>
    %138 = arith.truncf %137 : vector<32x512xf32> to vector<32x512xbf16>
    %c160 = arith.constant 160 : index
    %c0_51 = arith.constant 0 : index
    %139 = vector.load %arg11[%c160, %c0_51] : memref<288x512xbf16, #tpu.memory_space<vmem>>, vector<32x512xbf16>
    tpu.vector_store %arg11[%c160, %c0_51], %138 {strides = array<i32>} : memref<288x512xbf16, #tpu.memory_space<vmem>>, vector<32x512xbf16>,
    %c497_i32_52 = arith.constant 497 : i32
    %140 = tpu.dynamic_rotate %107 by %c497_i32_52 dim 1 : vector<32x512xf32>, i32 -> vector<32x512xf32>
    %141 = vector.extract_strided_slice %0 {offsets = [6, 0], sizes = [1, 512], strides = [1, 1]} : vector<9x512xf32> to vector<1x512xf32>
    %142 = vector.broadcast %141 : vector<1x512xf32> to vector<32x512xf32>
    %143 = arith.mulf %140, %142 : vector<32x512xf32>
    %144 = arith.truncf %143 : vector<32x512xf32> to vector<32x512xbf16>
    %c192_53 = arith.constant 192 : index
    %c0_54 = arith.constant 0 : index
    %145 = vector.load %arg11[%c192_53, %c0_54] : memref<288x512xbf16, #tpu.memory_space<vmem>>, vector<32x512xbf16>
    tpu.vector_store %arg11[%c192_53, %c0_54], %144 {strides = array<i32>} : memref<288x512xbf16, #tpu.memory_space<vmem>>, vector<32x512xbf16>,
    %c496_i32_55 = arith.constant 496 : i32
    %146 = tpu.dynamic_rotate %107 by %c496_i32_55 dim 1 : vector<32x512xf32>, i32 -> vector<32x512xf32>
    %147 = vector.extract_strided_slice %0 {offsets = [7, 0], sizes = [1, 512], strides = [1, 1]} : vector<9x512xf32> to vector<1x512xf32>
    %148 = vector.broadcast %147 : vector<1x512xf32> to vector<32x512xf32>
    %149 = arith.mulf %146, %148 : vector<32x512xf32>
    %150 = arith.truncf %149 : vector<32x512xf32> to vector<32x512xbf16>
    %c224 = arith.constant 224 : index
    %c0_56 = arith.constant 0 : index
    %151 = vector.load %arg11[%c224, %c0_56] : memref<288x512xbf16, #tpu.memory_space<vmem>>, vector<32x512xbf16>
    tpu.vector_store %arg11[%c224, %c0_56], %150 {strides = array<i32>} : memref<288x512xbf16, #tpu.memory_space<vmem>>, vector<32x512xbf16>,
    %c495_i32_57 = arith.constant 495 : i32
    %152 = tpu.dynamic_rotate %107 by %c495_i32_57 dim 1 : vector<32x512xf32>, i32 -> vector<32x512xf32>
    %153 = vector.extract_strided_slice %0 {offsets = [8, 0], sizes = [1, 512], strides = [1, 1]} : vector<9x512xf32> to vector<1x512xf32>
    %154 = vector.broadcast %153 : vector<1x512xf32> to vector<32x512xf32>
    %155 = arith.mulf %152, %154 : vector<32x512xf32>
    %156 = arith.truncf %155 : vector<32x512xf32> to vector<32x512xbf16>
    %c256_58 = arith.constant 256 : index
    %c0_59 = arith.constant 0 : index
    %157 = vector.load %arg11[%c256_58, %c0_59] : memref<288x512xbf16, #tpu.memory_space<vmem>>, vector<32x512xbf16>
    tpu.vector_store %arg11[%c256_58, %c0_59], %156 {strides = array<i32>} : memref<288x512xbf16, #tpu.memory_space<vmem>>, vector<32x512xbf16>,
    %c0_60 = arith.constant 0 : index
    %c0_61 = arith.constant 0 : index
    %158 = vector.load %arg7[%c0_60, %c0_61] : memref<4x288xbf16, #tpu.memory_space<vmem>>, vector<4x288xbf16>
    %c0_62 = arith.constant 0 : index
    %c0_63 = arith.constant 0 : index
    %159 = vector.load %arg11[%c0_62, %c0_63] : memref<288x512xbf16, #tpu.memory_space<vmem>>, vector<288x512xbf16>
    %cst_64 = arith.constant dense<0.000000e+00> : vector<4x512xf32>
    %160 = tpu.matmul %158, %159, %cst_64 {dimension_numbers = #tpu.dot_dimension_numbers<[1], [0], [0], [1], [0, 0, 1, 1], [], []>} : vector<4x288xbf16>, vector<288x512xbf16>, vector<4x512xf32> -> vector<4x512xf32>
    %c0_65 = arith.constant 0 : index
    %c0_66 = arith.constant 0 : index
    %161 = vector.load %arg8[%c0_65, %c0_66] : memref<4x1xf32, #tpu.memory_space<vmem>>, vector<4x1xf32>
    %162 = vector.broadcast %161 : vector<4x1xf32> to vector<4x512xf32>
    %163 = arith.addf %160, %162 : vector<4x512xf32>
    %cst_67 = arith.constant 0.000000e+00 : f32
    %164 = vector.broadcast %cst_67 : f32 to vector<4x512xf32>
    %165 = arith.maximumf %163, %164 : vector<4x512xf32>
    %166 = vector.extract_strided_slice %106 {offsets = [0, 0], sizes = [4, 512], strides = [1, 1]} : vector<36x512xf32> to vector<4x512xf32>
    %167 = tpu.concatenate %166, %165 in 0 : vector<4x512xf32>, vector<4x512xf32> -> vector<8x512xf32>
    %c0_68 = arith.constant 0 : index
    %c8 = arith.constant 8 : index
    %c0_69 = arith.constant 0 : index
    %168 = vector.load %arg9[%c0_68, %c8, %c0_69] : memref<1x16x512xf32, #tpu.memory_space<vmem>>, vector<1x8x512xf32>
    %169 = vector.shape_cast %168 : vector<1x8x512xf32> to vector<8x512xf32>
    %170 = vector.shape_cast %167 : vector<8x512xf32> to vector<1x8x512xf32>
    tpu.vector_store %arg9[%c0_68, %c8, %c0_69], %170 {strides = array<i32>} : memref<1x16x512xf32, #tpu.memory_space<vmem>>, vector<1x8x512xf32>,
    return
  }
  func.func @transform_0(%arg0: i32) -> (i32, i32, i32) {
    %c0_i32 = arith.constant 0 : i32
    %c0_i32_0 = arith.constant 0 : i32
    %c0_i32_1 = arith.constant 0 : i32
    return %arg0, %c0_i32, %c0_i32_0 : i32, i32, i32
  }
  func.func @transform_1(%arg0: i32) -> (i32, i32) {
    %c0_i32 = arith.constant 0 : i32
    %c0_i32_0 = arith.constant 0 : i32
    %c0_i32_1 = arith.constant 0 : i32
    return %c0_i32, %c0_i32_0 : i32, i32
  }
  func.func @transform_2(%arg0: i32) -> (i32, i32) {
    %c0_i32 = arith.constant 0 : i32
    %c0_i32_0 = arith.constant 0 : i32
    %c0_i32_1 = arith.constant 0 : i32
    return %c0_i32, %c0_i32_0 : i32, i32
  }
  func.func @transform_3(%arg0: i32) -> (i32, i32) {
    %c0_i32 = arith.constant 0 : i32
    %c0_i32_0 = arith.constant 0 : i32
    %c0_i32_1 = arith.constant 0 : i32
    return %c0_i32, %c0_i32_0 : i32, i32
  }
  func.func @transform_4(%arg0: i32) -> (i32, i32) {
    %c0_i32 = arith.constant 0 : i32
    %c0_i32_0 = arith.constant 0 : i32
    %c0_i32_1 = arith.constant 0 : i32
    return %c0_i32, %c0_i32_0 : i32, i32
  }
  func.func @transform_5(%arg0: i32) -> (i32, i32) {
    %c0_i32 = arith.constant 0 : i32
    %c0_i32_0 = arith.constant 0 : i32
    %c0_i32_1 = arith.constant 0 : i32
    return %c0_i32, %c0_i32_0 : i32, i32
  }
  func.func @transform_6(%arg0: i32) -> (i32, i32) {
    %c0_i32 = arith.constant 0 : i32
    %c0_i32_0 = arith.constant 0 : i32
    %c0_i32_1 = arith.constant 0 : i32
    return %c0_i32, %c0_i32_0 : i32, i32
  }
  func.func @transform_7(%arg0: i32) -> (i32, i32) {
    %c0_i32 = arith.constant 0 : i32
    %c0_i32_0 = arith.constant 0 : i32
    %c0_i32_1 = arith.constant 0 : i32
    return %c0_i32, %c0_i32_0 : i32, i32
  }
  func.func @transform_8(%arg0: i32) -> (i32, i32, i32) {
    %c0_i32 = arith.constant 0 : i32
    %c0_i32_0 = arith.constant 0 : i32
    %c0_i32_1 = arith.constant 0 : i32
    return %arg0, %c0_i32, %c0_i32_0 : i32, i32, i32
  }
}

</mosaic_0001>

<bundles_post_ra>
// kernel: tpu_custom_call.1
= control target key start
LH: loop header
LB: loop body
LE: loop exit
PB: predicated region body
PF: predicated region fallthrough
CT: control target
= control target key end

     0   :  { %13 = vsyncpa [#allocation5], 0  ;;  %s8886_s0 = inlined_call_operand.hbm [shape: f32[2,4,512], index: 0, kind: input, shape index: {}]   ;;  %s8887_s1 = inlined_call_operand.vmem [shape: f32[9,512], index: 1, kind: input, shape index: {}]   ;;  %s8888_s2 = inlined_call_operand.vmem [shape: bf16[72,36], index: 2, kind: input, shape index: {}]   ;;  %s8889_s3 = inlined_call_operand.vmem [shape: f32[72,1], index: 3, kind: input, shape index: {}]   ;;  %s8890_s4 = inlined_call_operand.vmem [shape: bf16[36,576], index: 4, kind: input, shape index: {}]   ;;  %s8891_s5 = inlined_call_operand.vmem [shape: f32[36,1], index: 5, kind: input, shape index: {}]   ;;  %s8892_s6 = inlined_call_operand.vmem [shape: bf16[4,288], index: 6, kind: input, shape index: {}]   ;;  %s8893_s7 = inlined_call_operand.vmem [shape: f32[4,1], index: 7, kind: input, shape index: {}]   ;;  %s8894_s8 = inlined_call_operand.hbm [shape: f32[2,16,512], index: 8, kind: output, shape index: {}]  }
   0x1   :  { %15 = vsyncpa [#allocation5 + $0x1], 0 }
   0x2   :  { %16 = vsyncpa [#allocation6], 0 }
   0x3   :  { %18 = vsyncpa [#allocation6 + $0x1], 0  ;;  %s4505_s27 = smov 0   ;;  %s4507_s28 = smov 0  }
   0x4   :  { %s4509_s29 = smov 0   ;;  %s4511_s30 = smov 0  }
   0x5 LB: > { %s4526_s9 = sadd.s32 4294967295, %s4444_s30   ;;  %s4113_s10 = sadd.s32 4294967294, %s4444_s30   ;;  %s4444_s30 = sphi %s4511_s30, %s9889_s30   ;;  %s4440_s29 = sphi %s4509_s29, %s9888_s29   ;;  %s4436_s28 = sphi %s4507_s28, %s9887_s28   ;;  %s4432_s27 = sphi %s4505_s27, %s9886_s27  }
   0x6   : > { %s4530_s11 = sadd.s32 1, %s4444_s30   ;;  %s31_s12 = sadd.s32 1, %s4440_s29 }
   0x7   : > { %s28_s13 = ssub.s32 %s4444_s30, %s4530_s11  ;;  %p38_p0 = scmp.ne.s32.totalorder %s4440_s29, %s4436_s28 }
   0x8   : > { %p29_p1 = scmp.eq.s32.totalorder %s28_s13, 0  ;;  %p39_p2 = scmp.eq.s32.totalorder %s4444_s30, 0 }
   0x9   : > { %p44_p3 = scmp.ne.s32.totalorder %s4436_s28, %s4432_s27  ;;  %p45_p4 = scmp.eq.s32.totalorder %s4526_s9, 0 }
   0xa   : > { %s4542_s14 = scalar_select %p29_p1, %s4440_s29, %s31_s12  }
   0xb   : > { %p4544_p5 = por %p39_p2, %p38_p0  ;;  %p4548_p6 = por %p45_p4, %p44_p3 }
   0xc   : > { %p215_p7 = scmp.eq.s32.totalorder %s4526_s9, 1  ;;  %p221_p8 = scmp.eq.s32.totalorder %s4113_s10, 1 }
   0xd   : > { %p4265_p10 = scmp.lt.s32.totalorder %s4444_s30, 2  ;;  %s262_s19 = sand.u32 1, %s4440_s29  }
   0xe   : > { %p4555_p11 = por %p215_p7, %p38_p0  ;;  %p4559_p12 = por %p221_p8, %p44_p3 }
   0xf   : > { %s4171_s20 = sshll.u32 %s4444_s30, 8  ;;  %s4116_s21 = sshll.u32 %s262_s19, 4 }
  0x10   : > { %s9257_s17 = scalar_select %p4555_p11, 1, 0 }
  0x11   : > { %s9258_s18 = scalar_select %p4559_p12, 1, 0 }
  0x12   : > { %s4568_s24 = scalar_lea.hbm %s8886_s0, %s4171_s20  ;;  %s266_s25 = scalar_lea.vmem [#allocation4], %s4116_s21 }
  0x13   : > { %s274_s26 = sshll.u32 %s266_s25, 4  ;;  %p4572_p13 = pnand %p4265_p10, %p4544_p5  ;;  %s4576_s26 = int_to_ptr.vmem [resolvable:$true] %s274_s26 }
  0x14   : > { %s263_s12 = scalar_lea.sflag [#allocation5], %s262_s19  ;;  %s4348_s13 = scalar_lea.hbm %s4568_s24, 256 }
  0x15   : > { %p4349_p2 = scmp.ne.s32.totalorder %s4568_s24, %s4348_s13  ;;  %p4350_p3 = pneg %p4572_p13 }
  0x16   : > { %s4353_s21 = scalar_lea.hbm %s8886_s0, 512  ;;  %p4354_p5 = scmp.lt.u32.totalorder %s4568_s24, %s8886_s0 }
  0x17   : > { %p4351_p4 = pnand %p4350_p3, %p4349_p2  ;;  %p4355_p8 = scmp.lt.u32.totalorder %s4353_s21, %s4348_s13 }
  0x18   : > { %p4357_p9 = scmp.lt.u32.totalorder %s4348_s13, %s4568_s24 }
  0x19   : > { %p4352_p7 = pneg %p4351_p4  ;;  %p4356_p10 = por %p4355_p8, %p4354_p5 }
  0x1b   : > { %p4358_p0 = por %p4357_p9, %p4356_p10 }
  0x1d   : > { %p4359_p1 = pnand %p4358_p0, %p4352_p7 }
  0x1f   : > { %4362 = shalt.err (!%p4359_p1)
}
  0x20   : > { %s4363_s19 = scalar_lea.vmem %s4576_s26, 256  ;;  %s4446_s25 = smov [#allocation4]  }
  0x21   : > { %p4364_p2 = scmp.ne.s32.totalorder %s4576_s26, %s4363_s19  ;;  %s4368_s15 = sshll.u32 %s4446_s25, 4  ;;  %s4369_s15 = int_to_ptr.vmem [resolvable:$false] %s4368_s15 }
  0x22   : > { %s4370_s20 = scalar_lea.vmem %s4369_s15, 512  ;;  %p4371_p11 = scmp.lt.s32.totalorder %s4576_s26, %s4369_s15 }
  0x23   : > { %p4366_p4 = pnand %p4364_p2, %p4350_p3  ;;  %p4372_p5 = scmp.lt.s32.totalorder %s4370_s20, %s4363_s19 }
  0x25   : > { %p4367_p12 = pneg %p4366_p4  ;;  %p4373_p8 = por %p4372_p5, %p4371_p11 }
  0x27   : > { %p4374_p9 = pnand %p4373_p8, %p4367_p12 }
  0x29   : > { %4377 = shalt.err (!%p4374_p9)
}
  0x2a   : > { %4260 = dma.hbm_to_vmem [thread:$0]  (!%p4572_p13), %s4568_s24, 256, %s4576_s26, %s263_s12  }
  0x2b   : > { %p9260_p0 = scmp.lt.s32.totalorder %s4444_s30, 3  ;;  %p9261_p1 = scmp.ge.s32.totalorder %s4444_s30, 1 }
  0x2d   : > { %p280_p3 = pnand %p9261_p1, %p9260_p0 }
  0x2f   : > { %283 = sbr.rel (%p280_p3) target bundleno = 1943 (0x797), region = 52 }
  0x36   : > { %s4610_s13 = sand.u32 1, %s4436_s28  }
  0x37   : > { %s4120_s21 = sshll.u32 %s4610_s13, 4  ;;  %s286_s22 = scalar_lea.sflag [#allocation5], %s4610_s13 }
  0x38   : > { %s289_s23 = scalar_lea.vmem [#allocation4], %s4120_s21 }
  0x39   : > { %4423 = dma.done.wait (%p4548_p6), %s286_s22, 256  }
  0x3a   : > { %4425 = vsyncadd (%p4548_p6), %s286_s22, 4294967040  ;;  %v4618_v0 = vld [vmem:[%s289_s23 + $0x8] sm:$0xff]  ;;  %v4620_v1 = vld [vmem:[%s289_s23] sm:$0xff]  ;;  %s9166_s24 = smov 16   ;;  %s8902_s16 = smov 1   ;;  %v8908_v4 = vmov 0   ;;  %v347_v15 = vlaneseq }
  0x3b   : > { %378 = vrot.lane.b32.xlu1 %v4618_v0, %s9166_s24  ;;  %374 = vrot.lane.b32.xlu0 %v4620_v1, %s9166_s24  ;;  %v4628_v2 = vcombine.high %v4618_v0, %v4618_v0  ;;  %v4636_v3 = vcombine.high %v4620_v1, %v4620_v1  ;;  %s9168_s26 = smov 17   ;;  %s8906_s10 = smov 15   ;;  %v693_v5 = vld [vmem:[%s8889_s3 + $0x10] sm:$0xff]  ;;  %v692_v6 = vld [vmem:[%s8889_s3 + $0x8] sm:$0xff]  ;;  %vm653_vm4 = vcmask 1043456   ;;  %vm784_vm9 = vcmask 1041408  }
  0x3c   : > { %s8900_s12 = smov 127   ;;  %s8896_s19 = smov 112   ;;  %829 = vmatprep.mubr.bf16.mxu0 %v8908_v4  ;;  %910 = vmatprep.mubr.bf16.mxu1 %v8908_v4  ;;  %v694_v7 = vld [vmem:[%s8889_s3 + $0x18] sm:$0xff]  ;;  %v695_v8 = vld [vmem:[%s8889_s3 + $0x20] sm:$0xff]  ;;  %v696_v9 = vld [vmem:[%s8889_s3 + $0x28] sm:$0xff]  ;;  %v4722_v18 = vshrl.u32 %v347_v15, 7 }
  0x3d   : > { %s8898_s25 = smov 113   ;;  %4312 = vset.pattern.permute.xlu1 %v8908_v4  ;;  %4311 = vset.pattern.permute.xlu0 %v8908_v4  ;;  %s8904_s15 = smov 111   ;;  %v697_v10 = vld [vmem:[%s8889_s3 + $0x30] sm:$0xff]  ;;  %v698_v11 = vld [vmem:[%s8889_s3 + $0x38] sm:$0xff]  ;;  %v699_v12 = vld [vmem:[%s8889_s3 + $0x40] sm:$0xff]  ;;  %v4724_v21 = vand.u32 127, %v347_v15 }
  0x3e   : > { %9262 = vst [vmem:[#allocation10_spill] sm:$0xff] %v4722_v18  ;;  %v389_v22 = vsub.s32 1, %v4722_v18  ;;  %v4730_v23 = vld [vmem:[%s8887_s1] sm:$0xff]  ;;  %v455_v24 = vsub.s32 3, %v4722_v18  ;;  %v4736_v27 = vld [vmem:[%s8887_s1 + $0x18] sm:$0xff]  ;;  %v4741_v28 = vld [vmem:[%s8887_s1 + $0x8] sm:$0xff] }
  0x3f   : > { %380 = vrot.lane.b32.xlu1 %v4628_v2, %s9166_s24  ;;  %440 = vrot.lane.b32.xlu0 %v4620_v1, %s8902_s16  ;;  %vm349_vm0 = vcmp.lt.s32.totalorder %v4724_v21, 17  ;;  %v4747_v29 = vld [vmem:[%s8887_s1 + $0x10] sm:$0xff]  ;;  %v356_v30 = vsub.s32 0, %v4722_v18  ;;  %vm382_vm1 = vcmp.lt.s32.totalorder %v4724_v21, 16  ;;  %vm415_vm2 = vcmp.lt.s32.totalorder %v4724_v21, 15  ;;  %s9299_s22 = smov 15  }
  0x40   : > { %vm448_vm3 = vcmp.lt.s32.totalorder %v4724_v21, 1  ;;  %v4754_v31 = vrot.slane %v4730_v23, %v389_v22  ;;  %v4757_v32 = vrot.slane %v4736_v27, %v389_v22  ;;  %v4760_v33 = vrot.slane %v4741_v28, %v455_v24  ;;  %s9300_s23 = smov 1   ;;  %s4172_s20 = sshll.u32 %s4526_s9, 10 }
  0x41   : > { %v4763_v34 = vrot.slane %v4741_v28, %v389_v22  ;;  %v422_v37 = vsub.s32 2, %v4722_v18  ;;  %v4767_v38 = vrot.slane %v4747_v29, %v389_v22  ;;  %v4770_v39 = vrot.slane %v4730_v23, %v455_v24  ;;  %s4027_s9 = scalar_lea.sflag [#allocation6], %s4610_s13  ;;  %p9883_p11 = scmp.ne.s32.totalorder %s9257_s17, 0 }
  0x42   : > { %9263 = vst [vmem:[#allocation11_spill] sm:$0xff] %v4754_v31  ;;  %9264 = vst [vmem:[#allocation12_spill] sm:$0xff] %v4757_v32  ;;  %v4773_v40 = vrot.slane %v4747_v29, %v455_v24  ;;  %v4776_v41 = vrot.slane %v4736_v27, %v455_v24  ;;  %v4783_v44 = vrot.slane %v4741_v28, %v356_v30  ;;  %vm481_vm5 = vcmp.lt.s32.totalorder %v4724_v21, 127 }
  0x43   : > { %442 = vrot.lane.b32.xlu1 %v4636_v3, %s8902_s16  ;;  %376 = vrot.lane.b32.xlu0 %v4636_v3, %s9166_s24  ;;  %9265 = vst [vmem:[#allocation13_spill] sm:$0xff] %v4760_v33  ;;  %9266 = vst [vmem:[#allocation14_spill] sm:$0xff] %v4763_v34  ;;  %v4790_v47 = vrot.slane %v4730_v23, %v356_v30  ;;  %v4793_v48 = vrot.slane %v4747_v29, %v356_v30  ;;  %vm547_vm6 = vcmp.lt.s32.totalorder %v4724_v21, 112  ;;  %vm768_vm10 = vcmask 293888  }
  0x44   : > { %9267 = vst [vmem:[#allocation15_spill] sm:$0xff] %v4767_v38  ;;  %9268 = vst [vmem:[#allocation16_spill] sm:$0xff] %v4770_v39  ;;  %v4800_v53 = vrot.slane %v4736_v27, %v356_v30  ;;  %v4803_v54 = vrot.slane %v4741_v28, %v422_v37  ;;  %v4814_v61 = vrot.slane %v4730_v23, %v422_v37  ;;  %vm514_vm7 = vcmp.lt.s32.totalorder %v4724_v21, 113 }
  0x45   : > { %9269 = vst [vmem:[#allocation17_spill] sm:$0xff] %v4773_v40  ;;  %9270 = vst [vmem:[#allocation18_spill] sm:$0xff] %v4776_v41  ;;  %v4817_v62 = vrot.slane %v4747_v29, %v422_v37  ;;  %vm580_vm8 = vcmp.lt.s32.totalorder %v4724_v21, 111  ;;  %vm2567_vm11 = vcmask 523264   ;;  %vm3379_vm12 = vcmask 1045504  }
  0x46   : > { %9271 = vst [vmem:[#allocation19_spill] sm:$0xff] %v4783_v44  ;;  %9272 = vst [vmem:[#allocation20_spill] sm:$0xff] %v4790_v47  ;;  %vm3834_vm13 = vcmask 261120  }
  0x47   : > { %446 = vrot.lane.b32.xlu1 %v4628_v2, %s8902_s16  ;;  %444 = vrot.lane.b32.xlu0 %v4618_v0, %s8902_s16  ;;  %9273 = vst [vmem:[#allocation21_spill] sm:$0xff] %v4793_v48  ;;  %9274 = vst [vmem:[#allocation22_spill] sm:$0xff] %v4800_v53  ;;  %s9677_s16 = smov 17  }
  0x48   : > { %9275 = vst [vmem:[#allocation23_spill] sm:$0xff] %v4803_v54  ;;  %9276 = vst [vmem:[#allocation24_spill] sm:$0xff] %v4814_v61 }
  0x49   : > { %9277 = vst [vmem:[#allocation25_spill] sm:$0xff] %v4817_v62 }
  0x4b   : > { %341 = vrot.lane.b32.xlu1 %v4636_v3, %s9168_s26  ;;  %339 = vrot.lane.b32.xlu0 %v4620_v1, %s9168_s26 }
  0x4f   : > { %345 = vrot.lane.b32.xlu1 %v4628_v2, %s9168_s26  ;;  %343 = vrot.lane.b32.xlu0 %v4618_v0, %s9168_s26 }
  0x53   : > { %409 = vrot.lane.b32.xlu1 %v4636_v3, %s8906_s10  ;;  %407 = vrot.lane.b32.xlu0 %v4620_v1, %s8906_s10 }
  0x57   : > { %413 = vrot.lane.b32.xlu1 %v4628_v2, %s8906_s10  ;;  %411 = vrot.lane.b32.xlu0 %v4618_v0, %s8906_s10  ;;  %s9679_s10 = smov 16  }
  0x5b   : > { %475 = vrot.lane.b32.xlu1 %v4636_v3, %s8900_s12  ;;  %473 = vrot.lane.b32.xlu0 %v4620_v1, %s8900_s12 }
  0x5f   : > { %479 = vrot.lane.b32.xlu1 %v4628_v2, %s8900_s12  ;;  %477 = vrot.lane.b32.xlu0 %v4618_v0, %s8900_s12  ;;  %s9431_s12 = smov 112  }
  0x63   : > { %541 = vrot.lane.b32.xlu1 %v4636_v3, %s8896_s19  ;;  %539 = vrot.lane.b32.xlu0 %v4620_v1, %s8896_s19 }
  0x67   : > { %545 = vrot.lane.b32.xlu1 %v4628_v2, %s8896_s19  ;;  %543 = vrot.lane.b32.xlu0 %v4618_v0, %s8896_s19  ;;  %s9301_s19 = smov 127  }
  0x6b   : > { %508 = vrot.lane.b32.xlu1 %v4636_v3, %s8898_s25  ;;  %506 = vrot.lane.b32.xlu0 %v4620_v1, %s8898_s25 }
  0x6f   : > { %512 = vrot.lane.b32.xlu1 %v4628_v2, %s8898_s25  ;;  %510 = vrot.lane.b32.xlu0 %v4618_v0, %s8898_s25  ;;  %s9395_s25 = smov 113  }
  0x73   : > { %574 = vrot.lane.b32.xlu1 %v4636_v3, %s8904_s15  ;;  %572 = vrot.lane.b32.xlu0 %v4620_v1, %s8904_s15 }
  0x77   : > { %578 = vrot.lane.b32.xlu1 %v4628_v2, %s8904_s15  ;;  %576 = vrot.lane.b32.xlu0 %v4618_v0, %s8904_s15  ;;  %s9574_s15 = smov 111  }
  0x7b   : > { %712 = vperm.xlu1 %4312, %v693_v5   ;;  %707 = vperm.xlu0 %4311, %v692_v6  }
  0x7f   : > { %717 = vperm.xlu1 %4312, %v694_v7   ;;  %722 = vperm.xlu0 %4311, %v695_v8   ;;  %v4824_v7 = vrot.slane %v4736_v27, %v422_v37 }
  0x81   : > { %9278 = vst [vmem:[#allocation26_spill] sm:$0xff] %v4824_v7 }
  0x83   : > { %727 = vperm.xlu1 %4312, %v696_v9   ;;  %732 = vperm.xlu0 %4311, %v697_v10  }
  0x87   : > { %737 = vperm.xlu1 %4312, %v698_v11   ;;  %742 = vperm.xlu0 %4311, %v699_v12  }
  0xad   : > { %v379_v13 = vpop.permute.xlu1 %378  ;;  %v375_v14 = vpop.permute.xlu0 %374 }
  0xb1   : > { %v381_v16 = vpop.permute.xlu1 %380  ;;  %v441_v17 = vpop.permute.xlu0 %440 }
  0xb2   : > { %v383_v42 = vsel %vm382_vm1, %v379_v13, %v381_v16  ;;  %v386_v43 = vsel %vm382_vm1, %v381_v16, %v375_v14 }
  0xb3   : > { %v403_v55 = vmul.f32 %v4754_v31, %v386_v43  ;;  %v406_v56 = vmul.f32 %v4757_v32, %v383_v42 }
  0xb5   : > { %v443_v19 = vpop.permute.xlu1 %442  ;;  %v377_v20 = vpop.permute.xlu0 %376  ;;  %v612_v15 = vrot.slane %v406_v56, 4 }
  0xb6   : > { %v451_v45 = vsel %vm448_vm3, %v441_v17, %v443_v19  ;;  %v385_v46 = vsel %vm382_vm1, %v375_v14, %v377_v20  ;;  %v384_v49 = vsel %vm382_vm1, %v377_v20, %v379_v13  ;;  %v609_v14 = vrot.slane %v403_v55, 4 }
  0xb7   : > { %v470_v59 = vmul.f32 %v4760_v33, %v451_v45  ;;  %v404_v60 = vmul.f32 %v4763_v34, %v385_v46  ;;  %v405_v63 = vmul.f32 %v4767_v38, %v384_v49 }
  0xb9   : > { %v447_v25 = vpop.permute.xlu1 %446  ;;  %v445_v26 = vpop.permute.xlu0 %444  ;;  %v610_v20 = vrot.slane %v404_v60, 4 }
  0xba   : > { %v452_v50 = vsel %vm448_vm3, %v447_v25, %v441_v17  ;;  %v450_v57 = vsel %vm448_vm3, %v443_v19, %v445_v26  ;;  %v449_v6 = vsel %vm448_vm3, %v445_v26, %v447_v25  ;;  %v622_v19 = vrot.slane %v470_v59, 4 }
  0xbb   : > { %v469_v5 = vmul.f32 %v4770_v39, %v452_v50  ;;  %v471_v8 = vmul.f32 %v4773_v40, %v450_v57  ;;  %v472_v22 = vmul.f32 %v4776_v41, %v449_v6  ;;  %v611_v25 = vrot.slane %v405_v63, 4 }
  0xbd   : > { %v342_v35 = vpop.permute.xlu1 %341  ;;  %v340_v36 = vpop.permute.xlu0 %339  ;;  %v621_v26 = vrot.slane %v469_v5, 4  ;;  %v623_v37 = vrot.slane %v471_v8, 4  ;;  %v624_v55 = vrot.slane %v472_v22, 4 }
  0xbe   : > { %v352_v58 = vsel %vm349_vm0, %v340_v36, %v342_v35 }
  0xbf   : > { %v371_v9 = vmul.f32 %v4783_v44, %v352_v58 }
  0xc1   : > { %v346_v51 = vpop.permute.xlu1 %345  ;;  %v344_v52 = vpop.permute.xlu0 %343  ;;  %v655_v45 = vsel %vm653_vm4, %v371_v9, %v610_v20 }
  0xc2   : > { %v353_v10 = vsel %vm349_vm0, %v346_v51, %v340_v36  ;;  %v350_v11 = vsel %vm349_vm0, %v344_v52, %v346_v51  ;;  %v351_v16 = vsel %vm349_vm0, %v342_v35, %v344_v52 }
  0xc3   : > { %v370_v30 = vmul.f32 %v4790_v47, %v353_v10  ;;  %v373_v36 = vmul.f32 %v4800_v53, %v350_v11  ;;  %v372_v42 = vmul.f32 %v4793_v48, %v351_v16 }
  0xc5   : > { %v410_v12 = vpop.permute.xlu1 %409  ;;  %v408_v13 = vpop.permute.xlu0 %407  ;;  %v654_v59 = vsel %vm653_vm4, %v370_v30, %v609_v14  ;;  %v657_v60 = vsel %vm653_vm4, %v373_v36, %v612_v15  ;;  %v656_v9 = vsel %vm653_vm4, %v372_v42, %v611_v25  ;;  %v488_v14 = vsub.s32 5, %v4722_v18 }
  0xc6   : > { %v418_v17 = vsel %vm415_vm2, %v408_v13, %v410_v12  ;;  %v554_v15 = vsub.s32 7, %v4722_v18 }
  0xc7   : > { %v437_v24 = vmul.f32 %v4803_v54, %v418_v17  ;;  %v4863_v22 = vrot.slane %v4730_v23, %v488_v14  ;;  %v4867_v25 = vrot.slane %v4736_v27, %v488_v14  ;;  %v4873_v30 = vrot.slane %v4747_v29, %v488_v14 }
  0xc8   : > { %v4876_v36 = vrot.slane %v4730_v23, %v554_v15 }
  0xc9   : > { %v414_v43 = vpop.permute.xlu1 %413  ;;  %v412_v35 = vpop.permute.xlu0 %411  ;;  %v659_v46 = vsel %vm653_vm4, %v437_v24, %v622_v19  ;;  %9279 = vst [vmem:[#allocation27_spill] sm:$0xff] %v4863_v22  ;;  %v521_v24 = vsub.s32 6, %v4722_v18  ;;  %9280 = vst [vmem:[#allocation28_spill] sm:$0xff] %v4867_v25 }
  0xca   : > { %v419_v49 = vsel %vm415_vm2, %v414_v43, %v408_v13  ;;  %v416_v50 = vsel %vm415_vm2, %v412_v35, %v414_v43  ;;  %v417_v51 = vsel %vm415_vm2, %v410_v12, %v412_v35  ;;  %v671_v52 = vpack.c.bf16 %v659_v46, %v655_v45  ;;  %9282 = vst [vmem:[#allocation30_spill] sm:$0xff] %v4873_v30 }
  0xcb   : > { %v436_v56 = vmul.f32 %v4814_v61, %v419_v49  ;;  %v438_v57 = vmul.f32 %v4817_v62, %v417_v51  ;;  %v439_v58 = vmul.f32 %v4824_v7, %v416_v50  ;;  %9283 = vst [vmem:[#allocation31_spill] sm:$0xff] %v4876_v36  ;;  %v4885_v45 = vrot.slane %v4736_v27, %v554_v15 }
  0xcc   : > { %797 = vmatprep.subr.bf16.mxu0 %v671_v52  ;;  %v4894_v52 = vrot.slane %v4741_v28, %v554_v15 }
  0xcd   : > { %v476_v63 = vpop.permute.xlu1 %475  ;;  %v474_v5 = vpop.permute.xlu0 %473  ;;  %v658_v6 = vsel %vm653_vm4, %v436_v56, %v621_v26  ;;  %v661_v8 = vsel %vm653_vm4, %v439_v58, %v624_v55  ;;  %v660_v10 = vsel %vm653_vm4, %v438_v57, %v623_v37  ;;  %v4870_v26 = vrot.slane %v4741_v28, %v488_v14  ;;  %9284 = vst [vmem:[#allocation32_spill] sm:$0xff] %v4885_v45 }
  0xce   : > { %v670_v11 = vpack.c.bf16 %v658_v6, %v654_v59  ;;  %v673_v12 = vpack.c.bf16 %v661_v8, %v657_v60  ;;  %v672_v13 = vpack.c.bf16 %v660_v10, %v656_v9  ;;  %v484_v37 = vsel %vm481_vm5, %v474_v5, %v476_v63  ;;  %9285 = vst [vmem:[#allocation33_spill] sm:$0xff] %v4894_v52 }
  0xcf   : > { %9281 = vst [vmem:[#allocation29_spill] sm:$0xff] %v4870_v26  ;;  %v4900_v56 = vrot.slane %v4747_v29, %v554_v15  ;;  %v4903_v57 = vrot.slane %v4730_v23, %v521_v24  ;;  %v502_v58 = vmul.f32 %v4863_v22, %v484_v37 }
  0xd0   : > { %798 = vmatpush1.bf16.msra.mxu0 %v670_v11  ;;  %878 = vmatprep.subr.bf16.mxu1 %v673_v12 }
  0xd1   : > { %v480_v16 = vpop.permute.xlu1 %479  ;;  %v478_v17 = vpop.permute.xlu0 %477  ;;  %879 = vmatpush1.bf16.msra.mxu1 %v672_v13  ;;  %9286 = vst [vmem:[#allocation34_spill] sm:$0xff] %v4900_v56  ;;  %9287 = vst [vmem:[#allocation35_spill] sm:$0xff] %v4903_v57  ;;  %v4918_v13 = vrot.slane %v4736_v27, %v521_v24  ;;  %v633_v14 = vrot.slane %v502_v58, 4 }
  0xd2   : > { %v485_v42 = vsel %vm481_vm5, %v480_v16, %v474_v5  ;;  %v483_v43 = vsel %vm481_vm5, %v476_v63, %v478_v17  ;;  %v482_v49 = vsel %vm481_vm5, %v478_v17, %v480_v16  ;;  %v4921_v16 = vrot.slane %v4741_v28, %v521_v24 }
  0xd3   : > { %v505_v59 = vmul.f32 %v4867_v25, %v485_v42  ;;  %v503_v60 = vmul.f32 %v4870_v26, %v483_v43  ;;  %v504_v5 = vmul.f32 %v4873_v30, %v482_v49  ;;  %9288 = vst [vmem:[#allocation36_spill] sm:$0xff] %v4918_v13  ;;  %v4924_v17 = vrot.slane %v4747_v29, %v521_v24 }
  0xd4   : > { %9289 = vst [vmem:[#allocation37_spill] sm:$0xff] %v4921_v16 }
  0xd5   : > { %v542_v19 = vpop.permute.xlu1 %541  ;;  %v540_v20 = vpop.permute.xlu0 %539  ;;  %9290 = vst [vmem:[#allocation38_spill] sm:$0xff] %v4924_v17  ;;  %v636_v15 = vrot.slane %v505_v59, 4  ;;  %v635_v37 = vrot.slane %v504_v5, 4  ;;  %v4122_v5 = vld [vmem:[%s8887_s1 + $0x20] ss:$0 sm:$0xff] }
  0xd6   : > { %v550_v50 = vsel %vm547_vm6, %v540_v20, %v542_v19 }
  0xd7   : > { %v568_v6 = vmul.f32 %v4876_v36, %v550_v50  ;;  %v665_v59 = vsel %vm653_vm4, %v4628_v2, %v636_v15 }
  0xd9   : > { %v546_v35 = vpop.permute.xlu1 %545  ;;  %v544_v46 = vpop.permute.xlu0 %543  ;;  %v645_v42 = vrot.slane %v568_v6, 4 }
  0xda   : > { %v551_v51 = vsel %vm547_vm6, %v546_v35, %v540_v20  ;;  %v549_v55 = vsel %vm547_vm6, %v542_v19, %v544_v46  ;;  %v548_v63 = vsel %vm547_vm6, %v544_v46, %v546_v35  ;;  %v634_v19 = vrot.slane %v503_v60, 4 }
  0xdb   : > { %v571_v8 = vmul.f32 %v4885_v45, %v551_v51  ;;  %v569_v23 = vmul.f32 %v4894_v52, %v549_v55  ;;  %v570_v12 = vmul.f32 %v4900_v56, %v548_v63  ;;  %v662_v60 = vsel %vm653_vm4, %v4620_v1, %v633_v14 }
  0xdc   : > { %v663_v58 = vsel %vm653_vm4, %v4636_v3, %v634_v19  ;;  %v664_v3 = vsel %vm653_vm4, %v4618_v0, %v635_v37  ;;  %v4125_v19 = vld [vmem:[%s8887_s1 + $0x38] ss:$0 sm:$0xff]  ;;  %v4123_v0 = vld [vmem:[%s8887_s1 + $0x28] ss:$0 sm:$0xff] }
  0xdd   : > { %v509_v9 = vpop.permute.xlu1 %508  ;;  %v507_v10 = vpop.permute.xlu0 %506  ;;  %v648_v43 = vrot.slane %v571_v8, 4  ;;  %v646_v27 = vrot.slane %v569_v23, 4  ;;  %v647_v49 = vrot.slane %v570_v12, 4 }
  0xde   : > { %v517_v11 = vsel %vm514_vm7, %v507_v10, %v509_v9 }
  0xdf   : > { %v535_v20 = vmul.f32 %v4903_v57, %v517_v11 }
  0xe1   : > { %v513_v35 = vpop.permute.xlu1 %512  ;;  %v511_v46 = vpop.permute.xlu0 %510  ;;  %v666_v63 = vsel %vm653_vm4, %v535_v20, %v645_v42  ;;  %v4124_v20 = vld [vmem:[%s8887_s1 + $0x30] ss:$0 sm:$0xff] }
  0xe2   : > { %v518_v28 = vsel %vm514_vm7, %v513_v35, %v507_v10  ;;  %v515_v29 = vsel %vm514_vm7, %v511_v46, %v513_v35  ;;  %v516_v24 = vsel %vm514_vm7, %v509_v9, %v511_v46  ;;  %v674_v14 = vpack.c.bf16 %v666_v63, %v662_v60  ;;  %v4316_v60 = vld [vmem:[%s8888_s2 + $0x8] sm:$0xff]   ;;  %v4317_v63 = vld [vmem:[%s8888_s2 + $0x10] sm:$0xff]  }
  0xe3   : > { %v538_v50 = vmul.f32 %v4918_v13, %v518_v28  ;;  %v536_v51 = vmul.f32 %v4921_v16, %v516_v24  ;;  %v537_v55 = vmul.f32 %v4924_v17, %v515_v29 }
  0xe5   : > { %v575_v6 = vpop.permute.xlu1 %574  ;;  %v573_v8 = vpop.permute.xlu0 %572  ;;  %v667_v9 = vsel %vm653_vm4, %v536_v51, %v646_v27  ;;  %v669_v10 = vsel %vm653_vm4, %v538_v50, %v648_v43  ;;  %v668_v2 = vsel %vm653_vm4, %v537_v55, %v647_v49 }
  0xe6   : > { %v583_v1 = vsel %vm580_vm8, %v573_v8, %v575_v6  ;;  %v675_v23 = vpack.c.bf16 %v667_v9, %v663_v58  ;;  %v677_v11 = vpack.c.bf16 %v669_v10, %v665_v59  ;;  %v676_v12 = vpack.c.bf16 %v668_v2, %v664_v3  ;;  %v4315_v59 = vld [vmem:[%s8888_s2] sm:$0xff]  }
  0xe7   : > { %v601_v15 = vmul.f32 %v4122_v5, %v583_v1  ;;  %v4318_v5 = vld [vmem:[%s8888_s2 + $0x18] sm:$0xff]  }
  0xe8   : > { %799 = vmatprep.subr.bf16.mxu0 %v675_v23  ;;  %880 = vmatprep.subr.bf16.mxu1 %v677_v11 }
  0xe9   : > { %v579_v37 = vpop.permute.xlu1 %578  ;;  %v577_v42 = vpop.permute.xlu0 %576  ;;  %800 = vmatpush1.bf16.msra.mxu0 %v674_v14  ;;  %881 = vmatpush1.bf16.msra.mxu1 %v676_v12  ;;  %v678_v29 = vpack.c.bf16 %v601_v15, %v601_v15 }
  0xea   : > { %v584_v43 = vsel %vm580_vm8, %v579_v37, %v573_v8  ;;  %v581_v35 = vsel %vm580_vm8, %v577_v42, %v579_v37  ;;  %v582_v46 = vsel %vm580_vm8, %v575_v6, %v577_v42  ;;  %v4319_v6 = vld [vmem:[%s8888_s2 + $0x20] ss:$0 sps:$4 sm:$0xff]  }
  0xeb   : > { %v604_v27 = vmul.f32 %v4125_v19, %v584_v43  ;;  %v602_v28 = vmul.f32 %v4123_v0, %v582_v46  ;;  %v603_v24 = vmul.f32 %v4124_v20, %v581_v35  ;;  %v786_v55 = vsel %vm784_vm9, %v678_v29, 0 }
  0xed   : > { %v681_v49 = vpack.c.bf16 %v604_v27, %v604_v27  ;;  %v679_v50 = vpack.c.bf16 %v602_v28, %v602_v28  ;;  %v680_v51 = vpack.c.bf16 %v603_v24, %v603_v24 }
  0xef   : > { %4131 = vmatprep.subr.msk.bf16.mxu0 %vm784_vm9, %v679_v50  ;;  %4137 = vmatprep.subr.msk.bf16.mxu1 %vm784_vm9, %v681_v49  ;;  %v792_v58 = vsel %vm784_vm9, %v680_v51, 0 }
  0xf0   : > { %802 = vmatpush1.bf16.msra.mxu0 %v786_v55  ;;  %883 = vmatpush1.bf16.msra.mxu1 %v792_v58 }
  0xf3   : > { %4132 = vmatmul.mubr.msk.bf16.vlgmr.msra.gmra.mrb[0].mxu0 %vm768_vm10, %v4315_v59  ;;  %4138 = vmatmul.mubr.msk.bf16.vlgmr.msra.gmra.mrb[0].mxu1 %vm768_vm10, %v4315_v59 }
  0xf4   : > { %839 = vmatprep.mubr.bf16.mxu0 %v8908_v4  ;;  %920 = vmatprep.mubr.bf16.mxu1 %v8908_v4 }
  0xfa   : > { %v5002_v8 = vpop.permute.xlu0 %707  ;;  %v5016_v0 = vpop.permute.xlu1 %712 }
  0xfb   : > { %4133 = vmatmul.mubr.msk.bf16.gmra.mrb[4].mxu0 %vm768_vm10, %v4316_v60  ;;  %4139 = vmatmul.mubr.msk.bf16.gmra.mrb[4].mxu1 %vm768_vm10, %v4316_v60 }
  0xfc   : > { %849 = vmatprep.mubr.bf16.mxu0 %v8908_v4  ;;  %930 = vmatprep.mubr.bf16.mxu1 %v8908_v4 }
 0x103   : > { %4134 = vmatmul.mubr.msk.bf16.gmra.mrb[8].mxu0 %vm768_vm10, %v4317_v63  ;;  %4140 = vmatmul.mubr.msk.bf16.gmra.mrb[8].mxu1 %vm768_vm10, %v4317_v63 }
 0x104   : > { %859 = vmatprep.mubr.bf16.mxu0 %v8908_v4  ;;  %940 = vmatprep.mubr.bf16.mxu1 %v8908_v4 }
 0x10b   : > { %4135 = vmatmul.mubr.msk.bf16.gmra.mrb[12].mxu0 %vm768_vm10, %v4318_v5  ;;  %4141 = vmatmul.mubr.msk.bf16.gmra.mrb[12].mxu1 %vm768_vm10, %v4318_v5 }
 0x10c   : > { %869 = vmatprep.mubr.bf16.mxu0 %v8908_v4  ;;  %950 = vmatprep.mubr.bf16.mxu1 %v8908_v4 }
 0x113   : > { %4136 = vmatmul.mubr.msk.bf16.gmra.mrb[16].mxu0 %vm768_vm10, %v4319_v6  ;;  %4142 = vmatmul.mubr.msk.bf16.gmra.mrb[16].mxu1 %vm768_vm10, %v4319_v6 }
 0x1c6   : > { %v5004_v9 = vpop.f32.mrb[0].mxu0  ;;  %v5006_v10 = vpop.f32.mrb[0].mxu1 }
 0x1c7   : > { %9291 = vst [vmem:[#allocation39_spill] sm:$0xff] %v5004_v9  ;;  %9292 = vst [vmem:[#allocation40_spill] sm:$0xff] %v5006_v10  ;;  %v5008_v3 = vpop.f32.mrb[1].mxu0  ;;  %v5010_v2 = vpop.f32.mrb[1].mxu1 }
 0x1c8   : > { %9293 = vst [vmem:[#allocation41_spill] sm:$0xff] %v5008_v3  ;;  %9294 = vst [vmem:[#allocation42_spill] sm:$0xff] %v5010_v2  ;;  %v835_v1 = vpop.f32.mrb[2].mxu0  ;;  %v916_v23 = vpop.f32.mrb[2].mxu1 }
 0x1c9   : > { %v836_v11 = vadd.f32 %v835_v1, %v5002_v8  ;;  %v837_v12 = vpop.f32.mrb[3].mxu0  ;;  %v918_v14 = vpop.f32.mrb[3].mxu1  ;;  %v917_v19 = vadd.f32 %v916_v23, %v5002_v8 }
 0x1ca   : > { %v838_v36 = vadd.f32 %v837_v12, %v5002_v8 }
 0x1cb   : > { %v5013_v15 = vmax.f32 %v836_v11, 0.0  ;;  %v5020_v42 = vmax.f32 %v917_v19, 0.0 }
 0x1cd   : > { %9295 = vst [vmem:[#allocation43_spill] sm:$0xff] %v5013_v15  ;;  %999 = vrot.lane.b32.xlu1 %v5013_v15, %s9168_s26  ;;  %9296 = vst [vmem:[#allocation44_spill] sm:$0xff] %v5020_v42 }
 0x1ce   : > { %v841_v20 = vpop.f32.mrb[4].mxu0  ;;  %v922_v37 = vpop.f32.mrb[4].mxu1 }
 0x1cf   : > { %v842_v43 = vadd.f32 %v841_v20, %v5016_v0  ;;  %v843_v35 = vpop.f32.mrb[5].mxu0  ;;  %v924_v46 = vpop.f32.mrb[5].mxu1  ;;  %v923_v24 = vadd.f32 %v922_v37, %v5016_v0 }
 0x1d0   : > { %v5023_v27 = vpop.f32.mrb[6].mxu0  ;;  %v5025_v28 = vpop.f32.mrb[6].mxu1 }
 0x1d1   : > { %v5027_v29 = vmax.f32 %v842_v43, 0.0  ;;  %v5030_v49 = vpop.f32.mrb[7].mxu0  ;;  %v5032_v50 = vpop.f32.mrb[7].mxu1  ;;  %1031 = vrot.lane.b32.xlu1 %v5020_v42, %s9168_s26  ;;  %v5038_v51 = vmax.f32 %v923_v24, 0.0 }
 0x1d3   : > { %9297 = vst [vmem:[#allocation45_spill] sm:$0xff] %v5027_v29  ;;  %1001 = vrot.lane.b32.xlu0 %v5027_v29, %s9168_s26  ;;  %9298 = vst [vmem:[#allocation46_spill] sm:$0xff] %v5038_v51 }
 0x1d5   : > { %1159 = vrot.lane.b32.xlu1 %v5013_v15, %s9166_s24 }
 0x1d6   : > { %v5042_v55 = vpop.f32.mrb[8].mxu0  ;;  %v5044_v58 = vpop.f32.mrb[8].mxu1 }
 0x1d7   : > { %v5046_v59 = vpop.f32.mrb[9].mxu0  ;;  %v5048_v60 = vpop.f32.mrb[9].mxu1  ;;  %1033 = vrot.lane.b32.xlu0 %v5038_v51, %s9168_s26 }
 0x1d8   : > { %v5052_v63 = vpop.f32.mrb[10].mxu0  ;;  %v5054_v5 = vpop.f32.mrb[10].mxu1 }
 0x1d9   : > { %v5056_v6 = vpop.f32.mrb[11].mxu0  ;;  %v5058_v1 = vpop.f32.mrb[11].mxu1  ;;  %1191 = vrot.lane.b32.xlu1 %v5020_v42, %s9166_s24 }
 0x1db   : > { %1161 = vrot.lane.b32.xlu0 %v5027_v29, %s9166_s24 }
 0x1dd   : > { %1319 = vrot.lane.b32.xlu1 %v5013_v15, %s9299_s22 }
 0x1de   : > { %v5066_v23 = vpop.f32.mrb[12].mxu0  ;;  %v5068_v11 = vpop.f32.mrb[12].mxu1 }
 0x1df   : > { %v5070_v19 = vpop.f32.mrb[13].mxu0  ;;  %v5072_v20 = vpop.f32.mrb[13].mxu1  ;;  %1193 = vrot.lane.b32.xlu0 %v5038_v51, %s9166_s24 }
 0x1e0   : > { %v5076_v37 = vpop.f32.mrb[14].mxu0  ;;  %v5078_v43 = vpop.f32.mrb[14].mxu1 }
 0x1e1   : > { %v5080_v24 = vpop.f32.mrb[15].mxu0  ;;  %v5082_v4 = vpop.f32.mrb[15].mxu1  ;;  %1351 = vrot.lane.b32.xlu1 %v5020_v42, %s9299_s22 }
 0x1e3   : > { %1321 = vrot.lane.b32.xlu0 %v5027_v29, %s9299_s22 }
 0x1e5   : > { %1479 = vrot.lane.b32.xlu1 %v5013_v15, %s9300_s23 }
 0x1e6   : > { %v5090_v2 = vpop.f32.mrb[16].mxu0  ;;  %v5092_v10 = vpop.f32.mrb[16].mxu1 }
 0x1e7   : > { %v5094_v3 = vpop.f32.mrb[17].mxu0  ;;  %v5096_v9 = vpop.f32.mrb[17].mxu1  ;;  %1353 = vrot.lane.b32.xlu0 %v5038_v51, %s9299_s22 }
 0x1e8   : > { %v875_v18 = vpop.f32.mrb[18].mxu0  ;;  %v956_v45 = vpop.f32.mrb[18].mxu1 }
 0x1e9   : > { %1511 = vrot.lane.b32.xlu1 %v5020_v42, %s9300_s23  ;;  %v876_v56 = vpop.f32.mrb[19].mxu0  ;;  %v957_v52 = vpop.f32.mrb[19].mxu1  ;;  %v5111_v18 = vmax.f32 %v838_v36, 0.0  ;;  %v919_v45 = vadd.f32 %v918_v14, %v5002_v8  ;;  %v925_v36 = vadd.f32 %v924_v46, %v5016_v0 }
 0x1ea   : > { %v844_v52 = vadd.f32 %v843_v35, %v5016_v0  ;;  %v718_v14 = vpop.permute.xlu1 %717 }
 0x1eb   : > { %1481 = vrot.lane.b32.xlu0 %v5027_v29, %s9300_s23  ;;  %9302 = vst [vmem:[#allocation47_spill] sm:$0xff] %v5111_v18  ;;  %v5119_v56 = vmax.f32 %v919_v45, 0.0  ;;  %v5130_v8 = vmax.f32 %v925_v36, 0.0  ;;  %v846_v0 = vadd.f32 %v5023_v27, %v718_v14  ;;  %v927_v46 = vadd.f32 %v5025_v28, %v718_v14  ;;  %v723_v45 = vpop.permute.xlu0 %722 }
 0x1ec   : > { %v5123_v12 = vmax.f32 %v844_v52, 0.0  ;;  %v852_v52 = vadd.f32 %v5042_v55, %v723_v45  ;;  %v929_v16 = vadd.f32 %v5032_v50, %v718_v14 }
 0x1ed   : > { %1671 = vrot.lane.b32.xlu1 %v5013_v15, %s9301_s19  ;;  %9303 = vst [vmem:[#allocation48_spill] sm:$0xff] %v5119_v56  ;;  %v5163_v35 = vmax.f32 %v846_v0, 0.0  ;;  %v5171_v27 = vmax.f32 %v927_v46, 0.0  ;;  %v933_v0 = vadd.f32 %v5044_v58, %v723_v45 }
 0x1ee   : > { %9304 = vst [vmem:[#allocation49_spill] sm:$0xff] %v5123_v12  ;;  %v5175_v36 = vmax.f32 %v852_v52, 0.0  ;;  %v5200_v55 = vpop.permute.xlu1 %727  ;;  %v848_v52 = vadd.f32 %v5030_v49, %v718_v14  ;;  %v854_v49 = vadd.f32 %v5046_v59, %v723_v45  ;;  %v5237_v30 = vmax.f32 %v929_v16, 0.0 }
 0x1ef   : > { %1513 = vrot.lane.b32.xlu0 %v5038_v51, %s9300_s23  ;;  %9305 = vst [vmem:[#allocation50_spill] sm:$0xff] %v5171_v27  ;;  %v5182_v28 = vmax.f32 %v933_v0, 0.0  ;;  %v5208_v58 = vpop.permute.xlu0 %732  ;;  %v935_v14 = vadd.f32 %v5048_v60, %v723_v45 }
 0x1f0   : > { %v5225_v17 = vmax.f32 %v848_v52, 0.0  ;;  %9307 = vst [vmem:[#allocation52_spill] sm:$0xff] %v5237_v30  ;;  %v5243_v50 = vmax.f32 %v854_v49, 0.0  ;;  %v862_v62 = vadd.f32 %v5066_v23, %v5208_v58 }
 0x1f1   : > { %1703 = vrot.lane.b32.xlu1 %v5020_v42, %s9301_s19  ;;  %9306 = vst [vmem:[#allocation51_spill] sm:$0xff] %v5182_v28  ;;  %v5252_v16 = vmax.f32 %v935_v14, 0.0 }
 0x1f2   : > { %v5210_v46 = vpop.permute.xlu1 %737 }
 0x1f3   : > { %1673 = vrot.lane.b32.xlu0 %v5027_v29, %s9301_s19  ;;  %v5221_v13 = vpop.permute.xlu0 %742  ;;  %9308 = vst [vmem:[#allocation53_spill] sm:$0xff] %v5252_v16 }
 0x1f5   : > { %1015 = vrot.lane.b32.xlu1 %v5111_v18, %s9168_s26 }
 0x1f7   : > { %1705 = vrot.lane.b32.xlu0 %v5038_v51, %s9301_s19 }
 0x1f9   : > { %1047 = vrot.lane.b32.xlu1 %v5119_v56, %s9168_s26 }
 0x1fb   : > { %1017 = vrot.lane.b32.xlu0 %v5123_v12, %s9168_s26 }
 0x1fd   : > { %1175 = vrot.lane.b32.xlu1 %v5111_v18, %s9166_s24 }
 0x1ff   : > { %1049 = vrot.lane.b32.xlu0 %v5130_v8, %s9168_s26 }
 0x201   : > { %1207 = vrot.lane.b32.xlu1 %v5119_v56, %s9166_s24 }
 0x203   : > { %1177 = vrot.lane.b32.xlu0 %v5123_v12, %s9166_s24 }
 0x205   : > { %1335 = vrot.lane.b32.xlu1 %v5111_v18, %s9299_s22 }
 0x207   : > { %1209 = vrot.lane.b32.xlu0 %v5130_v8, %s9166_s24 }
 0x209   : > { %1367 = vrot.lane.b32.xlu1 %v5119_v56, %s9299_s22 }
 0x20b   : > { %1337 = vrot.lane.b32.xlu0 %v5123_v12, %s9299_s22 }
 0x20d   : > { %1495 = vrot.lane.b32.xlu1 %v5111_v18, %s9300_s23 }
 0x20f   : > { %1369 = vrot.lane.b32.xlu0 %v5130_v8, %s9299_s22 }
 0x211   : > { %1527 = vrot.lane.b32.xlu1 %v5119_v56, %s9300_s23 }
 0x213   : > { %1497 = vrot.lane.b32.xlu0 %v5123_v12, %s9300_s23 }
 0x215   : > { %1687 = vrot.lane.b32.xlu1 %v5111_v18, %s9301_s19 }
 0x217   : > { %1529 = vrot.lane.b32.xlu0 %v5130_v8, %s9300_s23 }
 0x219   : > { %1719 = vrot.lane.b32.xlu1 %v5119_v56, %s9301_s19 }
 0x21b   : > { %1689 = vrot.lane.b32.xlu0 %v5123_v12, %s9301_s19 }
 0x21d   : > { %1003 = vrot.lane.b32.xlu1 %v5163_v35, %s9168_s26 }
 0x21f   : > { %1721 = vrot.lane.b32.xlu0 %v5130_v8, %s9301_s19 }
 0x221   : > { %1035 = vrot.lane.b32.xlu1 %v5171_v27, %s9168_s26 }
 0x223   : > { %1005 = vrot.lane.b32.xlu0 %v5175_v36, %s9168_s26 }
 0x225   : > { %1163 = vrot.lane.b32.xlu1 %v5163_v35, %s9166_s24 }
 0x227   : > { %1037 = vrot.lane.b32.xlu0 %v5182_v28, %s9168_s26 }
 0x229   : > { %1195 = vrot.lane.b32.xlu1 %v5171_v27, %s9166_s24 }
 0x22b   : > { %1165 = vrot.lane.b32.xlu0 %v5175_v36, %s9166_s24 }
 0x22d   : > { %1323 = vrot.lane.b32.xlu1 %v5163_v35, %s9299_s22 }
 0x22f   : > { %1197 = vrot.lane.b32.xlu0 %v5182_v28, %s9166_s24 }
 0x231   : > { %1355 = vrot.lane.b32.xlu1 %v5171_v27, %s9299_s22 }
 0x233   : > { %1325 = vrot.lane.b32.xlu0 %v5175_v36, %s9299_s22 }
 0x235   : > { %1483 = vrot.lane.b32.xlu1 %v5163_v35, %s9300_s23 }
 0x237   : > { %1357 = vrot.lane.b32.xlu0 %v5182_v28, %s9299_s22 }
 0x239   : > { %1515 = vrot.lane.b32.xlu1 %v5171_v27, %s9300_s23 }
 0x23b   : > { %1485 = vrot.lane.b32.xlu0 %v5175_v36, %s9300_s23 }
 0x23d   : > { %1675 = vrot.lane.b32.xlu1 %v5163_v35, %s9301_s19 }
 0x23f   : > { %1517 = vrot.lane.b32.xlu0 %v5182_v28, %s9300_s23  ;;  %v5219_v0 = vpop.permute.xlu1 %999 }
 0x241   : > { %1707 = vrot.lane.b32.xlu1 %v5171_v27, %s9301_s19 }
 0x243   : > { %1677 = vrot.lane.b32.xlu0 %v5175_v36, %s9301_s19  ;;  %v5230_v57 = vpop.permute.xlu1 %1031 }
 0x245   : > { %v5233_v25 = vpop.permute.xlu0 %1001  ;;  %1019 = vrot.lane.b32.xlu1 %v5225_v17, %s9168_s26 }
 0x247   : > { %1709 = vrot.lane.b32.xlu0 %v5182_v28, %s9301_s19  ;;  %v5241_v52 = vpop.permute.xlu1 %1159 }
 0x249   : > { %v1034_v26 = vpop.permute.xlu0 %1033  ;;  %1051 = vrot.lane.b32.xlu1 %v5237_v30, %s9168_s26 }
 0x24b   : > { %1021 = vrot.lane.b32.xlu0 %v5243_v50, %s9168_s26  ;;  %v5250_v59 = vpop.permute.xlu1 %1191 }
 0x24d   : > { %v5254_v22 = vpop.permute.xlu0 %1161  ;;  %1179 = vrot.lane.b32.xlu1 %v5225_v17, %s9166_s24 }
 0x24f   : > { %1053 = vrot.lane.b32.xlu0 %v5252_v16, %s9168_s26  ;;  %v5260_v60 = vpop.permute.xlu1 %1319 }
 0x250   : > { %9309 = vst [vmem:[#allocation54_spill] sm:$0xff] %v5260_v60  ;;  %v5346_v60 = vmax.f32 %v862_v62, 0.0 }
 0x251   : > { %v5262_v45 = vpop.permute.xlu0 %1193  ;;  %1211 = vrot.lane.b32.xlu1 %v5237_v30, %s9166_s24 }
 0x252   : > { %9323 = vst [vmem:[#allocation68_spill] sm:$0xff] %v5346_v60 }
 0x253   : > { %1181 = vrot.lane.b32.xlu0 %v5243_v50, %s9166_s24  ;;  %v5268_v49 = vpop.permute.xlu1 %1351 }
 0x254   : > { %9310 = vst [vmem:[#allocation55_spill] sm:$0xff] %v5268_v49 }
 0x255   : > { %v5270_v14 = vpop.permute.xlu0 %1321  ;;  %1339 = vrot.lane.b32.xlu1 %v5225_v17, %s9299_s22 }
 0x256   : > { %9311 = vst [vmem:[#allocation56_spill] sm:$0xff] %v5270_v14 }
 0x257   : > { %1213 = vrot.lane.b32.xlu0 %v5252_v16, %s9166_s24  ;;  %v5276_v41 = vpop.permute.xlu1 %1479 }
 0x258   : > { %9312 = vst [vmem:[#allocation57_spill] sm:$0xff] %v5276_v41 }
 0x259   : > { %v5278_v39 = vpop.permute.xlu0 %1353  ;;  %1371 = vrot.lane.b32.xlu1 %v5237_v30, %s9299_s22 }
 0x25a   : > { %9313 = vst [vmem:[#allocation58_spill] sm:$0xff] %v5278_v39 }
 0x25b   : > { %1341 = vrot.lane.b32.xlu0 %v5243_v50, %s9299_s22  ;;  %v5284_v33 = vpop.permute.xlu1 %1511 }
 0x25c   : > { %9314 = vst [vmem:[#allocation59_spill] sm:$0xff] %v5284_v33 }
 0x25d   : > { %v5286_v40 = vpop.permute.xlu0 %1481  ;;  %1499 = vrot.lane.b32.xlu1 %v5225_v17, %s9300_s23 }
 0x25e   : > { %9315 = vst [vmem:[#allocation60_spill] sm:$0xff] %v5286_v40  ;;  %v856_v40 = vadd.f32 %v5052_v63, %v5200_v55 }
 0x25f   : > { %1373 = vrot.lane.b32.xlu0 %v5252_v16, %s9299_s22  ;;  %v5292_v7 = vpop.permute.xlu1 %1671 }
 0x260   : > { %9316 = vst [vmem:[#allocation61_spill] sm:$0xff] %v5292_v7  ;;  %v5316_v39 = vmax.f32 %v856_v40, 0.0 }
 0x261   : > { %v5294_v41 = vpop.permute.xlu0 %1513  ;;  %1531 = vrot.lane.b32.xlu1 %v5237_v30, %s9300_s23 }
 0x262   : > { %9317 = vst [vmem:[#allocation62_spill] sm:$0xff] %v5294_v41  ;;  %9321 = vst [vmem:[#allocation66_spill] sm:$0xff] %v5316_v39 }
 0x263   : > { %1501 = vrot.lane.b32.xlu0 %v5243_v50, %s9300_s23  ;;  %v5300_v61 = vpop.permute.xlu1 %1703 }
 0x264   : > { %9318 = vst [vmem:[#allocation63_spill] sm:$0xff] %v5300_v61  ;;  %v937_v61 = vadd.f32 %v5054_v5, %v5200_v55 }
 0x265   : > { %v5302_v33 = vpop.permute.xlu0 %1673  ;;  %1691 = vrot.lane.b32.xlu1 %v5225_v17, %s9301_s19 }
 0x266   : > { %9319 = vst [vmem:[#allocation64_spill] sm:$0xff] %v5302_v33  ;;  %v5327_v54 = vmax.f32 %v937_v61, 0.0 }
 0x267   : > { %1533 = vrot.lane.b32.xlu0 %v5252_v16, %s9300_s23  ;;  %v1016_v7 = vpop.permute.xlu1 %1015 }
 0x268   : > { %v1079_v63 = vsel %vm349_vm0, %v5219_v0, %v1016_v7  ;;  %9322 = vst [vmem:[#allocation67_spill] sm:$0xff] %v5327_v54  ;;  %v1071_v49 = vsel %vm349_vm0, %v1016_v7, %v5230_v57 }
 0x269   : > { %v5310_v41 = vpop.permute.xlu0 %1705  ;;  %1723 = vrot.lane.b32.xlu1 %v5237_v30, %s9301_s19  ;;  %v1096_v5 = vmul.f32 %v1079_v63, %v4783_v44  ;;  %v943_v63 = vadd.f32 %v5068_v11, %v5208_v58 }
 0x26a   : > { %9320 = vst [vmem:[#allocation65_spill] sm:$0xff] %v5310_v41 }
 0x26b   : > { %1693 = vrot.lane.b32.xlu0 %v5243_v50, %s9301_s19  ;;  %v1048_v33 = vpop.permute.xlu1 %1047 }
 0x26c   : > { %v1063_v14 = vsel %vm349_vm0, %v5230_v57, %v1048_v33  ;;  %v1087_v23 = vsel %vm349_vm0, %v1048_v33, %v5219_v0 }
 0x26d   : > { %v1018_v41 = vpop.permute.xlu0 %1017  ;;  %1007 = vrot.lane.b32.xlu1 %v5316_v39, %s9168_s26  ;;  %v1098_v34 = vmul.f32 %v1063_v14, %v4800_v53  ;;  %v5369_v14 = vmax.f32 %v943_v63, 0.0 }
 0x26e   : > { %v1080_v40 = vsel %vm349_vm0, %v5233_v25, %v1018_v41  ;;  %v1072_v31 = vsel %vm349_vm0, %v1018_v41, %v1034_v26 }
 0x26f   : > { %v1100_v32 = vmul.f32 %v1080_v40, %v4783_v44  ;;  %1725 = vrot.lane.b32.xlu0 %v5252_v16, %s9301_s19  ;;  %v5342_v61 = vpop.permute.xlu1 %1175  ;;  %v1095_v40 = vmul.f32 %v1087_v23, %v4790_v47  ;;  %v1101_v11 = vmul.f32 %v1072_v31, %v4793_v48  ;;  %9324 = vst [vmem:[#allocation69_spill] sm:$0xff] %v5369_v14 }
 0x271   : > { %v1050_v33 = vpop.permute.xlu0 %1049  ;;  %1039 = vrot.lane.b32.xlu1 %v5327_v54, %s9168_s26  ;;  %v1128_v0 = vpack.c.bf16 %v1100_v32, %v1096_v5 }
 0x272   : > { %v1064_v41 = vsel %vm349_vm0, %v1034_v26, %v1050_v33  ;;  %v1088_v62 = vsel %vm349_vm0, %v1050_v33, %v5233_v25  ;;  %v1097_v26 = vmul.f32 %v1071_v49, %v4793_v48 }
 0x273   : > { %v1099_v7 = vmul.f32 %v1088_v62, %v4790_v47  ;;  %v1102_v57 = vmul.f32 %v1064_v41, %v4800_v53  ;;  %1009 = vrot.lane.b32.xlu0 %v5346_v60, %s9168_s26  ;;  %2577 = vmatprep.subr.bf16.mxu0 %v1128_v0  ;;  %v5367_v32 = vpop.permute.xlu1 %1207 }
 0x274   : > { %v1129_v25 = vpack.c.bf16 %v1101_v11, %v1097_v26 }
 0x275   : > { %v1127_v5 = vpack.c.bf16 %v1099_v7, %v1095_v40  ;;  %v5372_v23 = vpop.permute.xlu0 %1177  ;;  %1167 = vrot.lane.b32.xlu1 %v5316_v39, %s9166_s24  ;;  %v1130_v31 = vpack.c.bf16 %v1102_v57, %v1098_v34 }
 0x277   : > { %1041 = vrot.lane.b32.xlu0 %v5369_v14, %s9168_s26  ;;  %2578 = vmatpush1.bf16.msra.mxu0 %v1127_v5  ;;  %v5378_v33 = vpop.permute.xlu1 %1335  ;;  %v858_v5 = vadd.f32 %v5056_v6, %v5200_v55  ;;  %v864_v6 = vadd.f32 %v5070_v19, %v5208_v58 }
 0x278   : > { %9325 = vst [vmem:[#allocation70_spill] sm:$0xff] %v5378_v33  ;;  %2760 = vmatprep.subr.bf16.mxu1 %v1130_v31 }
 0x279   : > { %2761 = vmatpush1.bf16.msra.mxu1 %v1129_v25  ;;  %v5380_v63 = vpop.permute.xlu0 %1209  ;;  %1199 = vrot.lane.b32.xlu1 %v5327_v54, %s9166_s24 }
 0x27b   : > { %1169 = vrot.lane.b32.xlu0 %v5346_v60, %s9166_s24  ;;  %v5386_v49 = vpop.permute.xlu1 %1367 }
 0x27c   : > { %9326 = vst [vmem:[#allocation71_spill] sm:$0xff] %v5386_v49 }
 0x27d   : > { %v5388_v34 = vpop.permute.xlu0 %1337  ;;  %1327 = vrot.lane.b32.xlu1 %v5316_v39, %s9299_s22 }
 0x27e   : > { %9327 = vst [vmem:[#allocation72_spill] sm:$0xff] %v5388_v34 }
 0x27f   : > { %1201 = vrot.lane.b32.xlu0 %v5369_v14, %s9166_s24  ;;  %v5394_v0 = vpop.permute.xlu1 %1495 }
 0x280   : > { %9328 = vst [vmem:[#allocation73_spill] sm:$0xff] %v5394_v0 }
 0x281   : > { %v5396_v40 = vpop.permute.xlu0 %1369  ;;  %1359 = vrot.lane.b32.xlu1 %v5327_v54, %s9299_s22 }
 0x282   : > { %9329 = vst [vmem:[#allocation74_spill] sm:$0xff] %v5396_v40 }
 0x283   : > { %1329 = vrot.lane.b32.xlu0 %v5346_v60, %s9299_s22  ;;  %v5402_v41 = vpop.permute.xlu1 %1527 }
 0x284   : > { %9330 = vst [vmem:[#allocation75_spill] sm:$0xff] %v5402_v41 }
 0x285   : > { %v5404_v62 = vpop.permute.xlu0 %1497  ;;  %1487 = vrot.lane.b32.xlu1 %v5316_v39, %s9300_s23 }
 0x286   : > { %9331 = vst [vmem:[#allocation76_spill] sm:$0xff] %v5404_v62 }
 0x287   : > { %1361 = vrot.lane.b32.xlu0 %v5369_v14, %s9299_s22  ;;  %v5410_v11 = vpop.permute.xlu1 %1687 }
 0x288   : > { %9332 = vst [vmem:[#allocation77_spill] sm:$0xff] %v5410_v11  ;;  %v5434_v11 = vmax.f32 %v858_v5, 0.0 }
 0x289   : > { %v5412_v7 = vpop.permute.xlu0 %1529  ;;  %1519 = vrot.lane.b32.xlu1 %v5327_v54, %s9300_s23 }
 0x28a   : > { %9333 = vst [vmem:[#allocation78_spill] sm:$0xff] %v5412_v7  ;;  %9337 = vst [vmem:[#allocation82_spill] sm:$0xff] %v5434_v11 }
 0x28b   : > { %1489 = vrot.lane.b32.xlu0 %v5346_v60, %s9300_s23  ;;  %v5418_v57 = vpop.permute.xlu1 %1719 }
 0x28c   : > { %9334 = vst [vmem:[#allocation79_spill] sm:$0xff] %v5418_v57  ;;  %v939_v57 = vadd.f32 %v5058_v1, %v5200_v55  ;;  %v5454_v1 = vmax.f32 %v864_v6, 0.0  ;;  %v945_v55 = vadd.f32 %v5072_v20, %v5208_v58 }
 0x28d   : > { %v5420_v26 = vpop.permute.xlu0 %1689  ;;  %1679 = vrot.lane.b32.xlu1 %v5316_v39, %s9301_s19 }
 0x28e   : > { %9335 = vst [vmem:[#allocation80_spill] sm:$0xff] %v5420_v26  ;;  %9340 = vst [vmem:[#allocation85_spill] sm:$0xff] %v5454_v1 }
 0x28f   : > { %1521 = vrot.lane.b32.xlu0 %v5369_v14, %s9300_s23  ;;  %v5428_v31 = vpop.permute.xlu1 %1003 }
 0x291   : > { %v5430_v25 = vpop.permute.xlu0 %1721  ;;  %1711 = vrot.lane.b32.xlu1 %v5327_v54, %s9301_s19 }
 0x292   : > { %9336 = vst [vmem:[#allocation81_spill] sm:$0xff] %v5430_v25  ;;  %v5448_v25 = vmax.f32 %v939_v57, 0.0  ;;  %v5464_v57 = vmax.f32 %v945_v55, 0.0 }
 0x293   : > { %1681 = vrot.lane.b32.xlu0 %v5346_v60, %s9301_s19  ;;  %v5440_v26 = vpop.permute.xlu1 %1035 }
 0x294   : > { %9338 = vst [vmem:[#allocation83_spill] sm:$0xff] %v5448_v25  ;;  %9342 = vst [vmem:[#allocation87_spill] sm:$0xff] %v5464_v57 }
 0x295   : > { %v5444_v41 = vpop.permute.xlu0 %1005  ;;  %1023 = vrot.lane.b32.xlu1 %v5434_v11, %s9168_s26 }
 0x297   : > { %1713 = vrot.lane.b32.xlu0 %v5369_v14, %s9301_s19  ;;  %v5452_v5 = vpop.permute.xlu1 %1163 }
 0x298   : > { %9339 = vst [vmem:[#allocation84_spill] sm:$0xff] %v5452_v5 }
 0x299   : > { %v1038_v0 = vpop.permute.xlu0 %1037  ;;  %1055 = vrot.lane.b32.xlu1 %v5448_v25, %s9168_s26 }
 0x29b   : > { %1025 = vrot.lane.b32.xlu0 %v5454_v1, %s9168_s26  ;;  %v5462_v19 = vpop.permute.xlu1 %1195 }
 0x29c   : > { %9341 = vst [vmem:[#allocation86_spill] sm:$0xff] %v5462_v19  ;;  %v872_v19 = vadd.f32 %v5090_v2, %v5221_v13 }
 0x29d   : > { %v5466_v7 = vpop.permute.xlu0 %1165  ;;  %1183 = vrot.lane.b32.xlu1 %v5434_v11, %s9166_s24 }
 0x29e   : > { %9343 = vst [vmem:[#allocation88_spill] sm:$0xff] %v5466_v7  ;;  %v5558_v33 = vmax.f32 %v872_v19, 0.0 }
 0x29f   : > { %1057 = vrot.lane.b32.xlu0 %v5464_v57, %s9168_s26  ;;  %v5472_v20 = vpop.permute.xlu1 %1323 }
 0x2a0   : > { %9344 = vst [vmem:[#allocation89_spill] sm:$0xff] %v5472_v20  ;;  %9360 = vst [vmem:[#allocation105_spill] sm:$0xff] %v5558_v33 }
 0x2a1   : > { %v5474_v58 = vpop.permute.xlu0 %1197  ;;  %1215 = vrot.lane.b32.xlu1 %v5448_v25, %s9166_s24 }
 0x2a2   : > { %9345 = vst [vmem:[#allocation90_spill] sm:$0xff] %v5474_v58 }
 0x2a3   : > { %1185 = vrot.lane.b32.xlu0 %v5454_v1, %s9166_s24  ;;  %v5480_v6 = vpop.permute.xlu1 %1355 }
 0x2a4   : > { %9346 = vst [vmem:[#allocation91_spill] sm:$0xff] %v5480_v6 }
 0x2a5   : > { %v5482_v55 = vpop.permute.xlu0 %1325  ;;  %1343 = vrot.lane.b32.xlu1 %v5434_v11, %s9299_s22 }
 0x2a6   : > { %9347 = vst [vmem:[#allocation92_spill] sm:$0xff] %v5482_v55 }
 0x2a7   : > { %1217 = vrot.lane.b32.xlu0 %v5464_v57, %s9166_s24  ;;  %v5488_v7 = vpop.permute.xlu1 %1483 }
 0x2a8   : > { %9348 = vst [vmem:[#allocation93_spill] sm:$0xff] %v5488_v7 }
 0x2a9   : > { %v5490_v20 = vpop.permute.xlu0 %1357  ;;  %1375 = vrot.lane.b32.xlu1 %v5448_v25, %s9299_s22 }
 0x2aa   : > { %9349 = vst [vmem:[#allocation94_spill] sm:$0xff] %v5490_v20 }
 0x2ab   : > { %1345 = vrot.lane.b32.xlu0 %v5454_v1, %s9299_s22  ;;  %v5496_v58 = vpop.permute.xlu1 %1515 }
 0x2ac   : > { %9350 = vst [vmem:[#allocation95_spill] sm:$0xff] %v5496_v58 }
 0x2ad   : > { %v5498_v6 = vpop.permute.xlu0 %1485  ;;  %1503 = vrot.lane.b32.xlu1 %v5434_v11, %s9300_s23 }
 0x2ae   : > { %9351 = vst [vmem:[#allocation96_spill] sm:$0xff] %v5498_v6  ;;  %v866_v6 = vadd.f32 %v5076_v37, %v5210_v46 }
 0x2af   : > { %1377 = vrot.lane.b32.xlu0 %v5464_v57, %s9299_s22  ;;  %v5504_v55 = vpop.permute.xlu1 %1675 }
 0x2b0   : > { %9352 = vst [vmem:[#allocation97_spill] sm:$0xff] %v5504_v55  ;;  %v5528_v5 = vmax.f32 %v866_v6, 0.0 }
 0x2b1   : > { %v5506_v7 = vpop.permute.xlu0 %1517  ;;  %1535 = vrot.lane.b32.xlu1 %v5448_v25, %s9300_s23 }
 0x2b2   : > { %9353 = vst [vmem:[#allocation98_spill] sm:$0xff] %v5506_v7  ;;  %9357 = vst [vmem:[#allocation102_spill] sm:$0xff] %v5528_v5 }
 0x2b3   : > { %1505 = vrot.lane.b32.xlu0 %v5454_v1, %s9300_s23  ;;  %v5512_v20 = vpop.permute.xlu1 %1707 }
 0x2b4   : > { %9354 = vst [vmem:[#allocation99_spill] sm:$0xff] %v5512_v20  ;;  %v947_v20 = vadd.f32 %v5078_v43, %v5210_v46 }
 0x2b5   : > { %v5514_v58 = vpop.permute.xlu0 %1677  ;;  %1695 = vrot.lane.b32.xlu1 %v5434_v11, %s9301_s19 }
 0x2b6   : > { %9355 = vst [vmem:[#allocation100_spill] sm:$0xff] %v5514_v58  ;;  %v5539_v62 = vmax.f32 %v947_v20, 0.0 }
 0x2b7   : > { %1537 = vrot.lane.b32.xlu0 %v5464_v57, %s9300_s23  ;;  %v1020_v55 = vpop.permute.xlu1 %1019 }
 0x2b8   : > { %v1081_v37 = vsel %vm349_vm0, %v5428_v31, %v1020_v55  ;;  %9358 = vst [vmem:[#allocation103_spill] sm:$0xff] %v5539_v62  ;;  %v1073_v38 = vsel %vm349_vm0, %v1020_v55, %v5440_v26 }
 0x2b9   : > { %v5522_v7 = vpop.permute.xlu0 %1709  ;;  %1727 = vrot.lane.b32.xlu1 %v5448_v25, %s9301_s19  ;;  %v1104_v6 = vmul.f32 %v1081_v37, %v4783_v44  ;;  %v953_v37 = vadd.f32 %v5092_v10, %v5221_v13 }
 0x2ba   : > { %9356 = vst [vmem:[#allocation101_spill] sm:$0xff] %v5522_v7 }
 0x2bb   : > { %1697 = vrot.lane.b32.xlu0 %v5454_v1, %s9301_s19  ;;  %v1052_v58 = vpop.permute.xlu1 %1051 }
 0x2bc   : > { %v1065_v40 = vsel %vm349_vm0, %v5440_v26, %v1052_v58  ;;  %v1089_v2 = vsel %vm349_vm0, %v1052_v58, %v5428_v31 }
 0x2bd   : > { %v1022_v7 = vpop.permute.xlu0 %1021  ;;  %1011 = vrot.lane.b32.xlu1 %v5528_v5, %s9168_s26 }
 0x2be   : > { %v1082_v43 = vsel %vm349_vm0, %v5444_v41, %v1022_v7  ;;  %v1074_v49 = vsel %vm349_vm0, %v1022_v7, %v1038_v0 }
 0x2bf   : > { %v1108_v34 = vmul.f32 %v1082_v43, %v4783_v44  ;;  %1729 = vrot.lane.b32.xlu0 %v5464_v57, %s9301_s19  ;;  %v5554_v20 = vpop.permute.xlu1 %1179  ;;  %v1103_v43 = vmul.f32 %v1089_v2, %v4790_v47  ;;  %v1109_v19 = vmul.f32 %v1074_v49, %v4793_v48 }
 0x2c0   : > { %9359 = vst [vmem:[#allocation104_spill] sm:$0xff] %v5554_v20  ;;  %v1106_v20 = vmul.f32 %v1065_v40, %v4800_v53  ;;  %v5581_v40 = vmax.f32 %v953_v37, 0.0 }
 0x2c1   : > { %v1054_v31 = vpop.permute.xlu0 %1053  ;;  %1043 = vrot.lane.b32.xlu1 %v5539_v62, %s9168_s26  ;;  %v1132_v58 = vpack.c.bf16 %v1108_v34, %v1104_v6 }
 0x2c2   : > { %v1066_v7 = vsel %vm349_vm0, %v1038_v0, %v1054_v31  ;;  %v1090_v10 = vsel %vm349_vm0, %v1054_v31, %v5444_v41  ;;  %9361 = vst [vmem:[#allocation106_spill] sm:$0xff] %v5581_v40  ;;  %v1105_v0 = vmul.f32 %v1073_v38, %v4793_v48 }
 0x2c3   : > { %v1107_v26 = vmul.f32 %v1090_v10, %v4790_v47  ;;  %v1110_v55 = vmul.f32 %v1066_v7, %v4800_v53  ;;  %1013 = vrot.lane.b32.xlu0 %v5558_v33, %s9168_s26  ;;  %2579 = vmatprep.subr.bf16.mxu0 %v1132_v58  ;;  %v5579_v34 = vpop.permute.xlu1 %1211 }
 0x2c4   : > { %v1133_v41 = vpack.c.bf16 %v1109_v19, %v1105_v0 }
 0x2c5   : > { %v1131_v6 = vpack.c.bf16 %v1107_v26, %v1103_v43  ;;  %v5584_v2 = vpop.permute.xlu0 %1181  ;;  %1171 = vrot.lane.b32.xlu1 %v5528_v5, %s9166_s24  ;;  %v1134_v49 = vpack.c.bf16 %v1110_v55, %v1106_v20  ;;  %v868_v55 = vadd.f32 %v5080_v24, %v5210_v46  ;;  %v874_v24 = vadd.f32 %v5094_v3, %v5221_v13 }
 0x2c7   : > { %1045 = vrot.lane.b32.xlu0 %v5581_v40, %s9168_s26  ;;  %2580 = vmatpush1.bf16.msra.mxu0 %v1131_v6  ;;  %v5590_v31 = vpop.permute.xlu1 %1339 }
 0x2c8   : > { %9362 = vst [vmem:[#allocation107_spill] sm:$0xff] %v5590_v31  ;;  %2762 = vmatprep.subr.bf16.mxu1 %v1134_v49  ;;  %v5638_v49 = vmax.f32 %v868_v55, 0.0 }
 0x2c9   : > { %2763 = vmatpush1.bf16.msra.mxu1 %v1133_v41  ;;  %v5592_v37 = vpop.permute.xlu0 %1213  ;;  %1203 = vrot.lane.b32.xlu1 %v5539_v62, %s9166_s24  ;;  %v949_v41 = vadd.f32 %v5082_v4, %v5210_v46  ;;  %v955_v4 = vadd.f32 %v5096_v9, %v5221_v13 }
 0x2ca   : > { %9363 = vst [vmem:[#allocation108_spill] sm:$0xff] %v5592_v37  ;;  %9374 = vst [vmem:[#allocation119_spill] sm:$0xff] %v5638_v49 }
 0x2cb   : > { %1173 = vrot.lane.b32.xlu0 %v5558_v33, %s9166_s24  ;;  %v5598_v38 = vpop.permute.xlu1 %1371 }
 0x2cc   : > { %9364 = vst [vmem:[#allocation109_spill] sm:$0xff] %v5598_v38 }
 0x2cd   : > { %v5600_v20 = vpop.permute.xlu0 %1341  ;;  %1331 = vrot.lane.b32.xlu1 %v5528_v5, %s9299_s22 }
 0x2ce   : > { %9365 = vst [vmem:[#allocation110_spill] sm:$0xff] %v5600_v20 }
 0x2cf   : > { %1205 = vrot.lane.b32.xlu0 %v5581_v40, %s9166_s24  ;;  %v5606_v58 = vpop.permute.xlu1 %1499 }
 0x2d0   : > { %9366 = vst [vmem:[#allocation111_spill] sm:$0xff] %v5606_v58 }
 0x2d1   : > { %v5608_v43 = vpop.permute.xlu0 %1373  ;;  %1363 = vrot.lane.b32.xlu1 %v5539_v62, %s9299_s22 }
 0x2d2   : > { %9367 = vst [vmem:[#allocation112_spill] sm:$0xff] %v5608_v43 }
 0x2d3   : > { %1333 = vrot.lane.b32.xlu0 %v5558_v33, %s9299_s22  ;;  %v5614_v7 = vpop.permute.xlu1 %1531 }
 0x2d4   : > { %9368 = vst [vmem:[#allocation113_spill] sm:$0xff] %v5614_v7 }
 0x2d5   : > { %v5616_v10 = vpop.permute.xlu0 %1501  ;;  %1491 = vrot.lane.b32.xlu1 %v5528_v5, %s9300_s23 }
 0x2d6   : > { %9369 = vst [vmem:[#allocation114_spill] sm:$0xff] %v5616_v10 }
 0x2d7   : > { %1365 = vrot.lane.b32.xlu0 %v5581_v40, %s9299_s22  ;;  %v5622_v19 = vpop.permute.xlu1 %1691 }
 0x2d8   : > { %9370 = vst [vmem:[#allocation115_spill] sm:$0xff] %v5622_v19 }
 0x2d9   : > { %v5624_v26 = vpop.permute.xlu0 %1533  ;;  %1523 = vrot.lane.b32.xlu1 %v5539_v62, %s9300_s23 }
 0x2da   : > { %9371 = vst [vmem:[#allocation116_spill] sm:$0xff] %v5624_v26 }
 0x2db   : > { %1493 = vrot.lane.b32.xlu0 %v5558_v33, %s9300_s23  ;;  %v5632_v0 = vpop.permute.xlu1 %1723 }
 0x2dc   : > { %9372 = vst [vmem:[#allocation117_spill] sm:$0xff] %v5632_v0  ;;  %v5650_v0 = vmax.f32 %v949_v41, 0.0  ;;  %v5664_v41 = vmax.f32 %v955_v4, 0.0 }
 0x2dd   : > { %v5634_v6 = vpop.permute.xlu0 %1693  ;;  %1683 = vrot.lane.b32.xlu1 %v5528_v5, %s9301_s19 }
 0x2de   : > { %9373 = vst [vmem:[#allocation118_spill] sm:$0xff] %v5634_v6  ;;  %9376 = vst [vmem:[#allocation121_spill] sm:$0xff] %v5650_v0  ;;  %v5654_v6 = vmax.f32 %v874_v24, 0.0 }
 0x2df   : > { %1525 = vrot.lane.b32.xlu0 %v5581_v40, %s9300_s23  ;;  %v1008_v19 = vpop.permute.xlu1 %1007  ;;  %9379 = vst [vmem:[#allocation124_spill] sm:$0xff] %v5664_v41 }
 0x2e0   : > { %9377 = vst [vmem:[#allocation122_spill] sm:$0xff] %v5654_v6 }
 0x2e1   : > { %v5646_v7 = vpop.permute.xlu0 %1725  ;;  %1027 = vrot.lane.b32.xlu1 %v5638_v49, %s9168_s26 }
 0x2e2   : > { %9375 = vst [vmem:[#allocation120_spill] sm:$0xff] %v5646_v7 }
 0x2e3   : > { %1685 = vrot.lane.b32.xlu0 %v5558_v33, %s9301_s19  ;;  %v1040_v55 = vpop.permute.xlu1 %1039 }
 0x2e5   : > { %v1010_v46 = vpop.permute.xlu0 %1009  ;;  %1059 = vrot.lane.b32.xlu1 %v5650_v0, %s9168_s26 }
 0x2e7   : > { %1029 = vrot.lane.b32.xlu0 %v5654_v6, %s9168_s26  ;;  %v5662_v3 = vpop.permute.xlu1 %1167 }
 0x2e8   : > { %9378 = vst [vmem:[#allocation123_spill] sm:$0xff] %v5662_v3 }
 0x2e9   : > { %v1042_v7 = vpop.permute.xlu0 %1041  ;;  %1187 = vrot.lane.b32.xlu1 %v5638_v49, %s9166_s24 }
 0x2eb   : > { %1061 = vrot.lane.b32.xlu0 %v5664_v41, %s9168_s26  ;;  %v5670_v24 = vpop.permute.xlu1 %1199  ;;  %s8830_s26 = scalar_lea.hbm %s8894_s8, %s4172_s20 }
 0x2ec   : > { %9380 = vst [vmem:[#allocation125_spill] sm:$0xff] %v5670_v24 }
 0x2ed   : > { %v5672_v13 = vpop.permute.xlu0 %1169  ;;  %1219 = vrot.lane.b32.xlu1 %v5650_v0, %s9166_s24 }
 0x2ee   : > { %9381 = vst [vmem:[#allocation126_spill] sm:$0xff] %v5672_v13 }
 0x2ef   : > { %1189 = vrot.lane.b32.xlu0 %v5654_v6, %s9166_s24  ;;  %v5678_v9 = vpop.permute.xlu1 %1327 }
 0x2f0   : > { %9382 = vst [vmem:[#allocation127_spill] sm:$0xff] %v5678_v9 }
 0x2f1   : > { %v5680_v4 = vpop.permute.xlu0 %1201  ;;  %1347 = vrot.lane.b32.xlu1 %v5638_v49, %s9299_s22 }
 0x2f2   : > { %9383 = vst [vmem:[#allocation128_spill] sm:$0xff] %v5680_v4 }
 0x2f3   : > { %1221 = vrot.lane.b32.xlu0 %v5664_v41, %s9166_s24  ;;  %v5686_v26 = vpop.permute.xlu1 %1359 }
 0x2f4   : > { %9384 = vst [vmem:[#allocation129_spill] sm:$0xff] %v5686_v26 }
 0x2f5   : > { %v5688_v10 = vpop.permute.xlu0 %1329  ;;  %1379 = vrot.lane.b32.xlu1 %v5650_v0, %s9299_s22 }
 0x2f6   : > { %9385 = vst [vmem:[#allocation130_spill] sm:$0xff] %v5688_v10 }
 0x2f7   : > { %1349 = vrot.lane.b32.xlu0 %v5654_v6, %s9299_s22  ;;  %v5694_v58 = vpop.permute.xlu1 %1487 }
 0x2f8   : > { %9386 = vst [vmem:[#allocation131_spill] sm:$0xff] %v5694_v58 }
 0x2f9   : > { %v5696_v9 = vpop.permute.xlu0 %1361  ;;  %1507 = vrot.lane.b32.xlu1 %v5638_v49, %s9300_s23 }
 0x2fa   : > { %9387 = vst [vmem:[#allocation132_spill] sm:$0xff] %v5696_v9 }
 0x2fb   : > { %1381 = vrot.lane.b32.xlu0 %v5664_v41, %s9299_s22  ;;  %v5702_v43 = vpop.permute.xlu1 %1519 }
 0x2fc   : > { %9388 = vst [vmem:[#allocation133_spill] sm:$0xff] %v5702_v43 }
 0x2fd   : > { %v5704_v26 = vpop.permute.xlu0 %1489  ;;  %1539 = vrot.lane.b32.xlu1 %v5650_v0, %s9300_s23 }
 0x2fe   : > { %9389 = vst [vmem:[#allocation134_spill] sm:$0xff] %v5704_v26 }
 0x2ff   : > { %1509 = vrot.lane.b32.xlu0 %v5654_v6, %s9300_s23  ;;  %v5710_v10 = vpop.permute.xlu1 %1679 }
 0x300   : > { %9390 = vst [vmem:[#allocation135_spill] sm:$0xff] %v5710_v10 }
 0x301   : > { %v5712_v58 = vpop.permute.xlu0 %1521  ;;  %1699 = vrot.lane.b32.xlu1 %v5638_v49, %s9301_s19 }
 0x302   : > { %9391 = vst [vmem:[#allocation136_spill] sm:$0xff] %v5712_v58 }
 0x303   : > { %1541 = vrot.lane.b32.xlu0 %v5664_v41, %s9300_s23  ;;  %v5718_v9 = vpop.permute.xlu1 %1711 }
 0x304   : > { %9392 = vst [vmem:[#allocation137_spill] sm:$0xff] %v5718_v9 }
 0x305   : > { %v5720_v43 = vpop.permute.xlu0 %1681  ;;  %1715 = vrot.lane.b32.xlu1 %v5539_v62, %s9301_s19 }
 0x306   : > { %9393 = vst [vmem:[#allocation138_spill] sm:$0xff] %v5720_v43 }
 0x307   : > { %1701 = vrot.lane.b32.xlu0 %v5654_v6, %s9301_s19  ;;  %v1024_v26 = vpop.permute.xlu1 %1023 }
 0x308   : > { %v1083_v9 = vsel %vm349_vm0, %v1008_v19, %v1024_v26  ;;  %v1075_v31 = vsel %vm349_vm0, %v1024_v26, %v1040_v55 }
 0x309   : > { %v5726_v10 = vpop.permute.xlu0 %1713  ;;  %1731 = vrot.lane.b32.xlu1 %v5650_v0, %s9301_s19  ;;  %v1112_v3 = vmul.f32 %v1083_v9, %v4783_v44 }
 0x30a   : > { %9394 = vst [vmem:[#allocation139_spill] sm:$0xff] %v5726_v10 }
 0x30b   : > { %1717 = vrot.lane.b32.xlu0 %v5581_v40, %s9301_s19  ;;  %v1056_v58 = vpop.permute.xlu1 %1055 }
 0x30c   : > { %v1067_v10 = vsel %vm349_vm0, %v1040_v55, %v1056_v58  ;;  %v1091_v4 = vsel %vm349_vm0, %v1056_v58, %v1008_v19 }
 0x30d   : > { %v1026_v43 = vpop.permute.xlu0 %1025  ;;  %1831 = vrot.lane.b32.xlu1 %v5013_v15, %s9395_s25  ;;  %v1111_v58 = vmul.f32 %v1091_v4, %v4790_v47  ;;  %v1114_v19 = vmul.f32 %v1067_v10, %v4800_v53  ;;  %v1113_v10 = vmul.f32 %v1075_v31, %v4793_v48 }
 0x30e   : > { %v1084_v24 = vsel %vm349_vm0, %v1010_v46, %v1026_v43  ;;  %v1076_v38 = vsel %vm349_vm0, %v1026_v43, %v1042_v7 }
 0x30f   : > { %v1116_v20 = vmul.f32 %v1084_v24, %v4783_v44  ;;  %1733 = vrot.lane.b32.xlu0 %v5664_v41, %s9301_s19  ;;  %v5746_v13 = vpop.permute.xlu1 %1183  ;;  %v1117_v43 = vmul.f32 %v1076_v38, %v4793_v48  ;;  %v4322_v38 = vld [vmem:[%s8890_s4 + $0x4] ss:$20 sps:$4 sm:$0xff]  }
 0x310   : > { %9396 = vst [vmem:[#allocation140_spill] sm:$0xff] %v5746_v13  ;;  %2609 = vmatprep.mubr.bf16.mxu0 %v4322_v38  ;;  %2792 = vmatprep.mubr.bf16.mxu1 %v4322_v38 }
 0x311   : > { %v1058_v9 = vpop.permute.xlu0 %1057  ;;  %1847 = vrot.lane.b32.xlu1 %v5111_v18, %s9395_s25  ;;  %v1136_v37 = vpack.c.bf16 %v1116_v20, %v1112_v3 }
 0x312   : > { %v1068_v24 = vsel %vm349_vm0, %v1042_v7, %v1058_v9  ;;  %v1092_v13 = vsel %vm349_vm0, %v1058_v9, %v1010_v46  ;;  %v1137_v46 = vpack.c.bf16 %v1117_v43, %v1113_v10 }
 0x313   : > { %v1115_v44 = vmul.f32 %v1092_v13, %v4790_v47  ;;  %v1118_v26 = vmul.f32 %v1068_v24, %v4800_v53  ;;  %1833 = vrot.lane.b32.xlu0 %v5027_v29, %s9395_s25  ;;  %2581 = vmatprep.subr.bf16.mxu0 %v1136_v37  ;;  %v5765_v20 = vpop.permute.xlu1 %1215 }
 0x315   : > { %v1135_v55 = vpack.c.bf16 %v1115_v44, %v1111_v58  ;;  %v5768_v3 = vpop.permute.xlu0 %1185  ;;  %1863 = vrot.lane.b32.xlu1 %v5020_v42, %s9395_s25  ;;  %v1138_v7 = vpack.c.bf16 %v1118_v26, %v1114_v19 }
 0x317   : > { %1849 = vrot.lane.b32.xlu0 %v5123_v12, %s9395_s25  ;;  %2582 = vmatpush1.bf16.msra.mxu0 %v1135_v55  ;;  %v5777_v37 = vpop.permute.xlu1 %1343 }
 0x318   : > { %9397 = vst [vmem:[#allocation141_spill] sm:$0xff] %v5777_v37  ;;  %2764 = vmatprep.subr.bf16.mxu1 %v1138_v7 }
 0x319   : > { %2765 = vmatpush1.bf16.msra.mxu1 %v1137_v46  ;;  %v5779_v44 = vpop.permute.xlu0 %1217  ;;  %1879 = vrot.lane.b32.xlu1 %v5119_v56, %s9395_s25 }
 0x31b   : > { %1865 = vrot.lane.b32.xlu0 %v5038_v51, %s9395_s25  ;;  %v5785_v31 = vpop.permute.xlu1 %1375 }
 0x31c   : > { %9398 = vst [vmem:[#allocation142_spill] sm:$0xff] %v5785_v31  ;;  %v1231_v31 = vsel %vm382_vm1, %v5342_v61, %v5250_v59 }
 0x31d   : > { %v5787_v13 = vpop.permute.xlu0 %1345  ;;  %1835 = vrot.lane.b32.xlu1 %v5163_v35, %s9395_s25 }
 0x31e   : > { %9399 = vst [vmem:[#allocation143_spill] sm:$0xff] %v5787_v13 }
 0x31f   : > { %1881 = vrot.lane.b32.xlu0 %v5130_v8, %s9395_s25  ;;  %v5793_v4 = vpop.permute.xlu1 %1503 }
 0x320   : > { %9400 = vst [vmem:[#allocation144_spill] sm:$0xff] %v5793_v4 }
 0x321   : > { %v5795_v9 = vpop.permute.xlu0 %1377  ;;  %1851 = vrot.lane.b32.xlu1 %v5225_v17, %s9395_s25 }
 0x322   : > { %9401 = vst [vmem:[#allocation145_spill] sm:$0xff] %v5795_v9  ;;  %v1232_v9 = vsel %vm382_vm1, %v5372_v23, %v5262_v45 }
 0x323   : > { %1837 = vrot.lane.b32.xlu0 %v5175_v36, %s9395_s25  ;;  %v5801_v58 = vpop.permute.xlu1 %1535 }
 0x324   : > { %9402 = vst [vmem:[#allocation146_spill] sm:$0xff] %v5801_v58 }
 0x325   : > { %v5803_v19 = vpop.permute.xlu0 %1505  ;;  %1867 = vrot.lane.b32.xlu1 %v5171_v27, %s9395_s25 }
 0x326   : > { %9403 = vst [vmem:[#allocation147_spill] sm:$0xff] %v5803_v19 }
 0x327   : > { %1853 = vrot.lane.b32.xlu0 %v5243_v50, %s9395_s25  ;;  %v5809_v24 = vpop.permute.xlu1 %1695 }
 0x328   : > { %9404 = vst [vmem:[#allocation148_spill] sm:$0xff] %v5809_v24 }
 0x329   : > { %v5811_v43 = vpop.permute.xlu0 %1537  ;;  %1883 = vrot.lane.b32.xlu1 %v5237_v30, %s9395_s25 }
 0x32a   : > { %9405 = vst [vmem:[#allocation149_spill] sm:$0xff] %v5811_v43 }
 0x32b   : > { %1869 = vrot.lane.b32.xlu0 %v5182_v28, %s9395_s25  ;;  %v5817_v26 = vpop.permute.xlu1 %1727  ;;  %v9444_v28 = vld [vmem:[#allocation59_spill] sm:$0xff] }
 0x32c   : > { %9406 = vst [vmem:[#allocation150_spill] sm:$0xff] %v5817_v26 }
 0x32d   : > { %v5819_v10 = vpop.permute.xlu0 %1697  ;;  %1839 = vrot.lane.b32.xlu1 %v5316_v39, %s9395_s25 }
 0x32e   : > { %9407 = vst [vmem:[#allocation151_spill] sm:$0xff] %v5819_v10 }
 0x32f   : > { %1885 = vrot.lane.b32.xlu0 %v5252_v16, %s9395_s25  ;;  %v5825_v55 = vpop.permute.xlu1 %1011 }
 0x331   : > { %v5827_v7 = vpop.permute.xlu0 %1729  ;;  %1855 = vrot.lane.b32.xlu1 %v5434_v11, %s9395_s25  ;;  %v9439_v11 = vld [vmem:[#allocation76_spill] sm:$0xff] }
 0x332   : > { %9408 = vst [vmem:[#allocation152_spill] sm:$0xff] %v5827_v7 }
 0x333   : > { %1841 = vrot.lane.b32.xlu0 %v5346_v60, %s9395_s25  ;;  %v5833_v38 = vpop.permute.xlu1 %1043  ;;  %v9416_v60 = vld [vmem:[#allocation15_spill] sm:$0xff] }
 0x334   : > { %v5922_v16 = vmul.f32 %v1232_v9, %v9416_v60 }
 0x335   : > { %v5835_v46 = vpop.permute.xlu0 %1013  ;;  %1871 = vrot.lane.b32.xlu1 %v5327_v54, %s9395_s25 }
 0x336   : > { %9417 = vst [vmem:[#allocation160_spill] sm:$0xff] %v5922_v16 }
 0x337   : > { %1857 = vrot.lane.b32.xlu0 %v5454_v1, %s9395_s25  ;;  %v5841_v26 = vpop.permute.xlu1 %1171  ;;  %v9422_v1 = vld [vmem:[#allocation70_spill] sm:$0xff] }
 0x338   : > { %9409 = vst [vmem:[#allocation153_spill] sm:$0xff] %v5841_v26 }
 0x339   : > { %v5843_v24 = vpop.permute.xlu0 %1045  ;;  %1887 = vrot.lane.b32.xlu1 %v5448_v25, %s9395_s25 }
 0x33b   : > { %1873 = vrot.lane.b32.xlu0 %v5369_v14, %s9395_s25  ;;  %v5849_v7 = vpop.permute.xlu1 %1203 }
 0x33c   : > { %9410 = vst [vmem:[#allocation154_spill] sm:$0xff] %v5849_v7 }
 0x33d   : > { %v5851_v10 = vpop.permute.xlu0 %1173  ;;  %1843 = vrot.lane.b32.xlu1 %v5528_v5, %s9395_s25  ;;  %v9429_v5 = vld [vmem:[#allocation56_spill] sm:$0xff] }
 0x33f   : > { %1889 = vrot.lane.b32.xlu0 %v5464_v57, %s9395_s25  ;;  %v5857_v58 = vpop.permute.xlu1 %1331  ;;  %v9423_v57 = vld [vmem:[#allocation54_spill] sm:$0xff] }
 0x340   : > { %9411 = vst [vmem:[#allocation155_spill] sm:$0xff] %v5857_v58  ;;  %v1240_v58 = vsel %vm382_vm1, %v5254_v22, %v5372_v23  ;;  %v1248_v23 = vsel %vm382_vm1, %v5380_v63, %v5254_v22 }
 0x341   : > { %v5859_v4 = vpop.permute.xlu0 %1205  ;;  %1859 = vrot.lane.b32.xlu1 %v5638_v49, %s9395_s25 }
 0x342   : > { %9412 = vst [vmem:[#allocation156_spill] sm:$0xff] %v5859_v4  ;;  %v9453_v4 = vld [vmem:[#allocation18_spill] sm:$0xff] }
 0x343   : > { %1845 = vrot.lane.b32.xlu0 %v5558_v33, %s9395_s25  ;;  %v5865_v43 = vpop.permute.xlu1 %1363 }
 0x344   : > { %9413 = vst [vmem:[#allocation157_spill] sm:$0xff] %v5865_v43  ;;  %v1247_v43 = vsel %vm382_vm1, %v5367_v32, %v5241_v52 }
 0x345   : > { %v5867_v19 = vpop.permute.xlu0 %1333  ;;  %1875 = vrot.lane.b32.xlu1 %v5539_v62, %s9395_s25  ;;  %v1224_v62 = vsel %vm382_vm1, %v5262_v45, %v5380_v63  ;;  %v9432_v63 = vld [vmem:[#allocation23_spill] sm:$0xff] }
 0x346   : > { %9414 = vst [vmem:[#allocation158_spill] sm:$0xff] %v5867_v19  ;;  %v1239_v19 = vsel %vm382_vm1, %v5241_v52, %v5342_v61  ;;  %v1223_v61 = vsel %vm382_vm1, %v5250_v59, %v5367_v32  ;;  %v1399_v59 = vsel %vm415_vm2, %v9423_v57, %v9422_v1  ;;  %v9424_v32 = vld [vmem:[#allocation11_spill] sm:$0xff] }
 0x347   : > { %1861 = vrot.lane.b32.xlu0 %v5654_v6, %s9395_s25  ;;  %v5893_v37 = vpop.permute.xlu1 %1491  ;;  %v5963_v52 = vmul.f32 %v1247_v43, %v9424_v32  ;;  %v9434_v6 = vld [vmem:[#allocation58_spill] sm:$0xff] }
 0x348   : > { %9415 = vst [vmem:[#allocation159_spill] sm:$0xff] %v5893_v37  ;;  %v9419_v37 = vld [vmem:[#allocation14_spill] sm:$0xff] }
 0x349   : > { %v5924_v22 = vpop.permute.xlu0 %1365  ;;  %1891 = vrot.lane.b32.xlu1 %v5650_v0, %s9395_s25  ;;  %v5935_v14 = vmul.f32 %v1240_v58, %v9419_v37  ;;  %v9421_v0 = vld [vmem:[#allocation55_spill] sm:$0xff]  ;;  %v5953_v58 = vmul.f32 %v1248_v23, %v9424_v32  ;;  %v9426_v23 = vld [vmem:[#allocation12_spill] sm:$0xff] }
 0x34a   : > { %9418 = vst [vmem:[#allocation161_spill] sm:$0xff] %v5924_v22  ;;  %v5942_v22 = vmul.f32 %v1231_v31, %v9416_v60  ;;  %v1391_v13 = vsel %vm415_vm2, %v9422_v1, %v9421_v0  ;;  %v5960_v31 = vmul.f32 %v1239_v19, %v9419_v37  ;;  %v5972_v33 = vmul.f32 %v1223_v61, %v9426_v23  ;;  %v9427_v19 = vld [vmem:[#allocation71_spill] sm:$0xff]  ;;  %v9433_v1 = vld [vmem:[#allocation25_spill] sm:$0xff] }
 0x34b   : > { %1877 = vrot.lane.b32.xlu0 %v5581_v40, %s9395_s25  ;;  %v5957_v9 = vpop.permute.xlu1 %1523  ;;  %v1407_v43 = vsel %vm415_vm2, %v9427_v19, %v9423_v57  ;;  %v5989_v61 = vmul.f32 %v1399_v59, %v9432_v63  ;;  %v5992_v40 = vmul.f32 %v1391_v13, %v9433_v1  ;;  %v6001_v54 = vmul.f32 %v1224_v62, %v9426_v23  ;;  %v9435_v59 = vld [vmem:[#allocation74_spill] sm:$0xff]  ;;  %v9437_v62 = vld [vmem:[#allocation24_spill] sm:$0xff] }
 0x34c   : > { %9420 = vst [vmem:[#allocation162_spill] sm:$0xff] %v5942_v22  ;;  %9425 = vst [vmem:[#allocation55_spill] sm:$0xff] %v5957_v9  ;;  %v9428_v9 = vld [vmem:[#allocation72_spill] sm:$0xff]  ;;  %v1383_v13 = vsel %vm415_vm2, %v9421_v0, %v9427_v19  ;;  %v6018_v49 = vmul.f32 %v1407_v43, %v9437_v62  ;;  %v1384_v0 = vsel %vm415_vm2, %v9434_v6, %v9435_v59  ;;  %v9438_v19 = vld [vmem:[#allocation62_spill] sm:$0xff] }
 0x34d   : > { %v1400_v25 = vsel %vm415_vm2, %v9429_v5, %v9428_v9  ;;  %v5984_v45 = vpop.permute.xlu0 %1493  ;;  %1991 = vrot.lane.b32.xlu1 %v5013_v15, %s9431_s12  ;;  %v1392_v57 = vsel %vm415_vm2, %v9428_v9, %v9434_v6  ;;  %v9448_v22 = vld [vmem:[#allocation17_spill] sm:$0xff] }
 0x34e   : > { %9430 = vst [vmem:[#allocation70_spill] sm:$0xff] %v5984_v45  ;;  %v1408_v45 = vsel %vm415_vm2, %v9435_v59, %v9429_v5  ;;  %v6021_v15 = vmul.f32 %v1400_v25, %v9432_v63  ;;  %v1552_v5 = vsel %vm448_vm3, %v9439_v11, %v9438_v19  ;;  %v9441_v25 = vld [vmem:[#allocation78_spill] sm:$0xff] }
 0x34f   : > { %1893 = vrot.lane.b32.xlu0 %v5664_v41, %s9395_s25  ;;  %v6015_v9 = vpop.permute.xlu1 %1683  ;;  %v6032_v41 = vmul.f32 %v1392_v57, %v9433_v1  ;;  %v1544_v39 = vsel %vm448_vm3, %v9438_v19, %v9441_v25  ;;  %v9443_v57 = vld [vmem:[#allocation26_spill] sm:$0xff]  ;;  %v9446_v19 = vld [vmem:[#allocation57_spill] sm:$0xff]  ;;  %v6076_v16 = vmul.f32 %v1552_v5, %v9448_v22 }
 0x350   : > { %9436 = vst [vmem:[#allocation54_spill] sm:$0xff] %v6015_v9  ;;  %v9440_v9 = vld [vmem:[#allocation60_spill] sm:$0xff]  ;;  %v6051_v1 = vmul.f32 %v1383_v13, %v9443_v57 }
 0x351   : > { %v1560_v43 = vsel %vm448_vm3, %v9440_v9, %v9439_v11  ;;  %v1568_v6 = vsel %vm448_vm3, %v9441_v25, %v9440_v9  ;;  %v6046_v59 = vpop.permute.xlu0 %1525  ;;  %2007 = vrot.lane.b32.xlu1 %v5111_v18, %s9431_s12  ;;  %v9445_v11 = vld [vmem:[#allocation73_spill] sm:$0xff]  ;;  %v6062_v9 = vmul.f32 %v1408_v45, %v9437_v62  ;;  %v6065_v25 = vmul.f32 %v1384_v0, %v9443_v57  ;;  %v9447_v18 = vld [vmem:[#allocation75_spill] sm:$0xff]  ;;  %v9451_v57 = vld [vmem:[#allocation16_spill] sm:$0xff] }
 0x352   : > { %9442 = vst [vmem:[#allocation71_spill] sm:$0xff] %v6046_v59  ;;  %v1551_v7 = vsel %vm448_vm3, %v9445_v11, %v9444_v28  ;;  %v1559_v30 = vsel %vm448_vm3, %v9446_v19, %v9445_v11  ;;  %v1543_v13 = vsel %vm448_vm3, %v9444_v28, %v9447_v18  ;;  %v1567_v59 = vsel %vm448_vm3, %v9447_v18, %v9446_v19  ;;  %v9450_v11 = vld [vmem:[#allocation13_spill] sm:$0xff]  ;;  %v9460_v18 = vld [vmem:[#allocation86_spill] sm:$0xff] }
 0x353   : > { %9449 = vst [vmem:[#allocation72_spill] sm:$0xff] %v6076_v16  ;;  %1993 = vrot.lane.b32.xlu0 %v5027_v29, %s9431_s12  ;;  %v1028_v45 = vpop.permute.xlu1 %1027  ;;  %v6081_v0 = vmul.f32 %v1560_v43, %v9450_v11  ;;  %v6084_v62 = vmul.f32 %v1568_v6, %v9451_v57  ;;  %v6087_v28 = vmul.f32 %v1544_v39, %v9453_v4  ;;  %v9462_v29 = vld [vmem:[#allocation84_spill] sm:$0xff]  ;;  %v9463_v39 = vld [vmem:[#allocation63_spill] sm:$0xff] }
 0x354   : > { %v6094_v5 = vmul.f32 %v1559_v30, %v9450_v11  ;;  %v6097_v19 = vmul.f32 %v1551_v7, %v9448_v22  ;;  %v6106_v6 = vmul.f32 %v1567_v59, %v9451_v57  ;;  %v6109_v26 = vmul.f32 %v1543_v13, %v9453_v4  ;;  %v9461_v30 = vld [vmem:[#allocation104_spill] sm:$0xff]  ;;  %v9464_v57 = vld [vmem:[#allocation77_spill] sm:$0xff]  ;;  %v9466_v11 = vld [vmem:[#allocation90_spill] sm:$0xff] }
 0x355   : > { %9452 = vst [vmem:[#allocation56_spill] sm:$0xff] %v6084_v62  ;;  %9454 = vst [vmem:[#allocation58_spill] sm:$0xff] %v6087_v28  ;;  %v6099_v43 = vpop.permute.xlu0 %1685  ;;  %2023 = vrot.lane.b32.xlu1 %v5020_v42, %s9431_s12  ;;  %v1233_v7 = vsel %vm382_vm1, %v9461_v30, %v9460_v18  ;;  %v6127_v13 = vsel %vm481_vm5, %v9464_v57, %v9463_v39  ;;  %v1085_v59 = vsel %vm349_vm0, %v5825_v55, %v1028_v45  ;;  %v9467_v57 = vld [vmem:[#allocation88_spill] sm:$0xff]  ;;  %v9471_v28 = vld [vmem:[#allocation89_spill] sm:$0xff] }
 0x356   : > { %9455 = vst [vmem:[#allocation74_spill] sm:$0xff] %v6094_v5  ;;  %9456 = vst [vmem:[#allocation62_spill] sm:$0xff] %v6097_v19  ;;  %v1242_v19 = vsel %vm382_vm1, %v9467_v57, %v5584_v2 }
 0x357   : > { %9457 = vst [vmem:[#allocation76_spill] sm:$0xff] %v6099_v43  ;;  %9458 = vst [vmem:[#allocation60_spill] sm:$0xff] %v6106_v6  ;;  %v1241_v43 = vsel %vm382_vm1, %v9462_v29, %v9461_v30  ;;  %2009 = vrot.lane.b32.xlu0 %v5123_v12, %s9431_s12  ;;  %v1060_v4 = vpop.permute.xlu1 %1059  ;;  %v6146_v12 = vmul.f32 %v1233_v7, %v9416_v60  ;;  %v1234_v30 = vsel %vm382_vm1, %v5584_v2, %v9466_v11 }
 0x358   : > { %9459 = vst [vmem:[#allocation78_spill] sm:$0xff] %v6109_v26  ;;  %9465 = vst [vmem:[#allocation59_spill] sm:$0xff] %v6127_v13  ;;  %v6143_v39 = vmul.f32 %v1241_v43, %v9419_v37  ;;  %v1225_v43 = vsel %vm382_vm1, %v9460_v18, %v5579_v34  ;;  %v1249_v7 = vsel %vm382_vm1, %v5579_v34, %v9462_v29  ;;  %v9468_v13 = vld [vmem:[#allocation108_spill] sm:$0xff]  ;;  %v9470_v26 = vld [vmem:[#allocation107_spill] sm:$0xff] }
 0x359   : > { %v1030_v42 = vpop.permute.xlu0 %1029  ;;  %2039 = vrot.lane.b32.xlu1 %v5119_v56, %s9431_s12  ;;  %v1250_v16 = vsel %vm382_vm1, %v9468_v13, %v9467_v57  ;;  %v9469_v56 = vld [vmem:[#allocation19_spill] sm:$0xff]  ;;  %v1069_v18 = vsel %vm349_vm0, %v5833_v38, %v1060_v4  ;;  %v1093_v62 = vsel %vm349_vm0, %v1060_v4, %v5825_v55  ;;  %v6186_v57 = vmul.f32 %v1242_v19, %v9419_v37 }
 0x35a   : > { %v1086_v2 = vsel %vm349_vm0, %v5835_v46, %v1030_v42  ;;  %v1120_v6 = vmul.f32 %v1085_v59, %v9469_v56  ;;  %v6189_v59 = vmul.f32 %v1234_v30, %v9416_v60  ;;  %v1401_v5 = vsel %vm415_vm2, %v9471_v28, %v9470_v26 }
 0x35b   : > { %v1124_v29 = vmul.f32 %v1086_v2, %v9469_v56  ;;  %2025 = vrot.lane.b32.xlu0 %v5038_v51, %s9431_s12  ;;  %v6183_v34 = vpop.permute.xlu1 %1187  ;;  %v1078_v4 = vsel %vm349_vm0, %v1030_v42, %v5843_v24  ;;  %v1226_v55 = vsel %vm382_vm1, %v9466_v11, %v9468_v13  ;;  %v6203_v19 = vmul.f32 %v1250_v16, %v9424_v32 }
 0x35c   : > { %v1077_v30 = vsel %vm349_vm0, %v1028_v45, %v5833_v38  ;;  %v1119_v51 = vmul.f32 %v1093_v62, %v4790_v47  ;;  %v1122_v42 = vmul.f32 %v1069_v18, %v4800_v53  ;;  %v1125_v13 = vmul.f32 %v1078_v4, %v4793_v48  ;;  %v9472_v18 = vld [vmem:[#allocation91_spill] sm:$0xff] }
 0x35d   : > { %v1062_v2 = vpop.permute.xlu0 %1061  ;;  %1995 = vrot.lane.b32.xlu1 %v5163_v35, %s9431_s12  ;;  %v1140_v56 = vpack.c.bf16 %v1124_v29, %v1120_v6  ;;  %v1263_v6 = vmul.f32 %v1249_v7, %v9424_v32  ;;  %v1270_v29 = vmul.f32 %v1226_v55, %v9426_v23  ;;  %v9481_v4 = vld [vmem:[#allocation123_spill] sm:$0xff] }
 0x35e   : > { %v1070_v11 = vsel %vm349_vm0, %v5843_v24, %v1062_v2  ;;  %v1094_v16 = vsel %vm349_vm0, %v1062_v2, %v5835_v46  ;;  %v1266_v24 = vmul.f32 %v1225_v43, %v9426_v23  ;;  %v6231_v46 = vsel %vm415_vm2, %v9470_v26, %v9472_v18 }
 0x35f   : > { %v1123_v38 = vmul.f32 %v1094_v16, %v4790_v47  ;;  %v1126_v45 = vmul.f32 %v1070_v11, %v4800_v53  ;;  %2041 = vrot.lane.b32.xlu0 %v5130_v8, %s9431_s12  ;;  %2583 = vmatprep.subr.bf16.mxu0 %v1140_v56  ;;  %v6223_v62 = vpop.permute.xlu1 %1219  ;;  %v1121_v2 = vmul.f32 %v1077_v30, %v4793_v48  ;;  %v9473_v16 = vld [vmem:[#allocation109_spill] sm:$0xff] }
 0x360   : > { %v6240_v43 = vmul.f32 %v1401_v5, %v9432_v63  ;;  %v6246_v26 = vsel %vm415_vm2, %v9472_v18, %v9473_v16  ;;  %v6252_v55 = vsel %vm415_vm2, %v9473_v16, %v9471_v28  ;;  %v1291_v30 = vpack.c.bf16 %v6203_v19, %v1263_v6  ;;  %v9474_v5 = vld [vmem:[#allocation126_spill] sm:$0xff]  ;;  %v9479_v6 = vld [vmem:[#allocation92_spill] sm:$0xff]  ;;  %v9482_v53 = vld [vmem:[#allocation125_spill] sm:$0xff] }
 0x361   : > { %v1139_v56 = vpack.c.bf16 %v1123_v38, %v1119_v51  ;;  %v1190_v11 = vpop.permute.xlu0 %1189  ;;  %2011 = vrot.lane.b32.xlu1 %v5225_v17, %s9431_s12  ;;  %v1142_v7 = vpack.c.bf16 %v1126_v45, %v1122_v42  ;;  %v1292_v51 = vpack.c.bf16 %v6186_v57, %v6143_v39  ;;  %v1244_v42 = vsel %vm382_vm1, %v9474_v5, %v5768_v3  ;;  %v9475_v18 = vld [vmem:[#allocation94_spill] sm:$0xff]  ;;  %v9477_v39 = vld [vmem:[#allocation128_spill] sm:$0xff] }
 0x362   : > { %v1141_v38 = vpack.c.bf16 %v1125_v13, %v1121_v2  ;;  %v9476_v28 = vld [vmem:[#allocation110_spill] sm:$0xff]  ;;  %v1228_v57 = vsel %vm382_vm1, %v9477_v39, %v5779_v44  ;;  %v9478_v19 = vpack.c.bf16 %v5935_v14, %v5960_v31  ;;  %v1294_v13 = vpack.c.bf16 %v1270_v29, %v1266_v24  ;;  %v9483_v14 = vld [vmem:[#allocation112_spill] sm:$0xff] }
 0x363   : > { %1997 = vrot.lane.b32.xlu0 %v5175_v36, %s9431_s12  ;;  %2584 = vmatpush1.bf16.msra.mxu0 %v1139_v56  ;;  %v6263_v45 = vpop.permute.xlu1 %1347  ;;  %v1394_v16 = vsel %vm415_vm2, %v9476_v28, %v9475_v18  ;;  %v1402_v2 = vsel %vm415_vm2, %v9479_v6, %v9476_v28  ;;  %v9480_v56 = vld [vmem:[#allocation140_spill] sm:$0xff]  ;;  %v1386_v31 = vsel %vm415_vm2, %v9475_v18, %v9483_v14 }
 0x364   : > { %2766 = vmatprep.subr.bf16.mxu1 %v1142_v7  ;;  %2585 = vmatprep.subr.bf16.mxu0 %v9478_v19  ;;  %v1243_v48 = vsel %vm382_vm1, %v9481_v4, %v9480_v56  ;;  %v1227_v7 = vsel %vm382_vm1, %v9482_v53, %v5765_v20  ;;  %v1410_v24 = vsel %vm415_vm2, %v9483_v14, %v9479_v6  ;;  %v9487_v6 = vld [vmem:[#allocation156_spill] sm:$0xff] }
 0x365   : > { %2767 = vmatpush1.bf16.msra.mxu1 %v1141_v38  ;;  %v1222_v47 = vpop.permute.xlu0 %1221  ;;  %2027 = vrot.lane.b32.xlu1 %v5171_v27, %s9431_s12  ;;  %v1276_v29 = vmul.f32 %v1244_v42, %v9419_v37  ;;  %v1252_v38 = vsel %vm382_vm1, %v5779_v44, %v9474_v5  ;;  %v9484_v28 = vpack.c.bf16 %v6001_v54, %v5972_v33 }
 0x366   : > { %v1251_v18 = vsel %vm382_vm1, %v5765_v20, %v9481_v4  ;;  %v1278_v19 = vmul.f32 %v1228_v57, %v9426_v23  ;;  %v1246_v42 = vsel %vm382_vm1, %v5851_v10, %v1190_v11  ;;  %v9485_v44 = vpack.c.bf16 %v5953_v58, %v5963_v52  ;;  %v9486_v58 = vld [vmem:[#allocation153_spill] sm:$0xff] }
 0x367   : > { %2768 = vmatprep.subr.bf16.mxu1 %v9484_v28  ;;  %2013 = vrot.lane.b32.xlu0 %v5243_v50, %s9431_s12  ;;  %v6319_v54 = vpop.permute.xlu1 %1379  ;;  %v1235_v33 = vsel %vm382_vm1, %v9480_v56, %v9482_v53  ;;  %v1272_v20 = vmul.f32 %v1243_v48, %v9419_v37  ;;  %v1274_v4 = vmul.f32 %v1227_v7, %v9426_v23  ;;  %v9488_v48 = vld [vmem:[#allocation160_spill] sm:$0xff]  ;;  %v9489_v56 = vld [vmem:[#allocation162_spill] sm:$0xff] }
 0x368   : > { %2586 = vmatpush1.bf16.msra.mxu0 %v9485_v44  ;;  %v1236_v5 = vsel %vm382_vm1, %v5768_v3, %v9477_v39  ;;  %v1275_v52 = vmul.f32 %v1252_v38, %v9424_v32  ;;  %v1245_v57 = vsel %vm382_vm1, %v9486_v58, %v6183_v34  ;;  %v1230_v53 = vsel %vm382_vm1, %v9487_v6, %v1222_v47  ;;  %v9491_v3 = vld [vmem:[#allocation52_spill] sm:$0xff] }
 0x369   : > { %2587 = vmatprep.subr.bf16.mxu0 %v1292_v51  ;;  %v9490_v7 = vpack.c.bf16 %v9488_v48, %v9489_v56  ;;  %v6342_v14 = vpop.permute.xlu0 %1349  ;;  %2043 = vrot.lane.b32.xlu1 %v9491_v3, %s9431_s12  ;;  %v1271_v51 = vmul.f32 %v1251_v18, %v9424_v32  ;;  %v1284_v39 = vmul.f32 %v1246_v42, %v9419_v37  ;;  %v9492_v48 = vld [vmem:[#allocation154_spill] sm:$0xff] }
 0x36a   : > { %v1254_v38 = vsel %vm382_vm1, %v1222_v47, %v5851_v10  ;;  %v1296_v28 = vpack.c.bf16 %v1276_v29, %v1272_v20  ;;  %v1277_v44 = vmul.f32 %v1236_v5, %v9416_v60  ;;  %v1229_v56 = vsel %vm382_vm1, %v9492_v48, %v6223_v62  ;;  %v9496_v5 = vld [vmem:[#allocation25_spill] sm:$0xff] }
 0x36b   : > { %2769 = vmatpush1.bf16.msra.mxu1 %v9490_v7  ;;  %v9493_v7 = vld [vmem:[#allocation51_spill] sm:$0xff]  ;;  %v6358_v18 = vpop.permute.xlu1 %1507  ;;  %v1298_v42 = vpack.c.bf16 %v1278_v19, %v1274_v4  ;;  %v1280_v27 = vmul.f32 %v1245_v57, %v9419_v37  ;;  %v1253_v47 = vsel %vm382_vm1, %v6223_v62, %v9486_v58  ;;  %v1238_v10 = vsel %vm382_vm1, %v1190_v11, %v9487_v6  ;;  %v9495_v62 = vld [vmem:[#allocation66_spill] sm:$0xff]  ;;  %v9497_v6 = vld [vmem:[#allocation53_spill] sm:$0xff] }
 0x36c   : > { %2770 = vmatprep.subr.bf16.mxu1 %v1294_v13  ;;  %2029 = vrot.lane.b32.xlu0 %v9493_v7, %s9431_s12  ;;  %v1286_v13 = vmul.f32 %v1230_v53, %v9426_v23  ;;  %v1273_v29 = vmul.f32 %v1235_v33, %v9416_v60  ;;  %v1283_v20 = vmul.f32 %v1254_v38, %v9424_v32 }
 0x36d   : > { %2588 = vmatpush1.bf16.msra.mxu0 %v1291_v30  ;;  %v1295_v30 = vpack.c.bf16 %v1275_v52, %v1271_v51  ;;  %v9494_v19 = vpack.c.bf16 %v6189_v59, %v6146_v12  ;;  %v6374_v4 = vpop.permute.xlu0 %1381  ;;  %1999 = vrot.lane.b32.xlu1 %v9495_v62, %s9431_s12  ;;  %v6379_v58 = vmul.f32 %v1394_v16, %v9496_v5  ;;  %v9498_v51 = vld [vmem:[#allocation24_spill] sm:$0xff] }
 0x36e   : > { %2589 = vmatprep.subr.bf16.mxu0 %v1296_v28  ;;  %v1237_v11 = vsel %vm382_vm1, %v6183_v34, %v9492_v48  ;;  %v1282_v33 = vmul.f32 %v1229_v56, %v9426_v23  ;;  %v1300_v52 = vpack.c.bf16 %v1284_v39, %v1280_v27  ;;  %v1297_v57 = vpack.c.bf16 %v1277_v44, %v1273_v29  ;;  %v9499_v34 = vld [vmem:[#allocation26_spill] sm:$0xff] }
 0x36f   : > { %2771 = vmatpush1.bf16.msra.mxu1 %v9494_v19  ;;  %v1279_v12 = vmul.f32 %v1253_v47, %v9424_v32  ;;  %v1285_v59 = vmul.f32 %v1238_v10, %v9416_v60  ;;  %v6390_v16 = vpop.permute.xlu1 %1539  ;;  %v1428_v53 = vmul.f32 %v1402_v2, %v9432_v63  ;;  %v1427_v38 = vmul.f32 %v1410_v24, %v9498_v51  ;;  %v9501_v24 = vld [vmem:[#allocation95_spill] sm:$0xff]  ;;  %v9503_v10 = vld [vmem:[#allocation93_spill] sm:$0xff]  ;;  %v9506_v19 = vld [vmem:[#allocation68_spill] sm:$0xff] }
 0x370   : > { %2772 = vmatprep.subr.bf16.mxu1 %v1298_v42  ;;  %2045 = vrot.lane.b32.xlu0 %v9497_v6, %s9431_s12  ;;  %v1430_v28 = vmul.f32 %v1386_v31, %v9499_v34  ;;  %v1302_v48 = vpack.c.bf16 %v1286_v13, %v1282_v33  ;;  %v6397_v27 = vmul.f32 %v6231_v46, %v9496_v5  ;;  %v9500_v42 = vld [vmem:[#allocation82_spill] sm:$0xff]  ;;  %v9502_v47 = vld [vmem:[#allocation111_spill] sm:$0xff]  ;;  %v9516_v32 = vld [vmem:[#allocation129_spill] sm:$0xff] }
 0x371   : > { %2590 = vmatpush1.bf16.msra.mxu0 %v1295_v30  ;;  %v1281_v39 = vmul.f32 %v1237_v11, %v9416_v60  ;;  %v1299_v44 = vpack.c.bf16 %v1283_v20, %v1279_v12  ;;  %v6400_v56 = vpop.permute.xlu0 %1509  ;;  %2015 = vrot.lane.b32.xlu1 %v9500_v42, %s9431_s12  ;;  %v1423_v2 = vmul.f32 %v6252_v55, %v9498_v51  ;;  %v9504_v55 = vld [vmem:[#allocation143_spill] sm:$0xff]  ;;  %v9505_v30 = vld [vmem:[#allocation130_spill] sm:$0xff] }
 0x372   : > { %2591 = vmatprep.subr.bf16.mxu0 %v1300_v52  ;;  %v1426_v31 = vmul.f32 %v6246_v26, %v9499_v34  ;;  %v6412_v46 = vsel %vm448_vm3, %v9502_v47, %v9501_v24  ;;  %v6418_v13 = vsel %vm448_vm3, %v9503_v10, %v9502_v47  ;;  %v1453_v29 = vpack.c.bf16 %v6379_v58, %v6397_v27  ;;  %v9508_v52 = vld [vmem:[#allocation145_spill] sm:$0xff]  ;;  %v9515_v23 = vld [vmem:[#allocation142_spill] sm:$0xff] }
 0x373   : > { %2773 = vmatpush1.bf16.msra.mxu1 %v1297_v57  ;;  %v1404_v26 = vsel %vm415_vm2, %v9505_v30, %v9504_v55  ;;  %v1301_v20 = vpack.c.bf16 %v1285_v59, %v1281_v39  ;;  %v6428_v11 = vpop.permute.xlu1 %1699  ;;  %v1451_v33 = vpack.c.bf16 %v1427_v38, %v1423_v2  ;;  %v9509_v57 = vld [vmem:[#allocation132_spill] sm:$0xff]  ;;  %v9510_v58 = vpack.c.bf16 %v6021_v15, %v5989_v61  ;;  %v9511_v59 = vld [vmem:[#allocation98_spill] sm:$0xff]  ;;  %v9513_v47 = vld [vmem:[#allocation141_spill] sm:$0xff] }
 0x374   : > { %2774 = vmatprep.subr.bf16.mxu1 %v1302_v48  ;;  %2001 = vrot.lane.b32.xlu0 %v9506_v19, %s9431_s12  ;;  %9507 = vst [vmem:[#allocation73_spill] sm:$0xff] %v6428_v11  ;;  %v1388_v12 = vsel %vm415_vm2, %v9509_v57, %v9508_v52  ;;  %v1452_v48 = vpack.c.bf16 %v1428_v53, %v6240_v43  ;;  %v9512_v39 = vld [vmem:[#allocation114_spill] sm:$0xff]  ;;  %v9514_v38 = vld [vmem:[#allocation127_spill] sm:$0xff]  ;;  %v9518_v53 = vld [vmem:[#allocation96_spill] sm:$0xff] }
 0x375   : > { %2592 = vmatpush1.bf16.msra.mxu0 %v1299_v44  ;;  %v1454_v27 = vpack.c.bf16 %v1430_v28, %v1426_v31  ;;  %v6442_v44 = vsel %vm448_vm3, %v9512_v39, %v9511_v59  ;;  %v1403_v2 = vsel %vm415_vm2, %v9514_v38, %v9513_v47  ;;  %v1387_v15 = vsel %vm415_vm2, %v9516_v32, %v9515_v23  ;;  %v6452_v61 = vpop.permute.xlu0 %1541  ;;  %v9517_v43 = vld [vmem:[#allocation67_spill] sm:$0xff]  ;;  %v9519_v31 = vld [vmem:[#allocation116_spill] sm:$0xff] }
 0x376   : > { %2593 = vmatprep.subr.bf16.mxu0 %v9510_v58  ;;  %2031 = vrot.lane.b32.xlu1 %v9517_v43, %s9431_s12  ;;  %v1562_v28 = vsel %vm448_vm3, %v9518_v53, %v9512_v39  ;;  %v6464_v58 = vsel %vm448_vm3, %v9511_v59, %v9519_v31  ;;  %v1436_v60 = vmul.f32 %v1404_v26, %v9432_v63  ;;  %v9521_v59 = vld [vmem:[#allocation158_spill] sm:$0xff]  ;;  %v9522_v43 = vld [vmem:[#allocation85_spill] sm:$0xff] }
 0x377   : > { %2775 = vmatpush1.bf16.msra.mxu1 %v1301_v20  ;;  %v1412_v20 = vsel %vm415_vm2, %v9508_v52, %v9505_v30  ;;  %v9520_v37 = vpack.c.bf16 %v6065_v25, %v6051_v1  ;;  %v1411_v39 = vsel %vm415_vm2, %v9515_v23, %v9514_v38  ;;  %v1438_v11 = vmul.f32 %v1388_v12, %v9499_v34  ;;  %v9526_v38 = vld [vmem:[#allocation161_spill] sm:$0xff] }
 0x378   : > { %v1406_v26 = vsel %vm415_vm2, %v9521_v59, %v6342_v14  ;;  %2017 = vrot.lane.b32.xlu0 %v9522_v43, %s9431_s12  ;;  %v9523_v30 = vpack.c.bf16 %v6062_v9, %v6018_v49  ;;  %v1395_v1 = vsel %vm415_vm2, %v9513_v47, %v9516_v32  ;;  %v1432_v23 = vmul.f32 %v1403_v2, %v9432_v63  ;;  %v9525_v9 = vld [vmem:[#allocation155_spill] sm:$0xff] }
 0x379   : > { %2776 = vmatprep.subr.bf16.mxu1 %v9520_v37  ;;  %v6488_v37 = vpop.permute.xlu1 %1715  ;;  %v1434_v25 = vmul.f32 %v1387_v15, %v9499_v34  ;;  %v1396_v52 = vsel %vm415_vm2, %v9504_v55, %v9509_v57  ;;  %v1435_v49 = vmul.f32 %v1412_v20, %v9498_v51  ;;  %v1405_v12 = vsel %vm415_vm2, %v9525_v9, %v6263_v45  ;;  %v6512_v2 = vpop.permute.xlu0 %1701  ;;  %v9528_v55 = vld [vmem:[#allocation83_spill] sm:$0xff] }
 0x37a   : > { %2594 = vmatpush1.bf16.msra.mxu0 %v9523_v30  ;;  %9524 = vst [vmem:[#allocation57_spill] sm:$0xff] %v6488_v37  ;;  %v1390_v32 = vsel %vm415_vm2, %v9526_v38, %v6374_v4  ;;  %v9527_v47 = vpack.c.bf16 %v6032_v41, %v5992_v40  ;;  %2047 = vrot.lane.b32.xlu1 %v9528_v55, %s9431_s12  ;;  %v9529_v40 = vld [vmem:[#allocation157_spill] sm:$0xff] }
 0x37b   : > { %2595 = vmatprep.subr.bf16.mxu0 %v1452_v48  ;;  %v1431_v57 = vmul.f32 %v1411_v39, %v9498_v51  ;;  %v1444_v48 = vmul.f32 %v1406_v26, %v9432_v63  ;;  %v1414_v15 = vsel %vm415_vm2, %v6374_v4, %v9521_v59  ;;  %v1456_v20 = vpack.c.bf16 %v1436_v60, %v1432_v23 }
 0x37c   : > { %2777 = vmatpush1.bf16.msra.mxu1 %v9527_v47  ;;  %v1437_v30 = vmul.f32 %v1396_v52, %v9496_v5  ;;  %v1389_v41 = vsel %vm415_vm2, %v9529_v40, %v6319_v54  ;;  %v9530_v47 = vld [vmem:[#allocation69_spill] sm:$0xff]  ;;  %v1458_v26 = vpack.c.bf16 %v1438_v11, %v1434_v25  ;;  %v1440_v37 = vmul.f32 %v1405_v12, %v9432_v63  ;;  %v9531_v25 = vld [vmem:[#allocation102_spill] sm:$0xff]  ;;  %v9532_v12 = vld [vmem:[#allocation87_spill] sm:$0xff] }
 0x37d   : > { %2778 = vmatprep.subr.bf16.mxu1 %v1454_v27  ;;  %2033 = vrot.lane.b32.xlu0 %v9530_v47, %s9431_s12  ;;  %v6529_v39 = vpop.permute.xlu1 %1731  ;;  %v1413_v60 = vsel %vm415_vm2, %v6319_v54, %v9525_v9  ;;  %v1398_v4 = vsel %vm415_vm2, %v6342_v14, %v9526_v38  ;;  %v1446_v27 = vmul.f32 %v1390_v32, %v9499_v34  ;;  %v6543_v23 = vpop.permute.xlu0 %1717  ;;  %v9556_v63 = vld [vmem:[#allocation78_spill] sm:$0xff] }
 0x37e   : > { %2596 = vmatpush1.bf16.msra.mxu0 %v1451_v33  ;;  %v1433_v33 = vmul.f32 %v1395_v1, %v9496_v5  ;;  %v1455_v59 = vpack.c.bf16 %v1435_v49, %v1431_v57  ;;  %v1443_v11 = vmul.f32 %v1414_v15, %v9498_v51  ;;  %2003 = vrot.lane.b32.xlu1 %v9531_v25, %s9431_s12  ;;  %v9535_v57 = vld [vmem:[#allocation13_spill] sm:$0xff] }
 0x37f   : > { %2597 = vmatprep.subr.bf16.mxu0 %v1456_v20  ;;  %v1570_v54 = vsel %vm448_vm3, %v9519_v31, %v9518_v53  ;;  %v1397_v14 = vsel %vm415_vm2, %v6263_v45, %v9529_v40  ;;  %v1442_v1 = vmul.f32 %v1389_v41, %v9499_v34  ;;  %v1460_v52 = vpack.c.bf16 %v1444_v48, %v1440_v37  ;;  %v9534_v53 = vld [vmem:[#allocation113_spill] sm:$0xff]  ;;  %v9537_v40 = vld [vmem:[#allocation80_spill] sm:$0xff]  ;;  %v9551_v34 = vld [vmem:[#allocation146_spill] sm:$0xff] }
 0x380   : > { %2779 = vmatpush1.bf16.msra.mxu1 %v1453_v29  ;;  %v1457_v29 = vpack.c.bf16 %v1437_v30, %v1433_v33  ;;  %v1439_v49 = vmul.f32 %v1413_v60, %v9498_v51  ;;  %v1445_v9 = vmul.f32 %v1398_v4, %v9496_v5  ;;  %v1545_v45 = vsel %vm448_vm3, %v9501_v24, %v9534_v53  ;;  %v9536_v24 = vld [vmem:[#allocation119_spill] sm:$0xff]  ;;  %v9538_v41 = vld [vmem:[#allocation64_spill] sm:$0xff]  ;;  %v9540_v60 = vld [vmem:[#allocation18_spill] sm:$0xff] }
 0x381   : > { %2780 = vmatprep.subr.bf16.mxu1 %v1458_v26  ;;  %2049 = vrot.lane.b32.xlu0 %v9532_v12, %s9431_s12  ;;  %v6560_v38 = vpop.permute.xlu1 %1831  ;;  %v1569_v31 = vsel %vm448_vm3, %v9534_v53, %v9503_v10  ;;  %v6572_v37 = vmul.f32 %v6442_v44, %v9448_v22  ;;  %v1462_v32 = vpack.c.bf16 %v1446_v27, %v1442_v1  ;;  %v6576_v30 = vpop.permute.xlu0 %1733  ;;  %v9539_v26 = vld [vmem:[#allocation16_spill] sm:$0xff]  ;;  %v9541_v33 = vld [vmem:[#allocation147_spill] sm:$0xff]  ;;  %v9543_v1 = vld [vmem:[#allocation105_spill] sm:$0xff] }
 0x382   : > { %2598 = vmatpush1.bf16.msra.mxu0 %v1455_v59  ;;  %9533 = vst [vmem:[#allocation75_spill] sm:$0xff] %v6560_v38  ;;  %v1588_v48 = vmul.f32 %v1562_v28, %v9535_v57  ;;  %v1441_v15 = vmul.f32 %v1397_v14, %v9496_v5  ;;  %v1459_v20 = vpack.c.bf16 %v1443_v11, %v1439_v49  ;;  %v9542_v59 = vld [vmem:[#allocation134_spill] sm:$0xff] }
 0x383   : > { %2599 = vmatprep.subr.bf16.mxu0 %v1460_v52  ;;  %2019 = vrot.lane.b32.xlu1 %v9536_v24, %s9431_s12  ;;  %v6584_v10 = vsel %vm481_vm5, %v9538_v41, %v9537_v40  ;;  %v1585_v44 = vmul.f32 %v6412_v46, %v9448_v22  ;;  %v1587_v28 = vmul.f32 %v1570_v54, %v9539_v26  ;;  %v9547_v53 = vld [vmem:[#allocation74_spill] sm:$0xff] }
 0x384   : > { %2781 = vmatpush1.bf16.msra.mxu1 %v1457_v29  ;;  %v1590_v4 = vmul.f32 %v6464_v58, %v9540_v60  ;;  %v1584_v27 = vmul.f32 %v6418_v13, %v9535_v57  ;;  %v1564_v11 = vsel %vm448_vm3, %v9542_v59, %v9541_v33  ;;  %v1461_v14 = vpack.c.bf16 %v1445_v9, %v1441_v15  ;;  %v9545_v29 = vld [vmem:[#allocation149_spill] sm:$0xff]  ;;  %v9546_v13 = vld [vmem:[#allocation136_spill] sm:$0xff]  ;;  %v9550_v15 = vld [vmem:[#allocation131_spill] sm:$0xff] }
 0x385   : > { %2782 = vmatprep.subr.bf16.mxu1 %v1462_v32  ;;  %2005 = vrot.lane.b32.xlu0 %v9543_v1, %s9431_s12  ;;  %v6599_v46 = vpop.permute.xlu1 %1847  ;;  %v1583_v54 = vmul.f32 %v1569_v31, %v9539_v26  ;;  %v1586_v58 = vmul.f32 %v1545_v45, %v9540_v60  ;;  %v1613_v52 = vpack.c.bf16 %v6572_v37, %v1585_v44  ;;  %v9549_v32 = vld [vmem:[#allocation144_spill] sm:$0xff]  ;;  %v9552_v31 = vld [vmem:[#allocation133_spill] sm:$0xff]  ;;  %v6619_v37 = vpop.permute.xlu0 %1833  ;;  %v9554_v44 = vld [vmem:[#allocation103_spill] sm:$0xff] }
 0x386   : > { %2600 = vmatpush1.bf16.msra.mxu0 %v1459_v20  ;;  %9544 = vst [vmem:[#allocation86_spill] sm:$0xff] %v6599_v46  ;;  %v1548_v49 = vsel %vm448_vm3, %v9546_v13, %v9545_v29  ;;  %v9548_v9 = vpack.c.bf16 %v6081_v0, %v9547_v53  ;;  %v1563_v20 = vsel %vm448_vm3, %v9550_v15, %v9549_v32  ;;  %9553 = vst [vmem:[#allocation104_spill] sm:$0xff] %v6619_v37 }
 0x387   : > { %v1547_v45 = vsel %vm448_vm3, %v9552_v31, %v9551_v34  ;;  %2035 = vrot.lane.b32.xlu1 %v9554_v44, %s9431_s12  ;;  %v1612_v51 = vpack.c.bf16 %v1588_v48, %v1584_v27  ;;  %v1611_v5 = vpack.c.bf16 %v1587_v28, %v1583_v54  ;;  %v1596_v0 = vmul.f32 %v1564_v11, %v9535_v57  ;;  %v9558_v28 = vld [vmem:[#allocation70_spill] sm:$0xff]  ;;  %v9561_v54 = vld [vmem:[#allocation60_spill] sm:$0xff] }
 0x388   : > { %2601 = vmatprep.subr.bf16.mxu0 %v9548_v9  ;;  %2783 = vmatpush1.bf16.msra.mxu1 %v1461_v14  ;;  %v1572_v53 = vsel %vm448_vm3, %v9545_v29, %v9542_v59  ;;  %v9555_v9 = vld [vmem:[#allocation58_spill] sm:$0xff]  ;;  %v1614_v46 = vpack.c.bf16 %v1590_v4, %v1586_v58  ;;  %v1571_v14 = vsel %vm448_vm3, %v9551_v34, %v9550_v15  ;;  %v9560_v59 = vld [vmem:[#allocation56_spill] sm:$0xff]  ;;  %v9564_v15 = vld [vmem:[#allocation159_spill] sm:$0xff] }
 0x389   : > { %v9557_v38 = vpack.c.bf16 %v9555_v9, %v9556_v63  ;;  %v1598_v48 = vmul.f32 %v1548_v49, %v9540_v60  ;;  %v1566_v27 = vsel %vm448_vm3, %v9558_v28, %v6400_v56  ;;  %v9559_v11 = vld [vmem:[#allocation122_spill] sm:$0xff]  ;;  %v9562_v63 = vpack.c.bf16 %v9560_v59, %v9561_v54  ;;  %v9565_v59 = vld [vmem:[#allocation71_spill] sm:$0xff]  ;;  %v6669_v54 = vpop.permute.xlu0 %1849 }
 0x38a   : > { %2021 = vrot.lane.b32.xlu0 %v9559_v11, %s9431_s12  ;;  %v1555_v34 = vsel %vm448_vm3, %v9549_v32, %v9552_v31  ;;  %v1592_v4 = vmul.f32 %v1563_v20, %v9535_v57  ;;  %v1594_v58 = vmul.f32 %v1547_v45, %v9540_v60  ;;  %v1556_v29 = vsel %vm448_vm3, %v9541_v33, %v9546_v13  ;;  %v9566_v20 = vld [vmem:[#allocation72_spill] sm:$0xff]  ;;  %v9567_v31 = vld [vmem:[#allocation62_spill] sm:$0xff] }
 0x38b   : > { %2784 = vmatprep.subr.bf16.mxu1 %v9557_v38  ;;  %2602 = vmatpush1.bf16.msra.mxu0 %v9562_v63  ;;  %v6645_v38 = vpop.permute.xlu1 %1863  ;;  %v1595_v49 = vmul.f32 %v1572_v53, %v9539_v26  ;;  %v1565_v9 = vsel %vm448_vm3, %v9564_v15, %v6358_v18  ;;  %v1550_v32 = vsel %vm448_vm3, %v9565_v59, %v6452_v61 }
 0x38c   : > { %9563 = vst [vmem:[#allocation84_spill] sm:$0xff] %v6645_v38  ;;  %2603 = vmatprep.subr.bf16.mxu0 %v1612_v51  ;;  %v9568_v45 = vpack.c.bf16 %v9566_v20, %v9567_v31  ;;  %v9569_v51 = vld [vmem:[#allocation121_spill] sm:$0xff]  ;;  %v1591_v33 = vmul.f32 %v1571_v14, %v9539_v26  ;;  %v1604_v13 = vmul.f32 %v1566_v27, %v9535_v57  ;;  %v9570_v20 = vld [vmem:[#allocation55_spill] sm:$0xff] }
 0x38d   : > { %2051 = vrot.lane.b32.xlu1 %v9569_v51, %s9431_s12  ;;  %v1574_v53 = vsel %vm448_vm3, %v6452_v61, %v9558_v28  ;;  %v1616_v63 = vpack.c.bf16 %v1596_v0, %v1592_v4  ;;  %v1597_v38 = vmul.f32 %v1556_v29, %v9448_v22  ;;  %v1549_v31 = vsel %vm448_vm3, %v9570_v20, %v6390_v16  ;;  %v6700_v4 = vpop.permute.xlu0 %1865  ;;  %v9577_v29 = vld [vmem:[#allocation61_spill] sm:$0xff] }
 0x38e   : > { %2785 = vmatpush1.bf16.msra.mxu1 %v9568_v45  ;;  %v9571_v45 = vld [vmem:[#allocation106_spill] sm:$0xff]  ;;  %v1618_v27 = vpack.c.bf16 %v1598_v48, %v1594_v58  ;;  %v1600_v37 = vmul.f32 %v1565_v9, %v9535_v57  ;;  %v1573_v61 = vsel %vm448_vm3, %v6390_v16, %v9564_v15  ;;  %v1606_v0 = vmul.f32 %v1550_v32, %v9540_v60  ;;  %v9575_v58 = vld [vmem:[#allocation43_spill] sm:$0xff]  ;;  %v9576_v16 = vld [vmem:[#allocation77_spill] sm:$0xff] }
 0x38f   : > { %2786 = vmatprep.subr.bf16.mxu1 %v1614_v46  ;;  %2037 = vrot.lane.b32.xlu0 %v9571_v45, %s9431_s12  ;;  %v6686_v14 = vpop.permute.xlu1 %1879  ;;  %v1558_v46 = vsel %vm448_vm3, %v6400_v56, %v9565_v59  ;;  %v1615_v28 = vpack.c.bf16 %v1595_v49, %v1591_v33  ;;  %v1603_v48 = vmul.f32 %v1574_v53, %v9539_v26  ;;  %v9578_v32 = vld [vmem:[#allocation124_spill] sm:$0xff]  ;;  %v9580_v53 = vld [vmem:[#allocation79_spill] sm:$0xff] }
 0x390   : > { %2604 = vmatpush1.bf16.msra.mxu0 %v1611_v5  ;;  %9572 = vst [vmem:[#allocation90_spill] sm:$0xff] %v6686_v14  ;;  %v1593_v5 = vmul.f32 %v1555_v34, %v9448_v22  ;;  %9573 = vst [vmem:[#allocation88_spill] sm:$0xff] %v6700_v4  ;;  %v1751_v15 = vsel %vm481_vm5, %v9577_v29, %v9576_v16  ;;  %v1557_v56 = vsel %vm448_vm3, %v6358_v18, %v9570_v20 }
 0x391   : > { %2605 = vmatprep.subr.bf16.mxu0 %v1616_v63  ;;  %2151 = vrot.lane.b32.xlu1 %v9575_v58, %s9574_s15  ;;  %v1602_v34 = vmul.f32 %v1549_v31, %v9540_v60  ;;  %v1620_v49 = vpack.c.bf16 %v1604_v13, %v1600_v37  ;;  %v1599_v9 = vmul.f32 %v1573_v61, %v9539_v26  ;;  %v9581_v63 = vld [vmem:[#allocation63_spill] sm:$0xff]  ;;  %v9583_v31 = vld [vmem:[#allocation65_spill] sm:$0xff]  ;;  %v9594_v60 = vld [vmem:[#allocation100_spill] sm:$0xff] }
 0x392   : > { %2787 = vmatpush1.bf16.msra.mxu1 %v1613_v52  ;;  %v1617_v52 = vpack.c.bf16 %v1597_v38, %v1593_v5  ;;  %v1605_v59 = vmul.f32 %v1558_v46, %v9448_v22  ;;  %v1735_v18 = vsel %vm481_vm5, %v9581_v63, %v9580_v53  ;;  %v1759_v37 = vsel %vm481_vm5, %v9580_v53, %v9577_v29  ;;  %v9582_v38 = vld [vmem:[#allocation27_spill] sm:$0xff]  ;;  %v6736_v5 = vpop.permute.xlu0 %1881  ;;  %v9590_v53 = vld [vmem:[#allocation45_spill] sm:$0xff] }
 0x393   : > { %2788 = vmatprep.subr.bf16.mxu1 %v1618_v27  ;;  %2053 = vrot.lane.b32.xlu0 %v9578_v32, %s9431_s12  ;;  %v6717_v33 = vpop.permute.xlu1 %1835  ;;  %v6729_v13 = vmul.f32 %v6584_v10, %v9582_v38  ;;  %v1622_v20 = vpack.c.bf16 %v1606_v0, %v1602_v34  ;;  %v1744_v27 = vsel %vm481_vm5, %v9537_v40, %v9583_v31  ;;  %v9586_v10 = vld [vmem:[#allocation29_spill] sm:$0xff]  ;;  %v9587_v29 = vld [vmem:[#allocation59_spill] sm:$0xff] }
 0x394   : > { %2606 = vmatpush1.bf16.msra.mxu0 %v1615_v28  ;;  %9579 = vst [vmem:[#allocation108_spill] sm:$0xff] %v6717_v33  ;;  %v1601_v61 = vmul.f32 %v1557_v56, %v9448_v22  ;;  %v1619_v46 = vpack.c.bf16 %v1603_v48, %v1599_v9  ;;  %9584 = vst [vmem:[#allocation107_spill] sm:$0xff] %v6736_v5  ;;  %v9585_v28 = vld [vmem:[#allocation47_spill] sm:$0xff]  ;;  %v6741_v16 = vmul.f32 %v1751_v15, %v9582_v38  ;;  %v9588_v34 = vld [vmem:[#allocation81_spill] sm:$0xff] }
 0x395   : > { %2607 = vmatprep.subr.bf16.mxu0 %v1620_v49  ;;  %2167 = vrot.lane.b32.xlu1 %v9585_v28, %s9574_s15  ;;  %v6745_v0 = vmul.f32 %v9587_v29, %v9586_v10  ;;  %v1736_v40 = vsel %vm481_vm5, %v9583_v31, %v9588_v34  ;;  %v4320_v48 = vld [vmem:[%s8890_s4] ss:$20 sps:$4 sm:$0xff]   ;;  %v6771_v29 = vmul.f32 %v1744_v27, %v9586_v10 }
 0x396   : > { %2789 = vmatpush1.bf16.msra.mxu1 %v1617_v52  ;;  %v9589_v49 = vld [vmem:[#allocation30_spill] sm:$0xff]  ;;  %v1760_v52 = vsel %vm481_vm5, %v9588_v34, %v9538_v41  ;;  %v1621_v9 = vpack.c.bf16 %v1605_v59, %v1601_v61  ;;  %v9595_v59 = vld [vmem:[#allocation49_spill] sm:$0xff]  ;;  %v9598_v34 = vld [vmem:[#allocation120_spill] sm:$0xff]  ;;  %v6793_v26 = vpop.permute.xlu0 %1837  ;;  %v9608_v5 = vpack.c.bf16 %v9590_v53, %v9575_v58 }
 0x397   : > { %2790 = vmatprep.subr.bf16.mxu1 %v1622_v20  ;;  %v6757_v15 = vmul.f32 %v1735_v18, %v9589_v49  ;;  %2153 = vrot.lane.b32.xlu0 %v9590_v53, %s9574_s15  ;;  %v6765_v63 = vpop.permute.xlu1 %1851  ;;  %v9592_v20 = vld [vmem:[#allocation28_spill] sm:$0xff]  ;;  %v9593_v56 = vld [vmem:[#allocation118_spill] sm:$0xff]  ;;  %v9596_v61 = vpack.c.bf16 %v9595_v59, %v9585_v28  ;;  %9599 = vst [vmem:[#allocation91_spill] sm:$0xff] %v6793_v26  ;;  %v9621_v58 = vld [vmem:[#allocation139_spill] sm:$0xff] }
 0x398   : > { %2608 = vmatpush1.bf16.msra.mxu0 %v1619_v46  ;;  %9591 = vst [vmem:[#allocation89_spill] sm:$0xff] %v6765_v63  ;;  %v6768_v31 = vmul.f32 %v1759_v37, %v9592_v20  ;;  %v1754_v41 = vsel %vm481_vm5, %v9594_v60, %v9593_v56  ;;  %v6783_v46 = vmul.f32 %v1736_v40, %v9589_v49  ;;  %v9597_v37 = vld [vmem:[#allocation101_spill] sm:$0xff]  ;;  %v9600_v22 = vld [vmem:[#allocation44_spill] sm:$0xff]  ;;  %v9601_v40 = vld [vmem:[#allocation99_spill] sm:$0xff] }
 0x399   : > { %2638 = vmatprep.subr.bf16.mxu0 %v9596_v61  ;;  %v1746_v27 = vsel %vm481_vm5, %v9593_v56, %v9597_v37  ;;  %v1738_v18 = vsel %vm481_vm5, %v9597_v37, %v9598_v34  ;;  %2183 = vrot.lane.b32.xlu1 %v9600_v22, %s9574_s15  ;;  %v6798_v28 = vmul.f32 %v1760_v52, %v9592_v20  ;;  %v9602_v61 = vld [vmem:[#allocation115_spill] sm:$0xff]  ;;  %v9603_v56 = vld [vmem:[#allocation97_spill] sm:$0xff]  ;;  %v9610_v53 = vld [vmem:[#allocation46_spill] sm:$0xff] }
 0x39a   : > { %2791 = vmatpush1.bf16.msra.mxu1 %v1621_v9  ;;  %v1745_v57 = vsel %vm481_vm5, %v9602_v61, %v9601_v40  ;;  %v1753_v33 = vsel %vm481_vm5, %v9603_v56, %v9602_v61  ;;  %v9604_v9 = vld [vmem:[#allocation48_spill] sm:$0xff]  ;;  %v4323_v52 = vld [vmem:[%s8890_s4 + $0x2c] ss:$20 sps:$4 sm:$0xff]   ;;  %v9606_v63 = vld [vmem:[#allocation117_spill] sm:$0xff]  ;;  %v6819_v14 = vmul.f32 %v1754_v41, %v9582_v38  ;;  %v1762_v61 = vsel %vm481_vm5, %v9598_v34, %v9594_v60 }
 0x39b   : > { %v9605_v37 = vpack.c.bf16 %v5130_v8, %v9604_v9  ;;  %2610 = vmatmul.mubr.bf16.vlgmr.msra.gmra.mrb[20].mxu0 %v4320_v48  ;;  %v1737_v26 = vsel %vm481_vm5, %v9601_v40, %v9606_v63  ;;  %2169 = vrot.lane.b32.xlu0 %v9595_v59, %s9574_s15  ;;  %v1761_v41 = vsel %vm481_vm5, %v9606_v63, %v9603_v56  ;;  %v6853_v59 = vpop.permute.xlu0 %1853  ;;  %v4325_v34 = vld [vmem:[%s8890_s4 + $0x28] ss:$20 sps:$4 sm:$0xff]  }
 0x39c   : > { %2639 = vmatpush1.bf16.msra.mxu0 %v9608_v5  ;;  %v6837_v40 = vmul.f32 %v1746_v27, %v9586_v10  ;;  %v6840_v4 = vmul.f32 %v1738_v18, %v9589_v49  ;;  %v9609_v60 = vpack.c.bf16 %v5243_v50, %v5225_v17  ;;  %v6848_v5 = vmul.f32 %v1753_v33, %v9582_v38 }
 0x39d   : > { %2821 = vmatprep.subr.bf16.mxu1 %v9605_v37  ;;  %v6827_v37 = vpop.permute.xlu1 %1867  ;;  %2793 = vmatmul.mubr.bf16.vlgmr.msra.gmra.mrb[20].mxu1 %v4320_v48  ;;  %v9611_v63 = vpack.c.bf16 %v9610_v53, %v9600_v22  ;;  %v1800_v18 = vpack.c.bf16 %v6771_v29, %v6745_v0  ;;  %v6860_v48 = vmul.f32 %v1745_v57, %v9586_v10 }
 0x39e   : > { %9607 = vst [vmem:[#allocation109_spill] sm:$0xff] %v6827_v37  ;;  %2640 = vmatprep.subr.bf16.mxu0 %v9609_v60  ;;  %2199 = vrot.lane.b32.xlu1 %v9604_v9, %s9574_s15  ;;  %v6863_v27 = vmul.f32 %v1737_v26, %v9589_v49  ;;  %v6866_v33 = vmul.f32 %v1762_v61, %v9592_v20  ;;  %v2323_v9 = vld [vmem:[%s8890_s4 + $0x50] sm:$0x33]  ;;  %v9616_v60 = vld [vmem:[#allocation138_spill] sm:$0xff]  ;;  %v9620_v61 = vld [vmem:[#allocation135_spill] sm:$0xff] }
 0x39f   : > { %2822 = vmatpush1.bf16.msra.mxu1 %v9611_v63  ;;  %v9612_v22 = vpack.c.bf16 %v9497_v6, %v9491_v3  ;;  %2619 = vmatprep.mubr.bf16.mxu0 %v4323_v52  ;;  %v6875_v0 = vmul.f32 %v1761_v41, %v9592_v20  ;;  %v9614_v29 = vpack.c.bf16 %v5175_v36, %v5163_v35  ;;  %v9615_v41 = vld [vmem:[#allocation151_spill] sm:$0xff] }
 0x3a0   : > { %2185 = vrot.lane.b32.xlu0 %v9610_v53, %s9574_s15  ;;  %v1802_v56 = vpack.c.bf16 %v6798_v28, %v6768_v31  ;;  %v1756_v53 = vsel %vm481_vm5, %v9616_v60, %v9615_v41  ;;  %v9617_v63 = vpack.c.bf16 %v9522_v43, %v9500_v42  ;;  %2802 = vmatprep.mubr.bf16.mxu1 %v4323_v52  ;;  %v9618_v31 = vld [vmem:[#allocation137_spill] sm:$0xff]  ;;  %v9619_v28 = vld [vmem:[#allocation148_spill] sm:$0xff]  ;;  %v6917_v52 = vpop.permute.xlu0 %1869 }
 0x3a1   : > { %2823 = vmatprep.subr.bf16.mxu1 %v9612_v22  ;;  %v6881_v26 = vpop.permute.xlu1 %1883  ;;  %2641 = vmatpush1.bf16.msra.mxu0 %v9614_v29  ;;  %v1747_v29 = vsel %vm481_vm5, %v9619_v28, %v9618_v31  ;;  %v1755_v57 = vsel %vm481_vm5, %v9620_v61, %v9619_v28  ;;  %v1748_v43 = vsel %vm481_vm5, %v9615_v41, %v9621_v58  ;;  %v9624_v22 = vld [vmem:[#allocation152_spill] sm:$0xff] }
 0x3a2   : > { %9613 = vst [vmem:[#allocation126_spill] sm:$0xff] %v6881_v26  ;;  %2642 = vmatprep.subr.bf16.mxu0 %v9617_v63  ;;  %v9622_v63 = vld [vmem:[#allocation50_spill] sm:$0xff]  ;;  %2155 = vrot.lane.b32.xlu1 %v5163_v35, %s9574_s15  ;;  %v1740_v42 = vsel %vm481_vm5, %v9621_v58, %v9624_v22  ;;  %v9625_v28 = vpack.c.bf16 %v9532_v12, %v9528_v55 }
 0x3a3   : > { %v9623_v26 = vpack.c.bf16 %v9493_v7, %v9622_v63  ;;  %2620 = vmatmul.mubr.bf16.gmra.mrb[24].mxu0 %v4325_v34  ;;  %v4154_v37 = vcombine.high %v2323_v9, %v2323_v9  ;;  %v6939_v58 = vmul.f32 %v1756_v53, %v9582_v38  ;;  %v9627_v41 = vpack.c.bf16 %v9506_v19, %v9495_v62 }
 0x3a4   : > { %2201 = vrot.lane.b32.xlu0 %v5130_v8, %s9574_s15  ;;  %v6949_v12 = vmul.f32 %v1755_v57, %v9582_v38  ;;  %v9628_v53 = vpack.c.bf16 %v9559_v11, %v9536_v24  ;;  %v1764_v8 = vsel %vm481_vm5, %v9624_v22, %v9616_v60  ;;  %v9629_v57 = vld [vmem:[#allocation76_spill] sm:$0xff]  ;;  %v6974_v11 = vpop.permute.xlu0 %1885  ;;  %v9632_v60 = vpack.c.bf16 %v9578_v32, %v9569_v51  ;;  %v9634_v24 = vld [vmem:[#allocation54_spill] sm:$0xff] }
 0x3a5   : > { %2824 = vmatpush1.bf16.msra.mxu1 %v9623_v26  ;;  %v9626_v26 = vld [vmem:[#allocation150_spill] sm:$0xff]  ;;  %2643 = vmatpush1.bf16.msra.mxu0 %v9627_v41  ;;  %v6965_v41 = vmul.f32 %v1740_v42, %v9589_v49  ;;  %v4153_v22 = vcombine.low %v2323_v9, %v2323_v9  ;;  %v9635_v9 = vpack.c.bf16 %v9543_v1, %v9531_v25 }
 0x3a6   : > { %2825 = vmatprep.subr.bf16.mxu1 %v9625_v28  ;;  %v1739_v6 = vsel %vm481_vm5, %v9618_v31, %v9626_v26  ;;  %v1763_v35 = vsel %vm481_vm5, %v9626_v26, %v9620_v61  ;;  %v6943_v28 = vpop.permute.xlu1 %1839  ;;  %v6952_v31 = vmul.f32 %v1747_v29, %v9586_v10  ;;  %v6955_v61 = vmul.f32 %v1748_v43, %v9586_v10  ;;  %v9630_v43 = vld [vmem:[#allocation67_spill] sm:$0xff] }
 0x3a7   : > { %2644 = vmatprep.subr.bf16.mxu0 %v9628_v53  ;;  %2803 = vmatmul.mubr.bf16.gmra.mrb[24].mxu1 %v4325_v34  ;;  %v1758_v29 = vsel %vm481_vm5, %v9629_v57, %v6512_v2  ;;  %v9631_v26 = vpack.c.bf16 %v9530_v47, %v9630_v43  ;;  %v6979_v34 = vmul.f32 %v1739_v6, %v9589_v49 }
 0x3a8   : > { %2171 = vrot.lane.b32.xlu1 %v5225_v17, %s9574_s15  ;;  %v6982_v42 = vmul.f32 %v1763_v35, %v9592_v20  ;;  %2629 = vmatprep.mubr.bf16.mxu0 %v4154_v37  ;;  %v1750_v6 = vsel %vm481_vm5, %v6512_v2, %v6543_v23  ;;  %v7006_v53 = vmul.f32 %v1758_v29, %v9582_v38  ;;  %v9636_v2 = vld [vmem:[#allocation57_spill] sm:$0xff]  ;;  %v7021_v29 = vpop.permute.xlu0 %1841 }
 0x3a9   : > { %2826 = vmatpush1.bf16.msra.mxu1 %v9631_v26  ;;  %v9633_v26 = vld [vmem:[#allocation73_spill] sm:$0xff]  ;;  %2157 = vrot.lane.b32.xlu0 %v5175_v36, %s9574_s15  ;;  %v1742_v32 = vsel %vm481_vm5, %v6543_v23, %v6576_v30  ;;  %v1809_v36 = vpack.c.bf16 %v6965_v41, %v6979_v34  ;;  %v1808_v23 = vpack.c.bf16 %v6955_v61, %v6952_v31 }
 0x3aa   : > { %2827 = vmatprep.subr.bf16.mxu1 %v9632_v60  ;;  %v1757_v17 = vsel %vm481_vm5, %v9634_v24, %v9633_v26  ;;  %v6999_v35 = vpop.permute.xlu1 %1855  ;;  %2645 = vmatpush1.bf16.msra.mxu0 %v9635_v9  ;;  %v1790_v60 = vmul.f32 %v1764_v8, %v9592_v20  ;;  %v1749_v9 = vsel %vm481_vm5, %v9633_v26, %v9636_v2 }
 0x3ab   : > { %2646 = vmatprep.subr.bf16.mxu0 %v1800_v18  ;;  %2812 = vmatprep.mubr.bf16.mxu1 %v4154_v37  ;;  %v9637_v8 = vpack.c.bf16 %v9571_v45, %v9554_v44  ;;  %v7028_v37 = vmul.f32 %v1757_v17, %v9582_v38  ;;  %v1741_v18 = vsel %vm481_vm5, %v9636_v2, %v6529_v39 }
 0x3ac   : > { %2187 = vrot.lane.b32.xlu1 %v9622_v63, %s9574_s15  ;;  %v1796_v26 = vmul.f32 %v1750_v6, %v9586_v10  ;;  %2630 = vmatmul.mubr.bf16.gmra.mrb[28].mxu0 %v4153_v22  ;;  %v1765_v63 = vsel %vm481_vm5, %v6529_v39, %v9634_v24  ;;  %v1766_v31 = vsel %vm481_vm5, %v6576_v30, %v9629_v57  ;;  %v9641_v57 = vld [vmem:[#allocation75_spill] sm:$0xff] }
 0x3ad   : > { %2828 = vmatpush1.bf16.msra.mxu1 %v9637_v8  ;;  %v4330_v8 = vld [vmem:[%s8890_s4 + $0xc] ss:$20 sps:$4 sm:$0xff]   ;;  %v7047_v61 = vmul.f32 %v1742_v32, %v9589_v49  ;;  %2173 = vrot.lane.b32.xlu0 %v5243_v50, %s9574_s15  ;;  %v9638_v17 = vpack.c.bf16 %v6729_v13, %v6741_v16  ;;  %v1792_v6 = vmul.f32 %v1749_v9, %v9586_v10  ;;  %v9642_v16 = vld [vmem:[#allocation104_spill] sm:$0xff] }
 0x3ae   : > { %2829 = vmatprep.subr.bf16.mxu1 %v1802_v56  ;;  %v7051_v56 = vpop.permute.xlu1 %1871  ;;  %v1811_v39 = vpack.c.bf16 %v7006_v53, %v7028_v37  ;;  %v9639_v30 = vpack.c.bf16 %v6837_v40, %v6860_v48  ;;  %v1810_v24 = vpack.c.bf16 %v1790_v60, %v6982_v42  ;;  %v7064_v50 = vmul.f32 %v1741_v18, %v9589_v49  ;;  %v9640_v32 = vld [vmem:[#allocation86_spill] sm:$0xff]  ;;  %v7077_v48 = vpop.permute.xlu0 %1857  ;;  %v9646_v37 = vld [vmem:[#allocation107_spill] sm:$0xff] }
 0x3af   : > { %2647 = vmatpush1.bf16.msra.mxu0 %v9638_v17  ;;  %2813 = vmatmul.mubr.bf16.gmra.mrb[28].mxu1 %v4153_v22  ;;  %v1911_v13 = vsel %vm514_vm7, %v9641_v57, %v9640_v32  ;;  %v1912_v53 = vsel %vm514_vm7, %v9642_v16, %v6669_v54  ;;  %v9643_v40 = vpack.c.bf16 %v6783_v46, %v6757_v15  ;;  %v9645_v15 = vld [vmem:[#allocation88_spill] sm:$0xff]  ;;  %v9648_v18 = vld [vmem:[#allocation35_spill] sm:$0xff] }
 0x3b0   : > { %2648 = vmatprep.subr.bf16.mxu0 %v9639_v30  ;;  %2203 = vrot.lane.b32.xlu1 %v9491_v3, %s9574_s15  ;;  %v1794_v42 = vmul.f32 %v1765_v63, %v9592_v20  ;;  %v1798_v22 = vmul.f32 %v1766_v31, %v9592_v20  ;;  %v9644_v60 = vpack.c.bf16 %v6866_v33, %v6875_v0  ;;  %v9653_v30 = vld [vmem:[#allocation38_spill] sm:$0xff] }
 0x3b1   : > { %2830 = vmatpush1.bf16.msra.mxu1 %v9643_v40  ;;  %v1812_v2 = vpack.c.bf16 %v1796_v26, %v1792_v6  ;;  %2670 = vmatprep.mubr.bf16.mxu0 %v4330_v8  ;;  %v1813_v9 = vpack.c.bf16 %v7047_v61, %v7064_v50  ;;  %v1904_v46 = vsel %vm514_vm7, %v6669_v54, %v9645_v15 }
 0x3b2   : > { %2831 = vmatprep.subr.bf16.mxu1 %v9644_v60  ;;  %v1896_v3 = vsel %vm514_vm7, %v9645_v15, %v9646_v37  ;;  %2189 = vrot.lane.b32.xlu0 %v9493_v7, %s9574_s15  ;;  %v7098_v33 = vpop.permute.xlu1 %1887  ;;  %v9647_v0 = vpack.c.bf16 %v6819_v14, %v6848_v5  ;;  %v7104_v26 = vmul.f32 %v1911_v13, %v9648_v18  ;;  %v9649_v7 = vld [vmem:[#allocation84_spill] sm:$0xff]  ;;  %v9650_v14 = vld [vmem:[#allocation90_spill] sm:$0xff]  ;;  %v9658_v60 = vld [vmem:[#allocation53_spill] sm:$0xff] }
 0x3b3   : > { %v7107_v63 = vmul.f32 %v1912_v53, %v9648_v18  ;;  %v1920_v54 = vsel %vm514_vm7, %v9646_v37, %v9642_v16  ;;  %2853 = vmatprep.mubr.bf16.mxu1 %v4330_v8  ;;  %v1903_v31 = vsel %vm514_vm7, %v9640_v32, %v9649_v7  ;;  %v1895_v5 = vsel %vm514_vm7, %v9649_v7, %v9650_v14  ;;  %v9652_v8 = vld [vmem:[#allocation37_spill] sm:$0xff]  ;;  %v9654_v32 = vld [vmem:[#allocation91_spill] sm:$0xff]  ;;  %v9655_v16 = vld [vmem:[#allocation36_spill] sm:$0xff] }
 0x3b4   : > { %2649 = vmatpush1.bf16.msra.mxu0 %v9647_v0  ;;  %v1919_v61 = vsel %vm514_vm7, %v9650_v14, %v9641_v57  ;;  %v9651_v17 = vpack.c.bf16 %v6840_v4, %v6863_v27  ;;  %2159 = vrot.lane.b32.xlu1 %v9495_v62, %s9574_s15  ;;  %v1932_v6 = vmul.f32 %v1904_v46, %v9652_v8  ;;  %v9656_v4 = vld [vmem:[#allocation89_spill] sm:$0xff]  ;;  %v9657_v27 = vld [vmem:[#allocation108_spill] sm:$0xff] }
 0x3b5   : > { %2650 = vmatprep.subr.bf16.mxu0 %v1808_v23  ;;  %v1874_v23 = vpop.permute.xlu0 %1873  ;;  %v7132_v50 = vmul.f32 %v1896_v3, %v9653_v30  ;;  %v1914_v13 = vsel %vm514_vm7, %v9654_v32, %v6853_v59  ;;  %v1814_v57 = vpack.c.bf16 %v1798_v22, %v1794_v42  ;;  %v1934_v53 = vmul.f32 %v1920_v54, %v9655_v16 }
 0x3b6   : > { %2832 = vmatpush1.bf16.msra.mxu1 %v9651_v17  ;;  %v1913_v40 = vsel %vm514_vm7, %v9657_v27, %v9656_v4  ;;  %v1906_v62 = vsel %vm514_vm7, %v6853_v59, %v6917_v52  ;;  %2205 = vrot.lane.b32.xlu0 %v9658_v60, %s9574_s15  ;;  %v7149_v15 = vpop.permute.xlu1 %1843  ;;  %v1928_v42 = vmul.f32 %v1903_v31, %v9652_v8  ;;  %v9660_v59 = vld [vmem:[#allocation109_spill] sm:$0xff]  ;;  %v9662_v31 = vld [vmem:[#allocation126_spill] sm:$0xff] }
 0x3b7   : > { %2833 = vmatprep.subr.bf16.mxu1 %v1810_v24  ;;  %v9659_v24 = vpack.c.bf16 %v6939_v58, %v6949_v12  ;;  %v1959_v22 = vpack.c.bf16 %v7107_v63, %v7104_v26  ;;  %v1929_v46 = vmul.f32 %v1895_v5, %v9653_v30  ;;  %v1930_v37 = vmul.f32 %v1919_v61, %v9655_v16  ;;  %v9661_v26 = vld [vmem:[#allocation82_spill] sm:$0xff] }
 0x3b8   : > { %v1905_v3 = vsel %vm514_vm7, %v9656_v4, %v9660_v59  ;;  %v1939_v0 = vmul.f32 %v1914_v13, %v9648_v18  ;;  %v1922_v12 = vsel %vm514_vm7, %v6974_v11, %v9654_v32  ;;  %2175 = vrot.lane.b32.xlu1 %v9661_v26, %s9574_s15  ;;  %v1935_v63 = vmul.f32 %v1913_v40, %v9648_v18  ;;  %v9663_v4 = vld [vmem:[#allocation85_spill] sm:$0xff] }
 0x3b9   : > { %2651 = vmatpush1.bf16.msra.mxu0 %v9659_v24  ;;  %v1890_v58 = vpop.permute.xlu0 %1889  ;;  %v1940_v54 = vmul.f32 %v1906_v62, %v9652_v8  ;;  %v1960_v7 = vpack.c.bf16 %v1932_v6, %v1928_v42  ;;  %v1921_v14 = vsel %vm514_vm7, %v9662_v31, %v9657_v27  ;;  %v1908_v41 = vsel %vm514_vm7, %v7077_v48, %v1874_v23 }
 0x3ba   : > { %2652 = vmatprep.subr.bf16.mxu0 %v1812_v2  ;;  %2834 = vmatpush1.bf16.msra.mxu1 %v1809_v36  ;;  %v1961_v2 = vpack.c.bf16 %v7132_v50, %v1929_v46  ;;  %v1860_v34 = vpop.permute.xlu1 %1859  ;;  %v1962_v36 = vpack.c.bf16 %v1934_v53, %v1930_v37  ;;  %v1936_v5 = vmul.f32 %v1905_v3, %v9652_v8 }
 0x3bb   : > { %2835 = vmatprep.subr.bf16.mxu1 %v1814_v57  ;;  %2161 = vrot.lane.b32.xlu0 %v9506_v19, %s9574_s15  ;;  %v1897_v61 = vsel %vm514_vm7, %v9660_v59, %v9662_v31  ;;  %v1898_v17 = vsel %vm514_vm7, %v6917_v52, %v6974_v11  ;;  %v1942_v6 = vmul.f32 %v1922_v12, %v9655_v16  ;;  %v9664_v31 = vld [vmem:[#allocation87_spill] sm:$0xff] }
 0x3bc   : > { %v1963_v50 = vpack.c.bf16 %v1939_v0, %v1935_v63  ;;  %v1907_v19 = vsel %vm514_vm7, %v6999_v35, %v7051_v56  ;;  %2191 = vrot.lane.b32.xlu1 %v9630_v43, %s9574_s15  ;;  %v1938_v11 = vmul.f32 %v1921_v14, %v9655_v16  ;;  %v1916_v52 = vsel %vm514_vm7, %v7021_v29, %v7077_v48 }
 0x3bd   : > { %2653 = vmatpush1.bf16.msra.mxu0 %v1811_v39  ;;  %v1924_v39 = vsel %vm514_vm7, %v1890_v58, %v7021_v29  ;;  %v7202_v32 = vpop.permute.xlu0 %1845  ;;  %v1948_v13 = vmul.f32 %v1908_v41, %v9652_v8  ;;  %v1964_v57 = vpack.c.bf16 %v1940_v54, %v1936_v5  ;;  %v1941_v53 = vmul.f32 %v1898_v17, %v9653_v30 }
 0x3be   : > { %2654 = vmatprep.subr.bf16.mxu0 %v1960_v7  ;;  %2836 = vmatpush1.bf16.msra.mxu1 %v1813_v9  ;;  %v1923_v9 = vsel %vm514_vm7, %v7098_v33, %v6943_v28  ;;  %v1900_v43 = vsel %vm514_vm7, %v1874_v23, %v1890_v58  ;;  %v1876_v27 = vpop.permute.xlu1 %1875  ;;  %v1915_v29 = vsel %vm514_vm7, %v6943_v28, %v6999_v35 }
 0x3bf   : > { %2837 = vmatprep.subr.bf16.mxu1 %v1962_v36  ;;  %2177 = vrot.lane.b32.xlu0 %v9663_v4, %s9574_s15  ;;  %v1944_v48 = vmul.f32 %v1907_v19, %v9652_v8  ;;  %v1950_v40 = vmul.f32 %v1924_v39, %v9655_v16  ;;  %v1966_v62 = vpack.c.bf16 %v1942_v6, %v1938_v11  ;;  %v9665_v36 = vld [vmem:[#allocation119_spill] sm:$0xff] }
 0x3c0   : > { %v1937_v60 = vmul.f32 %v1897_v61, %v9653_v30  ;;  %v1947_v23 = vmul.f32 %v1916_v52, %v9648_v18  ;;  %v1899_v24 = vsel %vm514_vm7, %v7051_v56, %v7098_v33  ;;  %2207 = vrot.lane.b32.xlu1 %v9528_v55, %s9574_s15  ;;  %v1946_v28 = vmul.f32 %v1923_v9, %v9655_v16 }
 0x3c1   : > { %2655 = vmatpush1.bf16.msra.mxu0 %v1959_v22  ;;  %v1862_v42 = vpop.permute.xlu0 %1861  ;;  %v1949_v35 = vmul.f32 %v1900_v43, %v9653_v30  ;;  %v1968_v22 = vpack.c.bf16 %v1948_v13, %v1944_v48  ;;  %v1943_v37 = vmul.f32 %v1915_v29, %v9648_v18  ;;  %v1945_v55 = vmul.f32 %v1899_v24, %v9653_v30 }
 0x3c2   : > { %2656 = vmatprep.subr.bf16.mxu0 %v1964_v57  ;;  %2838 = vmatpush1.bf16.msra.mxu1 %v1961_v2  ;;  %v1965_v46 = vpack.c.bf16 %v1941_v53, %v1937_v60  ;;  %v1918_v59 = vsel %vm514_vm7, %v7202_v32, %v1862_v42  ;;  %v1892_v56 = vpop.permute.xlu1 %1891  ;;  %v1909_v33 = vsel %vm514_vm7, %v1860_v34, %v1876_v27  ;;  %v9668_v60 = vld [vmem:[#allocation33_spill] sm:$0xff] }
 0x3c3   : > { %2839 = vmatprep.subr.bf16.mxu1 %v1966_v62  ;;  %2193 = vrot.lane.b32.xlu0 %v9530_v47, %s9574_s15  ;;  %v1970_v3 = vpack.c.bf16 %v1950_v40, %v1946_v28  ;;  %v1967_v0 = vpack.c.bf16 %v1947_v23, %v1943_v37  ;;  %v1917_v12 = vsel %vm514_vm7, %v7149_v15, %v1860_v34  ;;  %v2472_v62 = vld [vmem:[%s8891_s5 + $0x10] sm:$0xff] }
 0x3c4   : > { %2163 = vrot.lane.b32.xlu1 %v9531_v25, %s9574_s15  ;;  %v1969_v47 = vpack.c.bf16 %v1949_v35, %v1945_v55  ;;  %v1955_v26 = vmul.f32 %v1918_v59, %v9648_v18  ;;  %v1952_v63 = vmul.f32 %v1909_v33, %v9652_v8  ;;  %v1901_v54 = vsel %vm514_vm7, %v1876_v27, %v1892_v56  ;;  %v9670_v55 = vld [vmem:[#allocation34_spill] sm:$0xff] }
 0x3c5   : > { %2657 = vmatpush1.bf16.msra.mxu0 %v1963_v50  ;;  %v1878_v58 = vpop.permute.xlu0 %1877  ;;  %v1951_v25 = vmul.f32 %v1917_v12, %v9648_v18  ;;  %v1925_v41 = vsel %vm514_vm7, %v1892_v56, %v7149_v15  ;;  %v1953_v17 = vmul.f32 %v1901_v54, %v9653_v30  ;;  %v2474_v12 = vld [vmem:[%s8891_s5 + $0x20] sm:$0xf]  ;;  %v2473_v54 = vld [vmem:[%s8891_s5 + $0x18] sm:$0xff] }
 0x3c6   : > { %2658 = vmatprep.subr.bf16.mxu0 %v1968_v22  ;;  %2840 = vmatpush1.bf16.msra.mxu1 %v1965_v46  ;;  %v1910_v2 = vsel %vm514_vm7, %v1862_v42, %v1878_v58  ;;  %v1992_v14 = vpop.permute.xlu1 %1991  ;;  %v1954_v19 = vmul.f32 %v1925_v41, %v9655_v16  ;;  %v9669_v42 = vld [vmem:[#allocation124_spill] sm:$0xff]  ;;  %v2471_v46 = vld [vmem:[%s8891_s5 + $0x8] sm:$0xff] }
 0x3c7   : > { %2841 = vmatprep.subr.bf16.mxu1 %v1970_v3  ;;  %v1956_v7 = vmul.f32 %v1910_v2, %v9652_v8  ;;  %2209 = vrot.lane.b32.xlu0 %v9664_v31, %s9574_s15  ;;  %v1971_v61 = vpack.c.bf16 %v1955_v26, %v1951_v25 }
 0x3c8   : > { %2179 = vrot.lane.b32.xlu1 %v9665_v36, %s9574_s15 }
 0x3c9   : > { %2659 = vmatpush1.bf16.msra.mxu0 %v1967_v0  ;;  %v1894_v34 = vpop.permute.xlu0 %1893  ;;  %v1972_v5 = vpack.c.bf16 %v1956_v7, %v1952_v63 }
 0x3ca   : > { %2842 = vmatpush1.bf16.msra.mxu1 %v1969_v47  ;;  %v1902_v6 = vsel %vm514_vm7, %v1878_v58, %v1894_v34  ;;  %v1926_v50 = vsel %vm514_vm7, %v1894_v34, %v7202_v32  ;;  %v2008_v11 = vpop.permute.xlu1 %2007  ;;  %v9666_v32 = vld [vmem:[#allocation122_spill] sm:$0xff]  ;;  %v9671_v58 = vld [vmem:[#allocation32_spill] sm:$0xff] }
 0x3cb   : > { %v1957_v15 = vmul.f32 %v1902_v6, %v9653_v30  ;;  %v1958_v39 = vmul.f32 %v1926_v50, %v9655_v16  ;;  %2165 = vrot.lane.b32.xlu0 %v9543_v1, %s9574_s15  ;;  %2660 = vmatprep.subr.bf16.mxu0 %v1972_v5  ;;  %v2470_v1 = vld [vmem:[%s8891_s5] sm:$0xff]  ;;  %v2071_v27 = vsel %vm547_vm6, %v1992_v14, %v2008_v11 }
 0x3cc   : > { %2195 = vrot.lane.b32.xlu1 %v9554_v44, %s9574_s15 }
 0x3cd   : > { %2661 = vmatpush1.bf16.msra.mxu0 %v1971_v61  ;;  %v1973_v52 = vpack.c.bf16 %v1957_v15, %v1953_v17  ;;  %v1994_v13 = vpop.permute.xlu0 %1993  ;;  %v1974_v57 = vpack.c.bf16 %v1958_v39, %v1954_v19 }
 0x3ce   : > { %v2024_v53 = vpop.permute.xlu1 %2023 }
 0x3cf   : > { %2181 = vrot.lane.b32.xlu0 %v9666_v32, %s9574_s15  ;;  %2843 = vmatprep.subr.bf16.mxu1 %v1974_v57  ;;  %v2063_v4 = vsel %vm547_vm6, %v2008_v11, %v2024_v53 }
 0x3d0   : > { %2844 = vmatpush1.bf16.msra.mxu1 %v1973_v52  ;;  %2211 = vrot.lane.b32.xlu1 %v9569_v51, %s9574_s15  ;;  %v9667_v51 = vld [vmem:[#allocation31_spill] sm:$0xff] }
 0x3d1   : > { %v2010_v9 = vpop.permute.xlu0 %2009  ;;  %v2087_v35 = vmul.f32 %v2071_v27, %v9667_v51 }
 0x3d2   : > { %v2072_v43 = vsel %vm547_vm6, %v1994_v13, %v2010_v9  ;;  %v2040_v44 = vpop.permute.xlu1 %2039 }
 0x3d3   : > { %2197 = vrot.lane.b32.xlu0 %v9571_v45, %s9574_s15  ;;  %v2091_v48 = vmul.f32 %v2072_v43, %v9667_v51  ;;  %v2088_v45 = vmul.f32 %v2063_v4, %v9668_v60  ;;  %v2055_v23 = vsel %vm547_vm6, %v2024_v53, %v2040_v44  ;;  %v2079_v22 = vsel %vm547_vm6, %v2040_v44, %v1992_v14 }
 0x3d4   : > { %2477 = vperm.xlu1 %4312, %v2470_v1   ;;  %v2089_v33 = vmul.f32 %v2055_v23, %v9670_v55  ;;  %v2090_v47 = vmul.f32 %v2079_v22, %v9671_v58 }
 0x3d5   : > { %v2026_v29 = vpop.permute.xlu0 %2025  ;;  %v2119_v56 = vpack.c.bf16 %v2091_v48, %v2087_v35 }
 0x3d6   : > { %v2064_v40 = vsel %vm547_vm6, %v2010_v9, %v2026_v29  ;;  %v1996_v28 = vpop.permute.xlu1 %1995 }
 0x3d7   : > { %v2092_v24 = vmul.f32 %v2064_v40, %v9668_v60  ;;  %2213 = vrot.lane.b32.xlu0 %v9669_v42, %s9574_s15 }
 0x3d8   : > { %2487 = vperm.xlu1 %4312, %v2472_v62  }
 0x3d9   : > { %v2042_v37 = vpop.permute.xlu0 %2041  ;;  %v2120_v59 = vpack.c.bf16 %v2092_v24, %v2088_v45 }
 0x3da   : > { %v2056_v3 = vsel %vm547_vm6, %v2026_v29, %v2042_v37  ;;  %v2080_v0 = vsel %vm547_vm6, %v2042_v37, %v1994_v13  ;;  %v2012_v63 = vpop.permute.xlu1 %2011 }
 0x3db   : > { %v2093_v26 = vmul.f32 %v2056_v3, %v9670_v55  ;;  %v2094_v2 = vmul.f32 %v2080_v0, %v9671_v58  ;;  %2482 = vperm.xlu0 %4311, %v2471_v46   ;;  %2662 = vmatprep.subr.bf16.mxu0 %v2120_v59  ;;  %v2073_v61 = vsel %vm547_vm6, %v1996_v28, %v2012_v63 }
 0x3dc   : > { %2663 = vmatpush1.bf16.msra.mxu0 %v2119_v56  ;;  %2497 = vperm.xlu1 %4312, %v2474_v12   ;;  %v2095_v11 = vmul.f32 %v2073_v61, %v9667_v51 }
 0x3dd   : > { %v2121_v7 = vpack.c.bf16 %v2093_v26, %v2089_v33  ;;  %v1998_v31 = vpop.permute.xlu0 %1997  ;;  %v2122_v14 = vpack.c.bf16 %v2094_v2, %v2090_v47 }
 0x3de   : > { %v2028_v25 = vpop.permute.xlu1 %2027 }
 0x3df   : > { %2492 = vperm.xlu0 %4311, %v2473_v54   ;;  %2845 = vmatprep.subr.bf16.mxu1 %v2122_v14  ;;  %v2065_v5 = vsel %vm547_vm6, %v2012_v63, %v2028_v25 }
 0x3e0   : > { %2846 = vmatpush1.bf16.msra.mxu1 %v2121_v7  ;;  %v2096_v19 = vmul.f32 %v2065_v5, %v9668_v60 }
 0x3e1   : > { %v2014_v41 = vpop.permute.xlu0 %2013 }
 0x3e2   : > { %v2074_v34 = vsel %vm547_vm6, %v1998_v31, %v2014_v41  ;;  %v2044_v36 = vpop.permute.xlu1 %2043 }
 0x3e3   : > { %v2099_v6 = vmul.f32 %v2074_v34, %v9667_v51  ;;  %v2057_v52 = vsel %vm547_vm6, %v2028_v25, %v2044_v36  ;;  %v2081_v13 = vsel %vm547_vm6, %v2044_v36, %v1996_v28 }
 0x3e4   : > { %v2097_v43 = vmul.f32 %v2057_v52, %v9670_v55  ;;  %v2098_v44 = vmul.f32 %v2081_v13, %v9671_v58 }
 0x3e5   : > { %v2030_v17 = vpop.permute.xlu0 %2029  ;;  %v2123_v53 = vpack.c.bf16 %v2099_v6, %v2095_v11 }
 0x3e6   : > { %v2066_v50 = vsel %vm547_vm6, %v2014_v41, %v2030_v17  ;;  %v2000_v39 = vpop.permute.xlu1 %1999 }
 0x3e7   : > { %v2100_v15 = vmul.f32 %v2066_v50, %v9668_v60 }
 0x3e9   : > { %v2046_v57 = vpop.permute.xlu0 %2045  ;;  %v2124_v32 = vpack.c.bf16 %v2100_v15, %v2096_v19 }
 0x3ea   : > { %v2058_v9 = vsel %vm547_vm6, %v2030_v17, %v2046_v57  ;;  %v2082_v1 = vsel %vm547_vm6, %v2046_v57, %v1998_v31  ;;  %v2016_v29 = vpop.permute.xlu1 %2015 }
 0x3eb   : > { %v2101_v4 = vmul.f32 %v2058_v9, %v9670_v55  ;;  %v2102_v27 = vmul.f32 %v2082_v1, %v9671_v58  ;;  %2664 = vmatprep.subr.bf16.mxu0 %v2124_v32  ;;  %v2075_v35 = vsel %vm547_vm6, %v2000_v39, %v2016_v29 }
 0x3ec   : > { %2665 = vmatpush1.bf16.msra.mxu0 %v2123_v53  ;;  %v2103_v3 = vmul.f32 %v2075_v35, %v9667_v51 }
 0x3ed   : > { %v2125_v48 = vpack.c.bf16 %v2101_v4, %v2097_v43  ;;  %v2002_v40 = vpop.permute.xlu0 %2001  ;;  %v2126_v62 = vpack.c.bf16 %v2102_v27, %v2098_v44 }
 0x3ee   : > { %v2032_v45 = vpop.permute.xlu1 %2031 }
 0x3ef   : > { %2847 = vmatprep.subr.bf16.mxu1 %v2126_v62  ;;  %v2067_v28 = vsel %vm547_vm6, %v2016_v29, %v2032_v45 }
 0x3f0   : > { %2848 = vmatpush1.bf16.msra.mxu1 %v2125_v48  ;;  %v2104_v59 = vmul.f32 %v2067_v28, %v9668_v60 }
 0x3f1   : > { %v2018_v23 = vpop.permute.xlu0 %2017 }
 0x3f2   : > { %v2076_v24 = vsel %vm547_vm6, %v2002_v40, %v2018_v23  ;;  %v2048_v42 = vpop.permute.xlu1 %2047 }
 0x3f3   : > { %v2107_v46 = vmul.f32 %v2076_v24, %v9667_v51  ;;  %v2059_v0 = vsel %vm547_vm6, %v2032_v45, %v2048_v42  ;;  %v2083_v12 = vsel %vm547_vm6, %v2048_v42, %v2000_v39  ;;  %v4328_v24 = vld [vmem:[%s8890_s4 + $0x8] ss:$20 sps:$4 sm:$0xff]  }
 0x3f4   : > { %v2105_v7 = vmul.f32 %v2059_v0, %v9670_v55  ;;  %v2106_v31 = vmul.f32 %v2083_v12, %v9671_v58  ;;  %v4331_v42 = vld [vmem:[%s8890_s4 + $0x34] ss:$20 sps:$4 sm:$0xff]  }
 0x3f5   : > { %v2034_v22 = vpop.permute.xlu0 %2033  ;;  %v2127_v2 = vpack.c.bf16 %v2107_v46, %v2103_v3  ;;  %v4333_v3 = vld [vmem:[%s8890_s4 + $0x30] ss:$20 sps:$4 sm:$0xff]  }
 0x3f6   : > { %v2068_v37 = vsel %vm547_vm6, %v2018_v23, %v2034_v22  ;;  %v2004_v33 = vpop.permute.xlu1 %2003 }
 0x3f7   : > { %v2108_v56 = vmul.f32 %v2068_v37, %v9668_v60 }
 0x3f9   : > { %v2050_v47 = vpop.permute.xlu0 %2049  ;;  %v2128_v26 = vpack.c.bf16 %v2108_v56, %v2104_v59  ;;  %v2324_v59 = vld [vmem:[%s8890_s4 + $0x58] sm:$0x33] }
 0x3fa   : > { %v2060_v63 = vsel %vm547_vm6, %v2034_v22, %v2050_v47  ;;  %v2084_v54 = vsel %vm547_vm6, %v2050_v47, %v2002_v40  ;;  %v2020_v41 = vpop.permute.xlu1 %2019  ;;  %v4156_v12 = vcombine.high %v2324_v59, %v2324_v59 }
 0x3fb   : > { %v2109_v14 = vmul.f32 %v2060_v63, %v9670_v55  ;;  %v2110_v25 = vmul.f32 %v2084_v54, %v9671_v58  ;;  %2666 = vmatprep.subr.bf16.mxu0 %v2128_v26  ;;  %v2077_v15 = vsel %vm547_vm6, %v2004_v33, %v2020_v41 }
 0x3fc   : > { %2667 = vmatpush1.bf16.msra.mxu0 %v2127_v2  ;;  %v2111_v53 = vmul.f32 %v2077_v15, %v9667_v51  ;;  %v7419_v2 = vld [vmem:[%s8887_s1 + $0x20] ss:$0 sm:$0xff] }
 0x3fd   : > { %v2129_v34 = vpack.c.bf16 %v2109_v14, %v2105_v7  ;;  %v2006_v36 = vpop.permute.xlu0 %2005  ;;  %v2130_v5 = vpack.c.bf16 %v2110_v25, %v2106_v31  ;;  %v7427_v7 = vld [vmem:[%s8887_s1 + $0x28] ss:$0 sm:$0xff] }
 0x3fe   : > { %v2036_v61 = vpop.permute.xlu1 %2035 }
 0x3ff   : > { %2849 = vmatprep.subr.bf16.mxu1 %v2130_v5  ;;  %v2069_v19 = vsel %vm547_vm6, %v2020_v41, %v2036_v61 }
 0x400   : > { %2850 = vmatpush1.bf16.msra.mxu1 %v2129_v34  ;;  %v2112_v13 = vmul.f32 %v2069_v19, %v9668_v60 }
 0x401   : > { %v2022_v17 = vpop.permute.xlu0 %2021 }
 0x402   : > { %v2078_v6 = vsel %vm547_vm6, %v2006_v36, %v2022_v17  ;;  %v2052_v50 = vpop.permute.xlu1 %2051 }
 0x403   : > { %v2115_v11 = vmul.f32 %v2078_v6, %v9667_v51  ;;  %v2061_v9 = vsel %vm547_vm6, %v2036_v61, %v2052_v50  ;;  %v2085_v1 = vsel %vm547_vm6, %v2052_v50, %v2004_v33  ;;  %v7439_v50 = vld [vmem:[%s8887_s1 + $0x30] ss:$0 sm:$0xff] }
 0x404   : > { %v2113_v48 = vmul.f32 %v2061_v9, %v9670_v55  ;;  %v2114_v40 = vmul.f32 %v2085_v1, %v9671_v58 }
 0x405   : > { %v2038_v39 = vpop.permute.xlu0 %2037  ;;  %v2131_v4 = vpack.c.bf16 %v2115_v11, %v2111_v53  ;;  %v7449_v11 = vld [vmem:[%s8887_s1 + $0x38] ss:$0 sm:$0xff] }
 0x406   : > { %v2070_v52 = vsel %vm547_vm6, %v2022_v17, %v2038_v39  ;;  %v2152_v32 = vpop.permute.xlu1 %2151  ;;  %v4155_v17 = vcombine.low %v2324_v59, %v2324_v59 }
 0x407   : > { %v2116_v57 = vmul.f32 %v2070_v52, %v9668_v60 }
 0x409   : > { %v2054_v43 = vpop.permute.xlu0 %2053  ;;  %v2132_v44 = vpack.c.bf16 %v2116_v57, %v2112_v13 }
 0x40a   : > { %v2062_v27 = vsel %vm547_vm6, %v2038_v39, %v2054_v43  ;;  %v2086_v29 = vsel %vm547_vm6, %v2054_v43, %v2006_v36  ;;  %v2168_v23 = vpop.permute.xlu1 %2167 }
 0x40b   : > { %v2117_v62 = vmul.f32 %v2062_v27, %v9670_v55  ;;  %v2118_v45 = vmul.f32 %v2086_v29, %v9671_v58  ;;  %2668 = vmatprep.subr.bf16.mxu0 %v2132_v44  ;;  %v2231_v47 = vsel %vm580_vm8, %v2152_v32, %v2168_v23  ;;  %v9672_v44 = vmov 0  }
 0x40c   : > { %2669 = vmatpush1.bf16.msra.mxu0 %v2131_v4  ;;  %v2247_v34 = vmul.f32 %v7419_v2, %v2231_v47 }
 0x40d   : > { %v2133_v28 = vpack.c.bf16 %v2117_v62, %v2113_v48  ;;  %v2154_v35 = vpop.permute.xlu0 %2153  ;;  %v2134_v22 = vpack.c.bf16 %v2118_v45, %v2114_v40 }
 0x40e   : > { %v2184_v46 = vpop.permute.xlu1 %2183 }
 0x40f   : > { %2851 = vmatprep.subr.bf16.mxu1 %v2134_v22  ;;  %2671 = vmatmul.mubr.bf16.vlgmr.msra.gmra.mrb[20].mxu0 %v4328_v24  ;;  %v2223_v0 = vsel %vm580_vm8, %v2168_v23, %v2184_v46 }
 0x410   : > { %2852 = vmatpush1.bf16.msra.mxu1 %v2133_v28  ;;  %2680 = vmatprep.mubr.bf16.mxu0 %v4331_v42  ;;  %v2248_v31 = vmul.f32 %v7427_v7, %v2223_v0 }
 0x411   : > { %v2170_v37 = vpop.permute.xlu0 %2169 }
 0x412   : > { %v2232_v56 = vsel %vm580_vm8, %v2154_v35, %v2170_v37  ;;  %v2200_v33 = vpop.permute.xlu1 %2199 }
 0x413   : > { %2854 = vmatmul.mubr.bf16.vlgmr.msra.gmra.mrb[20].mxu1 %v4328_v24  ;;  %v2251_v63 = vmul.f32 %v7419_v2, %v2232_v56  ;;  %v2215_v14 = vsel %vm580_vm8, %v2184_v46, %v2200_v33  ;;  %v2239_v36 = vsel %vm580_vm8, %v2200_v33, %v2152_v32 }
 0x414   : > { %2863 = vmatprep.mubr.bf16.mxu1 %v4331_v42  ;;  %v2249_v19 = vmul.f32 %v7439_v50, %v2215_v14  ;;  %v2250_v52 = vmul.f32 %v7449_v11, %v2239_v36 }
 0x415   : > { %v2186_v26 = vpop.permute.xlu0 %2185  ;;  %v2279_v6 = vpack.c.bf16 %v2251_v63, %v2247_v34 }
 0x416   : > { %v2224_v54 = vsel %vm580_vm8, %v2170_v37, %v2186_v26  ;;  %v2156_v41 = vpop.permute.xlu1 %2155 }
 0x417   : > { %v2252_v25 = vmul.f32 %v7427_v7, %v2224_v54  ;;  %2681 = vmatmul.mubr.bf16.gmra.mrb[24].mxu0 %v4333_v3 }
 0x418   : > { %2690 = vmatprep.mubr.bf16.mxu0 %v4156_v12 }
 0x419   : > { %v2202_v5 = vpop.permute.xlu0 %2201  ;;  %v2280_v61 = vpack.c.bf16 %v2252_v25, %v2248_v31 }
 0x41a   : > { %v2216_v15 = vsel %vm580_vm8, %v2186_v26, %v2202_v5  ;;  %v2240_v39 = vsel %vm580_vm8, %v2202_v5, %v2154_v35  ;;  %v2172_v32 = vpop.permute.xlu1 %2171 }
 0x41b   : > { %v2253_v13 = vmul.f32 %v7439_v50, %v2216_v15  ;;  %v2254_v57 = vmul.f32 %v7449_v11, %v2240_v39  ;;  %2699 = vmatprep.subr.bf16.mxu0 %v2280_v61  ;;  %2864 = vmatmul.mubr.bf16.gmra.mrb[24].mxu1 %v4333_v3  ;;  %v2233_v40 = vsel %vm580_vm8, %v2156_v41, %v2172_v32 }
 0x41c   : > { %2700 = vmatpush1.bf16.msra.mxu0 %v2279_v6  ;;  %2873 = vmatprep.mubr.bf16.mxu1 %v4156_v12  ;;  %v2255_v35 = vmul.f32 %v7419_v2, %v2233_v40 }
 0x41d   : > { %v2281_v53 = vpack.c.bf16 %v2253_v13, %v2249_v19  ;;  %v2158_v9 = vpop.permute.xlu0 %2157  ;;  %v2282_v1 = vpack.c.bf16 %v2254_v57, %v2250_v52 }
 0x41e   : > { %v2188_v43 = vpop.permute.xlu1 %2187 }
 0x41f   : > { %2882 = vmatprep.subr.bf16.mxu1 %v2282_v1  ;;  %2691 = vmatmul.mubr.bf16.gmra.mrb[28].mxu0 %v4155_v17  ;;  %v2225_v48 = vsel %vm580_vm8, %v2172_v32, %v2188_v43 }
 0x420   : > { %2883 = vmatpush1.bf16.msra.mxu1 %v2281_v53  ;;  %2731 = vmatprep.mubr.bf16.mxu0 %v9672_v44  ;;  %v2256_v24 = vmul.f32 %v7427_v7, %v2225_v48 }
 0x421   : > { %v2174_v4 = vpop.permute.xlu0 %2173 }
 0x422   : > { %v2234_v27 = vsel %vm580_vm8, %v2158_v9, %v2174_v4  ;;  %v2204_v29 = vpop.permute.xlu1 %2203 }
 0x423   : > { %2874 = vmatmul.mubr.bf16.gmra.mrb[28].mxu1 %v4155_v17  ;;  %v2259_v45 = vmul.f32 %v7419_v2, %v2234_v27  ;;  %v2217_v22 = vsel %vm580_vm8, %v2188_v43, %v2204_v29  ;;  %v2241_v46 = vsel %vm580_vm8, %v2204_v29, %v2156_v41 }
 0x424   : > { %2914 = vmatprep.mubr.bf16.mxu1 %v9672_v44  ;;  %v2257_v0 = vmul.f32 %v7439_v50, %v2217_v22  ;;  %v2258_v12 = vmul.f32 %v7449_v11, %v2241_v46 }
 0x425   : > { %v2190_v62 = vpop.permute.xlu0 %2189  ;;  %v2283_v56 = vpack.c.bf16 %v2259_v45, %v2255_v35 }
 0x426   : > { %v2226_v23 = vsel %vm580_vm8, %v2174_v4, %v2190_v62  ;;  %v2160_v28 = vpop.permute.xlu1 %2159 }
 0x427   : > { %v2260_v42 = vmul.f32 %v7427_v7, %v2226_v23 }
 0x429   : > { %v2206_v37 = vpop.permute.xlu0 %2205  ;;  %v2284_v59 = vpack.c.bf16 %v2260_v42, %v2256_v24 }
 0x42a   : > { %v2218_v33 = vsel %vm580_vm8, %v2190_v62, %v2206_v37  ;;  %v2242_v3 = vsel %vm580_vm8, %v2206_v37, %v2158_v9  ;;  %v2176_v63 = vpop.permute.xlu1 %2175 }
 0x42b   : > { %v2261_v47 = vmul.f32 %v7439_v50, %v2218_v33  ;;  %v2262_v26 = vmul.f32 %v7449_v11, %v2242_v3  ;;  %2701 = vmatprep.subr.bf16.mxu0 %v2284_v59  ;;  %v2235_v61 = vsel %vm580_vm8, %v2160_v28, %v2176_v63 }
 0x42c   : > { %2702 = vmatpush1.bf16.msra.mxu0 %v2283_v56  ;;  %v2263_v13 = vmul.f32 %v7419_v2, %v2235_v61 }
 0x42d   : > { %v2285_v54 = vpack.c.bf16 %v2261_v47, %v2257_v0  ;;  %v2162_v31 = vpop.permute.xlu0 %2161  ;;  %v2286_v14 = vpack.c.bf16 %v2262_v26, %v2258_v12 }
 0x42e   : > { %v2192_v25 = vpop.permute.xlu1 %2191 }
 0x42f   : > { %2884 = vmatprep.subr.bf16.mxu1 %v2286_v14  ;;  %v2227_v5 = vsel %vm580_vm8, %v2176_v63, %v2192_v25 }
 0x430   : > { %2885 = vmatpush1.bf16.msra.mxu1 %v2285_v54  ;;  %v2264_v15 = vmul.f32 %v7427_v7, %v2227_v5 }
 0x431   : > { %v2178_v41 = vpop.permute.xlu0 %2177 }
 0x432   : > { %v2236_v34 = vsel %vm580_vm8, %v2162_v31, %v2178_v41  ;;  %v2208_v36 = vpop.permute.xlu1 %2207 }
 0x433   : > { %v2267_v6 = vmul.f32 %v7419_v2, %v2236_v34  ;;  %v2219_v57 = vsel %vm580_vm8, %v2192_v25, %v2208_v36  ;;  %v2243_v32 = vsel %vm580_vm8, %v2208_v36, %v2160_v28  ;;  %v4336_v36 = vld [vmem:[%s8890_s4 + $0x10] ss:$20 sps:$4 sm:$0xff]  }
 0x434   : > { %v2265_v27 = vmul.f32 %v7439_v50, %v2219_v57  ;;  %v2266_v29 = vmul.f32 %v7449_v11, %v2243_v32 }
 0x435   : > { %v2194_v17 = vpop.permute.xlu0 %2193  ;;  %v2287_v1 = vpack.c.bf16 %v2267_v6, %v2263_v13 }
 0x436   : > { %v2228_v19 = vsel %vm580_vm8, %v2178_v41, %v2194_v17  ;;  %v2164_v52 = vpop.permute.xlu1 %2163 }
 0x437   : > { %v2268_v39 = vmul.f32 %v7427_v7, %v2228_v19 }
 0x439   : > { %v2210_v53 = vpop.permute.xlu0 %2209  ;;  %v2288_v9 = vpack.c.bf16 %v2268_v39, %v2264_v15 }
 0x43a   : > { %v2220_v43 = vsel %vm580_vm8, %v2194_v17, %v2210_v53  ;;  %v2244_v4 = vsel %vm580_vm8, %v2210_v53, %v2162_v31  ;;  %v2180_v62 = vpop.permute.xlu1 %2179 }
 0x43b   : > { %v2269_v48 = vmul.f32 %v7439_v50, %v2220_v43  ;;  %v2270_v40 = vmul.f32 %v7449_v11, %v2244_v4  ;;  %2703 = vmatprep.subr.bf16.mxu0 %v2288_v9  ;;  %v2237_v46 = vsel %vm580_vm8, %v2164_v52, %v2180_v62 }
 0x43c   : > { %2704 = vmatpush1.bf16.msra.mxu0 %v2287_v1  ;;  %v2271_v12 = vmul.f32 %v7419_v2, %v2237_v46 }
 0x43d   : > { %v2289_v45 = vpack.c.bf16 %v2269_v48, %v2265_v27  ;;  %v2166_v23 = vpop.permute.xlu0 %2165  ;;  %v2290_v24 = vpack.c.bf16 %v2270_v40, %v2266_v29 }
 0x43e   : > { %v2196_v42 = vpop.permute.xlu1 %2195 }
 0x43f   : > { %2886 = vmatprep.subr.bf16.mxu1 %v2290_v24  ;;  %v2229_v22 = vsel %vm580_vm8, %v2180_v62, %v2196_v42 }
 0x440   : > { %2887 = vmatpush1.bf16.msra.mxu1 %v2289_v45  ;;  %v2272_v3 = vmul.f32 %v7427_v7, %v2229_v22 }
 0x441   : > { %v2182_v28 = vpop.permute.xlu0 %2181 }
 0x442   : > { %v2238_v35 = vsel %vm580_vm8, %v2166_v23, %v2182_v28  ;;  %v2212_v37 = vpop.permute.xlu1 %2211 }
 0x443   : > { %v2275_v56 = vmul.f32 %v7419_v2, %v2238_v35  ;;  %v2221_v47 = vsel %vm580_vm8, %v2196_v42, %v2212_v37  ;;  %v2245_v26 = vsel %vm580_vm8, %v2212_v37, %v2164_v52 }
 0x444   : > { %v2273_v41 = vmul.f32 %v7439_v50, %v2221_v47 }
 0x445   : > { %v2198_v59 = vpop.permute.xlu0 %2197  ;;  %v2291_v31 = vpack.c.bf16 %v2275_v56, %v2271_v12 }
 0x446   : > { %v2230_v33 = vsel %vm580_vm8, %v2182_v28, %v2198_v59 }
 0x447   : > { %v2276_v0 = vmul.f32 %v7427_v7, %v2230_v33  ;;  %v2274_v7 = vmul.f32 %v7449_v11, %v2245_v26 }
 0x449   : > { %v2214_v63 = vpop.permute.xlu0 %2213  ;;  %v2292_v54 = vpack.c.bf16 %v2276_v0, %v2272_v3 }
 0x44a   : > { %v2222_v14 = vsel %vm580_vm8, %v2198_v59, %v2214_v63  ;;  %v2246_v25 = vsel %vm580_vm8, %v2214_v63, %v2166_v23 }
 0x44b   : > { %v2277_v2 = vmul.f32 %v7439_v50, %v2222_v14  ;;  %v2278_v34 = vmul.f32 %v7449_v11, %v2246_v25  ;;  %2705 = vmatprep.subr.bf16.mxu0 %v2292_v54  ;;  %v4337_v50 = vld [vmem:[%s8890_s4 + $0x38] ss:$20 sps:$4 sm:$0xff]   ;;  %v4338_v11 = vld [vmem:[%s8890_s4 + $0x60] ss:$0 sps:$4 sm:$0x33]  }
 0x44c   : > { %2706 = vmatpush1.bf16.msra.mxu0 %v2291_v31 }
 0x44d   : > { %v2293_v5 = vpack.c.bf16 %v2277_v2, %v2273_v41  ;;  %v2294_v61 = vpack.c.bf16 %v2278_v34, %v2274_v7 }
 0x44f   : > { %4158 = vmatmul.mubr.msk.bf16.vlgmr.msra.gmra.mrb[20].mxu0 %vm2567_vm11, %v4336_v36  ;;  %2888 = vmatprep.subr.bf16.mxu1 %v2294_v61 }
 0x450   : > { %2889 = vmatpush1.bf16.msra.mxu1 %v2293_v5  ;;  %2741 = vmatprep.mubr.bf16.mxu0 %v9672_v44 }
 0x453   : > { %4161 = vmatmul.mubr.msk.bf16.vlgmr.msra.gmra.mrb[20].mxu1 %vm2567_vm11, %v4336_v36  ;;  %v2478_v17 = vpop.permute.xlu1 %2477 }
 0x454   : > { %2924 = vmatprep.mubr.bf16.mxu1 %v9672_v44 }
 0x457   : > { %4159 = vmatmul.mubr.msk.bf16.gmra.mrb[24].mxu0 %vm2567_vm11, %v4337_v50  ;;  %v2488_v0 = vpop.permute.xlu1 %2487 }
 0x458   : > { %2751 = vmatprep.mubr.bf16.mxu0 %v9672_v44 }
 0x45a   : > { %v2483_v39 = vpop.permute.xlu0 %2482 }
 0x45b   : > { %4162 = vmatmul.mubr.msk.bf16.gmra.mrb[24].mxu1 %vm2567_vm11, %v4337_v50 }
 0x45c   : > { %2934 = vmatprep.mubr.bf16.mxu1 %v9672_v44 }
 0x45e   : > { %v2493_v31 = vpop.permute.xlu0 %2492 }
 0x45f   : > { %4160 = vmatmul.mubr.msk.bf16.gmra.mrb[28].mxu0 %vm2567_vm11, %v4338_v11 }
 0x463   : > { %4163 = vmatmul.mubr.msk.bf16.gmra.mrb[28].mxu1 %vm2567_vm11, %v4338_v11 }
 0x522   : > { %v2733_v6 = vpop.f32.mrb[20].mxu0 }
 0x523   : > { %v4173_v19 = vadd.f32 %v2733_v6, %v2478_v17  ;;  %v2735_v15 = vpop.f32.mrb[21].mxu0 }
 0x524   : > { %v4174_v52 = vadd.f32 %v2735_v15, %v2478_v17  ;;  %v2737_v13 = vpop.f32.mrb[22].mxu0 }
 0x525   : > { %v7547_v57 = vmax.f32 %v4173_v19, 0.0  ;;  %v4175_v32 = vadd.f32 %v2737_v13, %v2483_v39  ;;  %v2739_v53 = vpop.f32.mrb[23].mxu0 }
 0x526   : > { %v4176_v9 = vadd.f32 %v2739_v53, %v2483_v39  ;;  %v2916_v1 = vpop.f32.mrb[20].mxu1  ;;  %v7550_v48 = vmax.f32 %v4174_v52, 0.0 }
 0x527   : > { %9673 = vst [vmem:[#allocation94_spill] sm:$0xff] %v7547_v57  ;;  %v2947_v43 = vmax.f32 %v4175_v32, 0.0  ;;  %v4183_v4 = vadd.f32 %v2916_v1, %v2478_v17  ;;  %v2918_v27 = vpop.f32.mrb[21].mxu1  ;;  %v2983_v29 = vrot.slane %v7547_v57, 4 }
 0x528   : > { %9674 = vst [vmem:[#allocation110_spill] sm:$0xff] %v7550_v48  ;;  %v2948_v40 = vmax.f32 %v4176_v9, 0.0  ;;  %v4184_v62 = vadd.f32 %v2918_v27, %v2478_v17  ;;  %v2920_v45 = vpop.f32.mrb[22].mxu1 }
 0x529   : > { %v2984_v23 = vrot.slane %v2947_v43, 4  ;;  %v7553_v24 = vpack.c.bf16 %v2947_v43, %v7547_v57  ;;  %v7555_v42 = vmax.f32 %v4183_v4, 0.0  ;;  %v4185_v28 = vadd.f32 %v2920_v45, %v2483_v39  ;;  %v2922_v35 = vpop.f32.mrb[23].mxu1 }
 0x52a   : > { %v7558_v22 = vpack.c.bf16 %v2948_v40, %v7550_v48  ;;  %v4186_v46 = vadd.f32 %v2922_v35, %v2483_v39  ;;  %v2743_v37 = vpop.f32.mrb[24].mxu0  ;;  %v7563_v56 = vrot.slane %v2948_v40, 4  ;;  %v7567_v26 = vmax.f32 %v4184_v62, 0.0 }
 0x52b   : > { %9675 = vst [vmem:[#allocation128_spill] sm:$0xff] %v7555_v42  ;;  %v7561_v59 = vsel %vm653_vm4, %v2983_v29, %v2984_v23  ;;  %v2949_v33 = vmax.f32 %v4185_v28, 0.0  ;;  %v2745_v3 = vpop.f32.mrb[25].mxu0  ;;  %v3380_v12 = vrot.slane %v7553_v24, 2  ;;  %v2989_v47 = vrot.slane %v7555_v42, 4 }
 0x52c   : > { %9676 = vst [vmem:[#allocation92_spill] sm:$0xff] %v7567_v26  ;;  %v2950_v63 = vmax.f32 %v4186_v46, 0.0  ;;  %v2747_v54 = vpop.f32.mrb[26].mxu0  ;;  %3035 = vrot.lane.b32.xlu0 %v7561_v59, %s9677_s16  ;;  %v4177_v41 = vadd.f32 %v2743_v37, %v2488_v0  ;;  %v4178_v7 = vadd.f32 %v2745_v3, %v2488_v0  ;;  %v3383_v34 = vrot.slane %v7558_v22, 2 }
 0x52d   : > { %v2990_v14 = vrot.slane %v2949_v33, 4  ;;  %v7572_v25 = vpack.c.bf16 %v2949_v33, %v7555_v42  ;;  %v2749_v2 = vpop.f32.mrb[27].mxu0  ;;  %v4179_v5 = vadd.f32 %v2747_v54, %v2493_v31 }
 0x52e   : > { %v7576_v36 = vpack.c.bf16 %v2950_v63, %v7567_v26  ;;  %v4180_v61 = vadd.f32 %v2749_v2, %v2493_v31  ;;  %v2926_v50 = vpop.f32.mrb[24].mxu1  ;;  %v7581_v17 = vrot.slane %v2950_v63, 4  ;;  %v2951_v6 = vmax.f32 %v4177_v41, 0.0  ;;  %v2498_v63 = vpop.permute.xlu1 %2497 }
 0x52f   : > { %v7579_v11 = vsel %vm653_vm4, %v2989_v47, %v2990_v14  ;;  %v2952_v19 = vmax.f32 %v4178_v7, 0.0  ;;  %v2928_v15 = vpop.f32.mrb[25].mxu1  ;;  %v3386_v39 = vrot.slane %v7572_v25, 2  ;;  %v2955_v13 = vmax.f32 %v4179_v5, 0.0 }
 0x530   : > { %v3389_v52 = vrot.slane %v7576_v36, 2  ;;  %v2956_v32 = vmax.f32 %v4180_v61, 0.0  ;;  %v2930_v53 = vpop.f32.mrb[26].mxu1  ;;  %3051 = vrot.lane.b32.xlu0 %v7579_v11, %s9677_s16  ;;  %v2995_v9 = vrot.slane %v2951_v6, 4  ;;  %v4187_v43 = vadd.f32 %v2926_v50, %v2488_v0 }
 0x531   : > { %v2997_v1 = vrot.slane %v2952_v19, 4  ;;  %v4188_v4 = vadd.f32 %v2928_v15, %v2488_v0  ;;  %v2932_v27 = vpop.f32.mrb[27].mxu1  ;;  %v3003_v29 = vrot.slane %v2955_v13, 4  ;;  %v7587_v40 = vpack.c.bf16 %v2955_v13, %v2951_v6 }
 0x532   : > { %v3005_v62 = vrot.slane %v2956_v32, 4  ;;  %v3360_v45 = vpack.c.bf16 %v2956_v32, %v2952_v19  ;;  %v2753_v24 = vpop.f32.mrb[28].mxu0  ;;  %v7590_v28 = vsel %vm653_vm4, %v2984_v23, %v2995_v9  ;;  %v2953_v22 = vmax.f32 %v4187_v43, 0.0 }
 0x533   : > { %v7594_v35 = vsel %vm653_vm4, %v7563_v56, %v2997_v1  ;;  %v2954_v46 = vmax.f32 %v4188_v4, 0.0  ;;  %v2755_v37 = vpop.f32.mrb[29].mxu0  ;;  %v7597_v33 = vsel %vm653_vm4, %v2995_v9, %v3003_v29  ;;  %v3381_v3 = vrot.slane %v7587_v40, 2  ;;  %3037 = vrot.lane.b32.xlu1 %v7590_v28, %s9677_s16 }
 0x534   : > { %9678 = vst [vmem:[#allocation140_spill] sm:$0xff] %v7597_v33  ;;  %v7601_v0 = vsel %vm653_vm4, %v2997_v1, %v3005_v62  ;;  %v3384_v47 = vrot.slane %v3360_v45, 2  ;;  %v2757_v23 = vpop.f32.mrb[30].mxu0  ;;  %3115 = vrot.lane.b32.xlu0 %v7561_v59, %s9679_s10  ;;  %v2999_v54 = vrot.slane %v2953_v22, 4  ;;  %v4189_v7 = vadd.f32 %v2930_v53, %v2493_v31 }
 0x535   : > { %v3001_v41 = vrot.slane %v2954_v46, 4  ;;  %v4190_v2 = vadd.f32 %v2932_v27, %v2493_v31  ;;  %v2758_v5 = vpop.f32.mrb[31].mxu0  ;;  %v4181_v61 = vadd.f32 %v2753_v24, %v2498_v63  ;;  %v4182_v50 = vadd.f32 %v2755_v37, %v2498_v63 }
 0x536   : > { %v2936_v6 = vpop.f32.mrb[28].mxu1  ;;  %v7608_v19 = vsel %vm3379_vm12, %v3383_v34, %v3384_v47  ;;  %v7611_v15 = vsel %vm3379_vm12, %v3380_v12, %v3381_v3  ;;  %v7614_v13 = vsel %vm653_vm4, %v2990_v14, %v2999_v54  ;;  %v2957_v9 = vmax.f32 %v4189_v7, 0.0 }
 0x537   : > { %9680 = vst [vmem:[#allocation123_spill] sm:$0xff] %v7608_v19  ;;  %9681 = vst [vmem:[#allocation125_spill] sm:$0xff] %v7611_v15  ;;  %v7618_v32 = vsel %vm653_vm4, %v7581_v17, %v3001_v41  ;;  %v2958_v53 = vmax.f32 %v4190_v2, 0.0  ;;  %v2938_v31 = vpop.f32.mrb[29].mxu1  ;;  %v2959_v1 = vmax.f32 %v4181_v61, 0.0  ;;  %v2960_v43 = vmax.f32 %v4182_v50, 0.0  ;;  %3053 = vrot.lane.b32.xlu1 %v7614_v13, %s9677_s16 }
 0x538   : > { %v4191_v4 = vadd.f32 %v2936_v6, %v2498_v63  ;;  %v4192_v34 = vadd.f32 %v2938_v31, %v2498_v63  ;;  %v2940_v27 = vpop.f32.mrb[30].mxu1  ;;  %3131 = vrot.lane.b32.xlu0 %v7579_v11, %s9679_s10  ;;  %v3007_v12 = vrot.slane %v2957_v9, 4  ;;  %v3361_v14 = vpack.c.bf16 %v2957_v9, %v2953_v22  ;;  %v9694_v19 = vld [vmem:[#allocation19_spill] sm:$0xff] }
 0x539   : > { %v3009_v40 = vrot.slane %v2958_v53, 4  ;;  %v3362_v45 = vpack.c.bf16 %v2958_v53, %v2954_v46  ;;  %v2941_v24 = vpop.f32.mrb[31].mxu1  ;;  %v3011_v37 = vrot.slane %v2959_v1, 4  ;;  %v3363_v23 = vpack.c.bf16 %v2959_v1, %v2959_v1 }
 0x53a   : > { %v3013_v7 = vrot.slane %v2960_v43, 4  ;;  %v3364_v2 = vpack.c.bf16 %v2960_v43, %v2960_v43  ;;  %v7625_v5 = vsel %vm653_vm4, %v2999_v54, %v3007_v12  ;;  %v3387_v61 = vrot.slane %v3361_v14, 2 }
 0x53b   : > { %9682 = vst [vmem:[#allocation112_spill] sm:$0xff] %v7625_v5  ;;  %v7628_v50 = vsel %vm653_vm4, %v3001_v41, %v3009_v40  ;;  %v3390_v63 = vrot.slane %v3362_v45, 2  ;;  %v7631_v6 = vsel %vm653_vm4, %v3003_v29, %v3011_v37  ;;  %v3392_v31 = vrot.slane %v3363_v23, 2  ;;  %3117 = vrot.lane.b32.xlu1 %v7590_v28, %s9679_s10 }
 0x53c   : > { %v7634_v22 = vsel %vm653_vm4, %v3005_v62, %v3013_v7  ;;  %v3394_v46 = vrot.slane %v3364_v2, 2  ;;  %3195 = vrot.lane.b32.xlu0 %v7561_v59, %s9299_s22  ;;  %v2961_v54 = vmax.f32 %v4191_v4, 0.0  ;;  %v2962_v9 = vmax.f32 %v4192_v34, 0.0 }
 0x53d   : > { %v7643_v41 = vsel %vm3379_vm12, %v3389_v52, %v3390_v63  ;;  %v7648_v29 = vsel %vm3379_vm12, %v3386_v39, %v3387_v61  ;;  %v7654_v53 = vsel %vm3379_vm12, %v3381_v3, %v3392_v31  ;;  %v2986_v27 = vrot.slane %v7550_v48, 4 }
 0x53e   : > { %9683 = vst [vmem:[#allocation153_spill] sm:$0xff] %v7643_v41  ;;  %9684 = vst [vmem:[#allocation156_spill] sm:$0xff] %v7648_v29  ;;  %v7651_v62 = vsel %vm3379_vm12, %v3384_v47, %v3394_v46  ;;  %v3015_v1 = vrot.slane %v2961_v54, 4  ;;  %v3365_v43 = vpack.c.bf16 %v2961_v54, %v2961_v54  ;;  %v3017_v4 = vrot.slane %v2962_v9, 4 }
 0x53f   : > { %9685 = vst [vmem:[#allocation160_spill] sm:$0xff] %v7651_v62  ;;  %9686 = vst [vmem:[#allocation162_spill] sm:$0xff] %v7654_v53  ;;  %v3366_v34 = vpack.c.bf16 %v2962_v9, %v2962_v9  ;;  %3133 = vrot.lane.b32.xlu1 %v7614_v13, %s9679_s10  ;;  %v2992_v14 = vrot.slane %v7567_v26, 4 }
 0x540   : > { %3211 = vrot.lane.b32.xlu0 %v7579_v11, %s9299_s22  ;;  %v7661_v25 = vsel %vm653_vm4, %v3007_v12, %v3015_v1  ;;  %v3396_v36 = vrot.slane %v3365_v43, 2  ;;  %v7664_v39 = vsel %vm653_vm4, %v3009_v40, %v3017_v4  ;;  %v2988_v12 = vsel %vm653_vm4, %v2986_v27, %v7563_v56 }
 0x541   : > { %9687 = vst [vmem:[#allocation52_spill] sm:$0xff] %v7661_v25  ;;  %v3398_v52 = vrot.slane %v3366_v34, 2 }
 0x542   : > { %v7670_v47 = vsel %vm3379_vm12, %v3387_v61, %v3396_v36 }
 0x543   : > { %v7667_v3 = vsel %vm3379_vm12, %v3390_v63, %v3398_v52  ;;  %9689 = vst [vmem:[#allocation51_spill] sm:$0xff] %v7670_v47  ;;  %3197 = vrot.lane.b32.xlu1 %v7590_v28, %s9299_s22 }
 0x544   : > { %9688 = vst [vmem:[#allocation154_spill] sm:$0xff] %v7667_v3  ;;  %3275 = vrot.lane.b32.xlu0 %v7561_v59, %s9300_s23 }
 0x547   : > { %3213 = vrot.lane.b32.xlu1 %v7614_v13, %s9299_s22 }
 0x548   : > { %3291 = vrot.lane.b32.xlu0 %v7579_v11, %s9300_s23 }
 0x54b   : > { %3277 = vrot.lane.b32.xlu1 %v7590_v28, %s9300_s23 }
 0x54c   : > { %3416 = vrot.lane.b32.xlu0 %v7561_v59, %s9301_s19 }
 0x54f   : > { %3293 = vrot.lane.b32.xlu1 %v7614_v13, %s9300_s23 }
 0x550   : > { %3432 = vrot.lane.b32.xlu0 %v7579_v11, %s9301_s19 }
 0x553   : > { %3418 = vrot.lane.b32.xlu1 %v7590_v28, %s9301_s19 }
 0x554   : > { %3496 = vrot.lane.b32.xlu0 %v7561_v59, %s9395_s25 }
 0x557   : > { %3434 = vrot.lane.b32.xlu1 %v7614_v13, %s9301_s19 }
 0x558   : > { %3512 = vrot.lane.b32.xlu0 %v7579_v11, %s9395_s25 }
 0x55b   : > { %3498 = vrot.lane.b32.xlu1 %v7590_v28, %s9395_s25 }
 0x55c   : > { %3576 = vrot.lane.b32.xlu0 %v7561_v59, %s9431_s12 }
 0x55f   : > { %3514 = vrot.lane.b32.xlu1 %v7614_v13, %s9395_s25 }
 0x560   : > { %3592 = vrot.lane.b32.xlu0 %v7579_v11, %s9431_s12 }
 0x563   : > { %3578 = vrot.lane.b32.xlu1 %v7590_v28, %s9431_s12 }
 0x564   : > { %3656 = vrot.lane.b32.xlu0 %v7561_v59, %s9574_s15  ;;  %v7721_v59 = vsel %vm653_vm4, %v2992_v14, %v7581_v17 }
 0x567   : > { %3594 = vrot.lane.b32.xlu1 %v7614_v13, %s9431_s12 }
 0x568   : > { %3672 = vrot.lane.b32.xlu0 %v7579_v11, %s9574_s15 }
 0x56b   : > { %3658 = vrot.lane.b32.xlu1 %v7590_v28, %s9574_s15 }
 0x56c   : > { %3043 = vrot.lane.b32.xlu0 %v2988_v12, %s9677_s16 }
 0x56f   : > { %3674 = vrot.lane.b32.xlu1 %v7614_v13, %s9574_s15 }
 0x570   : > { %3059 = vrot.lane.b32.xlu0 %v7721_v59, %s9677_s16 }
 0x573   : > { %3045 = vrot.lane.b32.xlu1 %v7594_v35, %s9677_s16 }
 0x574   : > { %3123 = vrot.lane.b32.xlu0 %v2988_v12, %s9679_s10 }
 0x577   : > { %3061 = vrot.lane.b32.xlu1 %v7618_v32, %s9677_s16 }
 0x578   : > { %3139 = vrot.lane.b32.xlu0 %v7721_v59, %s9679_s10 }
 0x57b   : > { %3125 = vrot.lane.b32.xlu1 %v7594_v35, %s9679_s10 }
 0x57c   : > { %3203 = vrot.lane.b32.xlu0 %v2988_v12, %s9299_s22 }
 0x57f   : > { %3141 = vrot.lane.b32.xlu1 %v7618_v32, %s9679_s10 }
 0x580   : > { %3219 = vrot.lane.b32.xlu0 %v7721_v59, %s9299_s22 }
 0x583   : > { %3205 = vrot.lane.b32.xlu1 %v7594_v35, %s9299_s22 }
 0x584   : > { %3283 = vrot.lane.b32.xlu0 %v2988_v12, %s9300_s23 }
 0x587   : > { %3221 = vrot.lane.b32.xlu1 %v7618_v32, %s9299_s22 }
 0x588   : > { %3299 = vrot.lane.b32.xlu0 %v7721_v59, %s9300_s23 }
 0x58b   : > { %3285 = vrot.lane.b32.xlu1 %v7594_v35, %s9300_s23 }
 0x58c   : > { %3424 = vrot.lane.b32.xlu0 %v2988_v12, %s9301_s19 }
 0x58f   : > { %3301 = vrot.lane.b32.xlu1 %v7618_v32, %s9300_s23 }
 0x590   : > { %3440 = vrot.lane.b32.xlu0 %v7721_v59, %s9301_s19 }
 0x593   : > { %3426 = vrot.lane.b32.xlu1 %v7594_v35, %s9301_s19 }
 0x594   : > { %3504 = vrot.lane.b32.xlu0 %v2988_v12, %s9395_s25 }
 0x597   : > { %3442 = vrot.lane.b32.xlu1 %v7618_v32, %s9301_s19 }
 0x598   : > { %3520 = vrot.lane.b32.xlu0 %v7721_v59, %s9395_s25 }
 0x59b   : > { %3506 = vrot.lane.b32.xlu1 %v7594_v35, %s9395_s25 }
 0x59c   : > { %3584 = vrot.lane.b32.xlu0 %v2988_v12, %s9431_s12 }
 0x59e   : > { %v7765_v56 = vpop.permute.xlu0 %3035 }
 0x59f   : > { %3522 = vrot.lane.b32.xlu1 %v7618_v32, %s9395_s25 }
 0x5a0   : > { %3600 = vrot.lane.b32.xlu0 %v7721_v59, %s9431_s12 }
 0x5a2   : > { %v7771_v11 = vpop.permute.xlu0 %3051 }
 0x5a3   : > { %3586 = vrot.lane.b32.xlu1 %v7594_v35, %s9431_s12 }
 0x5a4   : > { %3664 = vrot.lane.b32.xlu0 %v2988_v12, %s9574_s15 }
 0x5a5   : > { %v7776_v17 = vpop.permute.xlu1 %3037 }
 0x5a6   : > { %v7778_v28 = vpop.permute.xlu0 %3115 }
 0x5a7   : > { %3602 = vrot.lane.b32.xlu1 %v7618_v32, %s9431_s12 }
 0x5a8   : > { %3039 = vrot.lane.b32.xlu0 %v7597_v33, %s9677_s16 }
 0x5a9   : > { %v7784_v13 = vpop.permute.xlu1 %3053 }
 0x5aa   : > { %v7786_v40 = vpop.permute.xlu0 %3131 }
 0x5ab   : > { %3666 = vrot.lane.b32.xlu1 %v7594_v35, %s9574_s15 }
 0x5ac   : > { %3055 = vrot.lane.b32.xlu0 %v7625_v5, %s9677_s16 }
 0x5ad   : > { %v7792_v45 = vpop.permute.xlu1 %3117 }
 0x5ae   : > { %v7794_v24 = vpop.permute.xlu0 %3195 }
 0x5af   : > { %3041 = vrot.lane.b32.xlu1 %v7631_v6, %s9677_s16 }
 0x5b0   : > { %3119 = vrot.lane.b32.xlu0 %v7597_v33, %s9679_s10 }
 0x5b1   : > { %v7800_v37 = vpop.permute.xlu1 %3133 }
 0x5b2   : > { %v7802_v23 = vpop.permute.xlu0 %3211 }
 0x5b3   : > { %3057 = vrot.lane.b32.xlu1 %v7661_v25, %s9677_s16 }
 0x5b4   : > { %3135 = vrot.lane.b32.xlu0 %v7625_v5, %s9679_s10 }
 0x5b5   : > { %v7808_v35 = vpop.permute.xlu1 %3197 }
 0x5b6   : > { %v7810_v7 = vpop.permute.xlu0 %3275 }
 0x5b7   : > { %3121 = vrot.lane.b32.xlu1 %v7631_v6, %s9679_s10 }
 0x5b8   : > { %3199 = vrot.lane.b32.xlu0 %v7597_v33, %s9299_s22 }
 0x5b9   : > { %v7816_v2 = vpop.permute.xlu1 %3213 }
 0x5ba   : > { %v7818_v61 = vpop.permute.xlu0 %3291 }
 0x5bb   : > { %3137 = vrot.lane.b32.xlu1 %v7661_v25, %s9679_s10 }
 0x5bc   : > { %3215 = vrot.lane.b32.xlu0 %v7625_v5, %s9299_s22 }
 0x5bd   : > { %v7824_v63 = vpop.permute.xlu1 %3277 }
 0x5be   : > { %v7826_v31 = vpop.permute.xlu0 %3416 }
 0x5bf   : > { %3201 = vrot.lane.b32.xlu1 %v7631_v6, %s9299_s22 }
 0x5c0   : > { %3279 = vrot.lane.b32.xlu0 %v7597_v33, %s9300_s23 }
 0x5c1   : > { %v7832_v46 = vpop.permute.xlu1 %3293 }
 0x5c2   : > { %v7834_v54 = vpop.permute.xlu0 %3432 }
 0x5c3   : > { %3217 = vrot.lane.b32.xlu1 %v7661_v25, %s9299_s22 }
 0x5c4   : > { %3295 = vrot.lane.b32.xlu0 %v7625_v5, %s9300_s23 }
 0x5c5   : > { %v7840_v9 = vpop.permute.xlu1 %3418 }
 0x5c6   : > { %v7842_v1 = vpop.permute.xlu0 %3496 }
 0x5c7   : > { %3281 = vrot.lane.b32.xlu1 %v7631_v6, %s9300_s23 }
 0x5c8   : > { %3420 = vrot.lane.b32.xlu0 %v7597_v33, %s9301_s19 }
 0x5c9   : > { %v7848_v43 = vpop.permute.xlu1 %3434 }
 0x5ca   : > { %v7850_v4 = vpop.permute.xlu0 %3512 }
 0x5cb   : > { %3297 = vrot.lane.b32.xlu1 %v7661_v25, %s9300_s23 }
 0x5cc   : > { %3436 = vrot.lane.b32.xlu0 %v7625_v5, %s9301_s19 }
 0x5cd   : > { %v7856_v34 = vpop.permute.xlu1 %3498 }
 0x5ce   : > { %v7858_v36 = vpop.permute.xlu0 %3576 }
 0x5cf   : > { %3422 = vrot.lane.b32.xlu1 %v7631_v6, %s9301_s19 }
 0x5d0   : > { %3500 = vrot.lane.b32.xlu0 %v7597_v33, %s9395_s25 }
 0x5d1   : > { %v7864_v52 = vpop.permute.xlu1 %3514 }
 0x5d2   : > { %v7866_v27 = vpop.permute.xlu0 %3592 }
 0x5d3   : > { %3438 = vrot.lane.b32.xlu1 %v7661_v25, %s9301_s19 }
 0x5d4   : > { %3516 = vrot.lane.b32.xlu0 %v7625_v5, %s9395_s25 }
 0x5d5   : > { %v7872_v12 = vpop.permute.xlu1 %3578 }
 0x5d6   : > { %v7874_v14 = vpop.permute.xlu0 %3656 }
 0x5d7   : > { %9690 = vst [vmem:[#allocation66_spill] sm:$0xff] %v7874_v14  ;;  %3502 = vrot.lane.b32.xlu1 %v7631_v6, %s9395_s25 }
 0x5d8   : > { %3580 = vrot.lane.b32.xlu0 %v7597_v33, %s9431_s12  ;;  %v9696_v33 = vld [vmem:[#allocation22_spill] sm:$0xff] }
 0x5d9   : > { %v7880_v26 = vpop.permute.xlu1 %3594 }
 0x5da   : > { %v7882_v42 = vpop.permute.xlu0 %3672 }
 0x5db   : > { %9691 = vst [vmem:[#allocation95_spill] sm:$0xff] %v7882_v42  ;;  %3518 = vrot.lane.b32.xlu1 %v7661_v25, %s9395_s25 }
 0x5dc   : > { %3596 = vrot.lane.b32.xlu0 %v7625_v5, %s9431_s12 }
 0x5dd   : > { %v7888_v48 = vpop.permute.xlu1 %3658 }
 0x5de   : > { %9692 = vst [vmem:[#allocation111_spill] sm:$0xff] %v7888_v48  ;;  %v3044_v57 = vpop.permute.xlu0 %3043 }
 0x5df   : > { %3582 = vrot.lane.b32.xlu1 %v7631_v6, %s9431_s12  ;;  %v3075_v53 = vsel %vm349_vm0, %v7765_v56, %v3044_v57 }
 0x5e0   : > { %3047 = vrot.lane.b32.xlu0 %v7601_v0, %s9677_s16 }
 0x5e1   : > { %v7894_v44 = vpop.permute.xlu1 %3674 }
 0x5e2   : > { %9693 = vst [vmem:[#allocation93_spill] sm:$0xff] %v7894_v44  ;;  %v3060_v47 = vpop.permute.xlu0 %3059 }
 0x5e3   : > { %3598 = vrot.lane.b32.xlu1 %v7661_v25, %s9431_s12  ;;  %v3067_v62 = vsel %vm349_vm0, %v7771_v11, %v3060_v47  ;;  %v3079_v15 = vsel %vm349_vm0, %v3060_v47, %v7765_v56  ;;  %v3084_v25 = vmul.f32 %v3075_v53, %v9694_v19  ;;  %v3071_v47 = vsel %vm349_vm0, %v3044_v57, %v7771_v11  ;;  %v9695_v56 = vld [vmem:[#allocation20_spill] sm:$0xff] }
 0x5e4   : > { %3063 = vrot.lane.b32.xlu0 %v7628_v50, %s9677_s16  ;;  %v3083_v44 = vmul.f32 %v3079_v15, %v9695_v56  ;;  %v3086_v53 = vmul.f32 %v3067_v62, %v9696_v33  ;;  %v9697_v15 = vld [vmem:[#allocation21_spill] sm:$0xff] }
 0x5e5   : > { %v3046_v3 = vpop.permute.xlu1 %3045 }
 0x5e6   : > { %v3124_v29 = vpop.permute.xlu0 %3123  ;;  %v3076_v41 = vsel %vm349_vm0, %v7776_v17, %v3046_v3  ;;  %v3072_v48 = vsel %vm349_vm0, %v3046_v3, %v7784_v13 }
 0x5e7   : > { %v3088_v5 = vmul.f32 %v3076_v41, %v9694_v19  ;;  %3049 = vrot.lane.b32.xlu1 %v7634_v22, %s9677_s16  ;;  %v3151_v42 = vsel %vm382_vm1, %v3124_v29, %v7786_v40  ;;  %v3155_v3 = vsel %vm382_vm1, %v7778_v28, %v3124_v29  ;;  %v3089_v62 = vmul.f32 %v3072_v48, %v9697_v15  ;;  %v9699_v48 = vld [vmem:[#allocation15_spill] sm:$0xff] }
 0x5e8   : > { %3127 = vrot.lane.b32.xlu0 %v7601_v0, %s9679_s10  ;;  %v3085_v29 = vmul.f32 %v3071_v47, %v9697_v15 }
 0x5e9   : > { %v3062_v14 = vpop.permute.xlu1 %3061  ;;  %v3100_v41 = vpack.c.bf16 %v3088_v5, %v3084_v25 }
 0x5ea   : > { %v3140_v19 = vpop.permute.xlu0 %3139  ;;  %v3068_v58 = vsel %vm349_vm0, %v7784_v13, %v3062_v14  ;;  %v3080_v57 = vsel %vm349_vm0, %v3062_v14, %v7776_v17  ;;  %v9698_v17 = vld [vmem:[#allocation14_spill] sm:$0xff] }
 0x5eb   : > { %v3087_v5 = vmul.f32 %v3080_v57, %v9695_v56  ;;  %v3090_v25 = vmul.f32 %v3068_v58, %v9696_v33  ;;  %3065 = vrot.lane.b32.xlu1 %v7664_v39, %s9677_s16  ;;  %3838 = vmatprep.subr.bf16.mxu0 %v3100_v41  ;;  %v7947_v14 = vmul.f32 %v3155_v3, %v9698_v17  ;;  %v9705_v3 = vld [vmem:[#allocation25_spill] sm:$0xff] }
 0x5ec   : > { %3143 = vrot.lane.b32.xlu0 %v7628_v50, %s9679_s10  ;;  %v7950_v57 = vmul.f32 %v3151_v42, %v9699_v48  ;;  %v3101_v33 = vpack.c.bf16 %v3089_v62, %v3085_v29  ;;  %v3147_v42 = vsel %vm382_vm1, %v7786_v40, %v3140_v19  ;;  %v9703_v29 = vld [vmem:[#allocation12_spill] sm:$0xff] }
 0x5ed   : > { %v3099_v11 = vpack.c.bf16 %v3087_v5, %v3083_v44  ;;  %v3126_v13 = vpop.permute.xlu1 %3125  ;;  %v3102_v55 = vpack.c.bf16 %v3090_v25, %v3086_v53  ;;  %v3159_v53 = vsel %vm382_vm1, %v3140_v19, %v7778_v28  ;;  %v9702_v19 = vld [vmem:[#allocation11_spill] sm:$0xff] }
 0x5ee   : > { %v3204_v60 = vpop.permute.xlu0 %3203  ;;  %9700 = vst [vmem:[#allocation143_spill] sm:$0xff] %v7950_v57  ;;  %v3152_v58 = vsel %vm382_vm1, %v3126_v13, %v7800_v37  ;;  %v3156_v41 = vsel %vm382_vm1, %v7792_v45, %v3126_v13  ;;  %v7985_v28 = vmul.f32 %v3159_v53, %v9702_v19 }
 0x5ef   : > { %v7959_v44 = vmul.f32 %v3156_v41, %v9698_v17  ;;  %v7962_v47 = vmul.f32 %v3152_v58, %v9699_v48  ;;  %3129 = vrot.lane.b32.xlu1 %v7634_v22, %s9679_s10  ;;  %3839 = vmatpush1.bf16.msra.mxu0 %v3099_v11  ;;  %v7988_v11 = vmul.f32 %v3147_v42, %v9703_v29 }
 0x5f0   : > { %3920 = vmatprep.subr.bf16.mxu1 %v3102_v55  ;;  %3207 = vrot.lane.b32.xlu0 %v7601_v0, %s9299_s22 }
 0x5f1   : > { %9701 = vst [vmem:[#allocation130_spill] sm:$0xff] %v7962_v47  ;;  %3921 = vmatpush1.bf16.msra.mxu1 %v3101_v33  ;;  %v3142_v62 = vpop.permute.xlu1 %3141 }
 0x5f2   : > { %v3220_v5 = vpop.permute.xlu0 %3219  ;;  %v3148_v40 = vsel %vm382_vm1, %v7800_v37, %v3142_v62  ;;  %v3160_v55 = vsel %vm382_vm1, %v3142_v62, %v7792_v45  ;;  %v3231_v37 = vsel %vm415_vm2, %v3204_v60, %v7802_v23  ;;  %v3235_v45 = vsel %vm415_vm2, %v7794_v24, %v3204_v60  ;;  %v9704_v60 = vld [vmem:[#allocation23_spill] sm:$0xff] }
 0x5f3   : > { %v7991_v33 = vmul.f32 %v3160_v55, %v9702_v19  ;;  %v7994_v13 = vmul.f32 %v3148_v40, %v9703_v29  ;;  %3145 = vrot.lane.b32.xlu1 %v7664_v39, %s9679_s10  ;;  %v8017_v55 = vmul.f32 %v3235_v45, %v9704_v60  ;;  %v8020_v25 = vmul.f32 %v3231_v37, %v9705_v3 }
 0x5f4   : > { %3223 = vrot.lane.b32.xlu0 %v7628_v50, %s9299_s22  ;;  %v3227_v53 = vsel %vm415_vm2, %v7802_v23, %v3220_v5  ;;  %v3239_v45 = vsel %vm415_vm2, %v3220_v5, %v7794_v24  ;;  %v9708_v24 = vld [vmem:[#allocation24_spill] sm:$0xff] }
 0x5f5   : > { %v3206_v41 = vpop.permute.xlu1 %3205  ;;  %9706 = vst [vmem:[#allocation68_spill] sm:$0xff] %v8020_v25  ;;  %v8049_v5 = vmul.f32 %v3239_v45, %v9708_v24 }
 0x5f6   : > { %v3284_v42 = vpop.permute.xlu0 %3283  ;;  %v3232_v62 = vsel %vm415_vm2, %v3206_v41, %v7816_v2  ;;  %v3236_v40 = vsel %vm415_vm2, %v7808_v35, %v3206_v41 }
 0x5f7   : > { %v8023_v58 = vmul.f32 %v3236_v40, %v9704_v60  ;;  %v8026_v57 = vmul.f32 %v3232_v62, %v9705_v3  ;;  %3209 = vrot.lane.b32.xlu1 %v7634_v22, %s9299_s22  ;;  %9709 = vst [vmem:[#allocation132_spill] sm:$0xff] %v8049_v5  ;;  %v9710_v60 = vld [vmem:[#allocation26_spill] sm:$0xff] }
 0x5f8   : > { %3287 = vrot.lane.b32.xlu0 %v7601_v0, %s9300_s23  ;;  %v8052_v47 = vmul.f32 %v3227_v53, %v9710_v60 }
 0x5f9   : > { %9707 = vst [vmem:[#allocation145_spill] sm:$0xff] %v8026_v57  ;;  %v3222_v41 = vpop.permute.xlu1 %3221 }
 0x5fa   : > { %v3300_v62 = vpop.permute.xlu0 %3299  ;;  %v3228_v3 = vsel %vm415_vm2, %v7816_v2, %v3222_v41  ;;  %v3240_v23 = vsel %vm415_vm2, %v3222_v41, %v7808_v35  ;;  %v3311_v2 = vsel %vm448_vm3, %v3284_v42, %v7818_v61  ;;  %v3315_v35 = vsel %vm448_vm3, %v7810_v7, %v3284_v42  ;;  %v9711_v42 = vld [vmem:[#allocation13_spill] sm:$0xff] }
 0x5fb   : > { %v8055_v37 = vmul.f32 %v3240_v23, %v9708_v24  ;;  %v8058_v25 = vmul.f32 %v3228_v3, %v9710_v60  ;;  %3225 = vrot.lane.b32.xlu1 %v7664_v39, %s9299_s22  ;;  %v8081_v57 = vmul.f32 %v3315_v35, %v9711_v42  ;;  %v9712_v60 = vld [vmem:[#allocation17_spill] sm:$0xff]  ;;  %v3307_v41 = vsel %vm448_vm3, %v7818_v61, %v3300_v62 }
 0x5fc   : > { %3303 = vrot.lane.b32.xlu0 %v7628_v50, %s9300_s23  ;;  %v8084_v24 = vmul.f32 %v3311_v2, %v9712_v60  ;;  %v3319_v35 = vsel %vm448_vm3, %v3300_v62, %v7810_v7  ;;  %v9715_v7 = vld [vmem:[#allocation16_spill] sm:$0xff] }
 0x5fd   : > { %v3286_v45 = vpop.permute.xlu1 %3285  ;;  %v8113_v62 = vmul.f32 %v3319_v35, %v9715_v7 }
 0x5fe   : > { %v3425_v3 = vpop.permute.xlu0 %3424  ;;  %v3312_v23 = vsel %vm448_vm3, %v3286_v45, %v7832_v46  ;;  %v3316_v40 = vsel %vm448_vm3, %v7824_v63, %v3286_v45  ;;  %9713 = vst [vmem:[#allocation98_spill] sm:$0xff] %v8084_v24 }
 0x5ff   : > { %v8087_v53 = vmul.f32 %v3316_v40, %v9711_v42  ;;  %v8090_v5 = vmul.f32 %v3312_v23, %v9712_v60  ;;  %3289 = vrot.lane.b32.xlu1 %v7634_v22, %s9300_s23  ;;  %9716 = vst [vmem:[#allocation141_spill] sm:$0xff] %v8113_v62 }
 0x600   : > { %3680 = vrot.lane.b32.xlu0 %v7721_v59, %s9574_s15  ;;  %v9717_v59 = vld [vmem:[#allocation18_spill] sm:$0xff] }
 0x601   : > { %9714 = vst [vmem:[#allocation114_spill] sm:$0xff] %v8090_v5  ;;  %v3302_v2 = vpop.permute.xlu1 %3301  ;;  %v8116_v42 = vmul.f32 %v3307_v41, %v9717_v59 }
 0x602   : > { %v3441_v45 = vpop.permute.xlu0 %3440  ;;  %v3308_v60 = vsel %vm448_vm3, %v7832_v46, %v3302_v2  ;;  %v3320_v61 = vsel %vm448_vm3, %v3302_v2, %v7824_v63  ;;  %v3452_v46 = vsel %vm481_vm5, %v3425_v3, %v7834_v54  ;;  %v3456_v63 = vsel %vm481_vm5, %v7826_v31, %v3425_v3 }
 0x603   : > { %v8119_v40 = vmul.f32 %v3320_v61, %v9715_v7  ;;  %v8122_v24 = vmul.f32 %v3308_v60, %v9717_v59  ;;  %3305 = vrot.lane.b32.xlu1 %v7664_v39, %s9300_s23  ;;  %v8145_v3 = vmul.f32 %v3456_v63, %v9582_v38  ;;  %v8148_v5 = vmul.f32 %v3452_v46, %v9586_v10 }
 0x604   : > { %3428 = vrot.lane.b32.xlu0 %v7601_v0, %s9301_s19  ;;  %v3448_v2 = vsel %vm481_vm5, %v7834_v54, %v3441_v45  ;;  %v3460_v63 = vsel %vm481_vm5, %v3441_v45, %v7826_v31 }
 0x605   : > { %v3427_v35 = vpop.permute.xlu1 %3426  ;;  %9718 = vst [vmem:[#allocation127_spill] sm:$0xff] %v8145_v3  ;;  %9719 = vst [vmem:[#allocation142_spill] sm:$0xff] %v8148_v5  ;;  %v8177_v31 = vmul.f32 %v3448_v2, %v9589_v49  ;;  %v8180_v45 = vmul.f32 %v3460_v63, %v9592_v20  ;;  %v9770_v5 = vld [vmem:[#allocation22_spill] sm:$0xff] }
 0x606   : > { %v3505_v60 = vpop.permute.xlu0 %3504  ;;  %v3453_v61 = vsel %vm481_vm5, %v3427_v35, %v7848_v43  ;;  %v3457_v23 = vsel %vm481_vm5, %v7840_v9, %v3427_v35 }
 0x607   : > { %v8151_v41 = vmul.f32 %v3457_v23, %v9582_v38  ;;  %v8154_v62 = vmul.f32 %v3453_v61, %v9586_v10  ;;  %3682 = vrot.lane.b32.xlu1 %v7618_v32, %s9574_s15  ;;  %9722 = vst [vmem:[#allocation116_spill] sm:$0xff] %v8177_v31  ;;  %9723 = vst [vmem:[#allocation158_spill] sm:$0xff] %v8180_v45 }
 0x608   : > { %3444 = vrot.lane.b32.xlu0 %v7628_v50, %s9301_s19 }
 0x609   : > { %9720 = vst [vmem:[#allocation129_spill] sm:$0xff] %v8151_v41  ;;  %9721 = vst [vmem:[#allocation96_spill] sm:$0xff] %v8154_v62  ;;  %v3443_v46 = vpop.permute.xlu1 %3442 }
 0x60a   : > { %v3521_v35 = vpop.permute.xlu0 %3520  ;;  %v3449_v32 = vsel %vm481_vm5, %v7848_v43, %v3443_v46  ;;  %v3461_v54 = vsel %vm481_vm5, %v3443_v46, %v7840_v9  ;;  %v3532_v43 = vsel %vm514_vm7, %v3505_v60, %v7850_v4  ;;  %v3536_v9 = vsel %vm514_vm7, %v7842_v1, %v3505_v60 }
 0x60b   : > { %v8183_v23 = vmul.f32 %v3449_v32, %v9589_v49  ;;  %v8186_v3 = vmul.f32 %v3461_v54, %v9592_v20  ;;  %3662 = vrot.lane.b32.xlu1 %v7631_v6, %s9574_s15  ;;  %v8209_v60 = vmul.f32 %v3536_v9, %v9648_v18  ;;  %v8212_v61 = vmul.f32 %v3532_v43, %v9652_v8 }
 0x60c   : > { %3508 = vrot.lane.b32.xlu0 %v7601_v0, %s9395_s25  ;;  %v3528_v32 = vsel %vm514_vm7, %v7850_v4, %v3521_v35  ;;  %v3540_v9 = vsel %vm514_vm7, %v3521_v35, %v7842_v1 }
 0x60d   : > { %9724 = vst [vmem:[#allocation155_spill] sm:$0xff] %v8183_v23  ;;  %9725 = vst [vmem:[#allocation161_spill] sm:$0xff] %v8186_v3  ;;  %v3507_v63 = vpop.permute.xlu1 %3506  ;;  %v8241_v1 = vmul.f32 %v3528_v32, %v9653_v30  ;;  %v8244_v35 = vmul.f32 %v3540_v9, %v9655_v16 }
 0x60e   : > { %v3585_v46 = vpop.permute.xlu0 %3584  ;;  %v3533_v6 = vsel %vm514_vm7, %v3507_v63, %v7864_v52  ;;  %v3537_v54 = vsel %vm514_vm7, %v7856_v34, %v3507_v63  ;;  %9726 = vst [vmem:[#allocation83_spill] sm:$0xff] %v8209_v60  ;;  %9727 = vst [vmem:[#allocation157_spill] sm:$0xff] %v8212_v61 }
 0x60f   : > { %v8215_v2 = vmul.f32 %v3537_v54, %v9648_v18  ;;  %v8218_v31 = vmul.f32 %v3533_v6, %v9652_v8  ;;  %3430 = vrot.lane.b32.xlu1 %v7634_v22, %s9301_s19  ;;  %9730 = vst [vmem:[#allocation113_spill] sm:$0xff] %v8241_v1  ;;  %9731 = vst [vmem:[#allocation80_spill] sm:$0xff] %v8244_v35 }
 0x610   : > { %3524 = vrot.lane.b32.xlu0 %v7628_v50, %s9395_s25 }
 0x611   : > { %9728 = vst [vmem:[#allocation69_spill] sm:$0xff] %v8215_v2  ;;  %9729 = vst [vmem:[#allocation102_spill] sm:$0xff] %v8218_v31  ;;  %v3523_v63 = vpop.permute.xlu1 %3522 }
 0x612   : > { %v3601_v6 = vpop.permute.xlu0 %3600  ;;  %v3529_v18 = vsel %vm514_vm7, %v7864_v52, %v3523_v63  ;;  %v3541_v4 = vsel %vm514_vm7, %v3523_v63, %v7856_v34  ;;  %v3612_v52 = vsel %vm547_vm6, %v3585_v46, %v7866_v27  ;;  %v3616_v34 = vsel %vm547_vm6, %v7858_v36, %v3585_v46 }
 0x613   : > { %v8247_v43 = vmul.f32 %v3529_v18, %v9653_v30  ;;  %v8250_v60 = vmul.f32 %v3541_v4, %v9655_v16  ;;  %3446 = vrot.lane.b32.xlu1 %v7664_v39, %s9301_s19  ;;  %v4456_v4 = vmov 1983009808   ;;  %v8273_v16 = vmul.f32 %v3616_v34, %v9667_v51  ;;  %v9735_v30 = vld [vmem:[#allocation33_spill] sm:$0xff]  ;;  %s4121_s19 = sshll.u32 %s4610_s13, 6 }
 0x614   : > { %3588 = vrot.lane.b32.xlu0 %v7601_v0, %s9431_s12  ;;  %v3818_v54 = vunpack.c.l.s4 %v4456_v4  ;;  %v8276_v18 = vmul.f32 %v3612_v52, %v9735_v30  ;;  %v3608_v4 = vsel %vm547_vm6, %v7866_v27, %v3601_v6  ;;  %v3620_v34 = vsel %vm547_vm6, %v3601_v6, %v7858_v36  ;;  %v3736_v6 = vld [vmem:[%s8892_s6] sm:$0x3f] }
 0x615   : > { %9732 = vst [vmem:[#allocation64_spill] sm:$0xff] %v8247_v43  ;;  %9733 = vst [vmem:[#allocation147_spill] sm:$0xff] %v8250_v60  ;;  %v3587_v32 = vpop.permute.xlu1 %3586 }
 0x616   : > { %v3665_v9 = vpop.permute.xlu0 %3664  ;;  %v3613_v2 = vsel %vm547_vm6, %v3587_v32, %v7880_v26  ;;  %v3617_v46 = vsel %vm547_vm6, %v7872_v12, %v3587_v32  ;;  %9734 = vst [vmem:[#allocation134_spill] sm:$0xff] %v8273_v16  ;;  %9736 = vst [vmem:[#allocation105_spill] sm:$0xff] %v8276_v18  ;;  %v3819_v52 = vunpack.c.0.s8 %v3818_v54  ;;  %v9739_v54 = vld [vmem:[#allocation10_spill] sm:$0xff]  ;;  %v9750_v18 = vld [vmem:[#allocation93_spill] sm:$0xff] }
 0x617   : > { %v8279_v1 = vmul.f32 %v3617_v46, %v9667_v51  ;;  %v8282_v63 = vmul.f32 %v3613_v2, %v9735_v30  ;;  %3510 = vrot.lane.b32.xlu1 %v7634_v22, %s9395_s25  ;;  %v9740_v16 = vld [vmem:[#allocation34_spill] sm:$0xff]  ;;  %v9742_v30 = vld [vmem:[#allocation32_spill] sm:$0xff] }
 0x618   : > { %3604 = vrot.lane.b32.xlu0 %v7628_v50, %s9431_s12  ;;  %v3822_v32 = vsub.s32 %v3819_v52, %v9739_v54  ;;  %v8314_v43 = vmul.f32 %v3620_v34, %v9742_v30  ;;  %v9747_v52 = vld [vmem:[#allocation66_spill] sm:$0xff]  ;;  %v9748_v34 = vld [vmem:[#allocation140_spill] sm:$0xff] }
 0x619   : > { %9737 = vst [vmem:[#allocation149_spill] sm:$0xff] %v8279_v1  ;;  %9738 = vst [vmem:[#allocation136_spill] sm:$0xff] %v8282_v63  ;;  %v3603_v2 = vpop.permute.xlu1 %3602  ;;  %v8311_v1 = vmul.f32 %v3608_v4, %v9740_v16  ;;  %v3696_v4 = vsel %vm580_vm8, %v9747_v52, %v3665_v9  ;;  %v9751_v63 = vld [vmem:[#allocation111_spill] sm:$0xff] }
 0x61a   : > { %v8296_v46 = vpop.permute.xlu0 %3039  ;;  %v3609_v27 = vsel %vm547_vm6, %v7880_v26, %v3603_v2  ;;  %v3621_v36 = vsel %vm547_vm6, %v3603_v2, %v7872_v12  ;;  %9743 = vst [vmem:[#allocation144_spill] sm:$0xff] %v8314_v43  ;;  %v9746_v12 = vld [vmem:[#allocation95_spill] sm:$0xff]  ;;  %v8332_v54 = vrot.slane %v3736_v6, %v3822_v32 }
 0x61b   : > { %9741 = vst [vmem:[#allocation74_spill] sm:$0xff] %v8311_v1  ;;  %v8317_v51 = vmul.f32 %v3609_v27, %v9740_v16  ;;  %v8320_v26 = vmul.f32 %v3621_v36, %v9742_v30  ;;  %3526 = vrot.lane.b32.xlu1 %v7664_v39, %s9395_s25  ;;  %v3692_v2 = vsel %vm580_vm8, %v3665_v9, %v9746_v12  ;;  %v8351_v27 = vld [vmem:[%s8887_s1 + $0x20] ss:$0 sm:$0xff]  ;;  %v8359_v16 = vld [vmem:[%s8887_s1 + $0x28] ss:$0 sm:$0xff]  ;;  %s8817_s25 = scalar_lea.vmem [#allocation7], %s4121_s19 }
 0x61c   : > { %3660 = vrot.lane.b32.xlu0 %v9748_v34, %s9574_s15  ;;  %9749 = vst [vmem:[#allocation133_spill] sm:$0xff] %v8332_v54  ;;  %v3831_v34 = vcombine.high %v8332_v54, %v8332_v54  ;;  %9752 = vst [vmem:[#allocation103_spill] sm:$0xff] %v8351_v27  ;;  %v8354_v1 = vmul.f32 %v8351_v27, %v3696_v4  ;;  %s4040_s21 = sshll.u32 %s8817_s25, 4  ;;  %s8832_s21 = int_to_ptr.vmem [resolvable:$true] %s4040_s21 }
 0x61d   : > { %9744 = vst [vmem:[#allocation131_spill] sm:$0xff] %v8317_v51  ;;  %9745 = vst [vmem:[#allocation146_spill] sm:$0xff] %v8320_v26  ;;  %v3667_v36 = vpop.permute.xlu1 %3666  ;;  %v8362_v51 = vmul.f32 %v8359_v16, %v3692_v2  ;;  %s4378_s16 = scalar_lea.vmem %s8832_s21, 1024 }
 0x61e   : > { %v8336_v30 = vpop.permute.xlu0 %3055  ;;  %v3693_v12 = vsel %vm580_vm8, %v3667_v36, %v9750_v18  ;;  %v3697_v9 = vsel %vm580_vm8, %v9751_v63, %v3667_v36  ;;  %9753 = vst [vmem:[#allocation58_spill] sm:$0xff] %v8354_v1  ;;  %9754 = vst [vmem:[#allocation78_spill] sm:$0xff] %v8359_v16  ;;  %3870 = vmatprep.mubr.bf16.mxu0 %v3831_v34  ;;  %3952 = vmatprep.mubr.bf16.mxu1 %v3831_v34  ;;  %p4379_p6 = scmp.ne.s32.totalorder %s8832_s21, %s4378_s16 }
 0x61f   : > { %9755 = vst [vmem:[#allocation70_spill] sm:$0xff] %v8362_v51  ;;  %v8365_v36 = vmul.f32 %v8351_v27, %v3697_v9  ;;  %v8368_v54 = vmul.f32 %v8359_v16, %v3693_v12  ;;  %3590 = vrot.lane.b32.xlu1 %v7634_v22, %s9431_s12  ;;  %v9758_v12 = vld [vmem:[#allocation112_spill] sm:$0xff]  ;;  %v3816_v9 = vcombine.high %v3736_v6, %v3736_v6 }
 0x620   : > { %3668 = vrot.lane.b32.xlu0 %v7601_v0, %s9574_s15  ;;  %v9759_v27 = vld [vmem:[#allocation52_spill] sm:$0xff]  ;;  %p4380_p12 = pnand %p4379_p6, %p9883_p11 }
 0x621   : > { %9756 = vst [vmem:[#allocation56_spill] sm:$0xff] %v8365_v36  ;;  %9757 = vst [vmem:[#allocation60_spill] sm:$0xff] %v8368_v54  ;;  %v3042_v43 = vpop.permute.xlu1 %3041  ;;  %v8390_v4 = vrot.slane %v3816_v9, %v3822_v32 }
 0x622   : > { %v8376_v26 = vpop.permute.xlu0 %3119  ;;  %p4381_p13 = pneg %p4380_p12 }
 0x623   : > { %3606 = vrot.lane.b32.xlu1 %v7664_v39, %s9431_s12  ;;  %9760 = vst [vmem:[#allocation159_spill] sm:$0xff] %v8390_v4 }
 0x624   : > { %3676 = vrot.lane.b32.xlu0 %v9758_v12, %s9574_s15  ;;  %v3809_v12 = vld [vmem:[%s8893_s7] sm:$0xf] }
 0x625   : > { %v3058_v16 = vpop.permute.xlu1 %3057 }
 0x626   : > { %v8384_v0 = vpop.permute.xlu0 %3135 }
 0x627   : > { %3678 = vrot.lane.b32.xlu1 %v9759_v27, %s9574_s15 }
 0x628   : > { %3684 = vrot.lane.b32.xlu0 %v7628_v50, %s9574_s15  ;;  %v691_v50 = vld [vmem:[%s8889_s3] sm:$0xff] }
 0x629   : > { %v8392_v2 = vpop.permute.xlu1 %3121 }
 0x62a   : > { %v8394_v34 = vpop.permute.xlu0 %3199 }
 0x62b   : > { %3670 = vrot.lane.b32.xlu1 %v7634_v22, %s9574_s15 }
 0x62c   : > { %3812 = vperm.xlu0 %4311, %v3809_v12  }
 0x62d   : > { %v8401_v6 = vpop.permute.xlu1 %3137 }
 0x62e   : > { %v8403_v27 = vpop.permute.xlu0 %3215 }
 0x62f   : > { %3686 = vrot.lane.b32.xlu1 %v7664_v39, %s9574_s15  ;;  %s4457_s15 = smov [#allocation7]  }
 0x630   : > { %s4382_s10 = sshll.u32 %s4457_s15, 4  ;;  %s4383_s10 = int_to_ptr.vmem [resolvable:$false] %s4382_s10 }
 0x631   : > { %v8410_v32 = vpop.permute.xlu1 %3201  ;;  %s4384_s22 = scalar_lea.vmem %s4383_s10, 2048  ;;  %p4385_p7 = scmp.lt.s32.totalorder %s8832_s21, %s4383_s10 }
 0x632   : > { %v8412_v9 = vpop.permute.xlu0 %3279  ;;  %p4386_p10 = scmp.lt.s32.totalorder %s4384_s22, %s4378_s16 }
 0x633   : > { %702 = vperm.xlu1 %4312, %v691_v50  }
 0x634   : > { %p4387_p2 = por %p4386_p10, %p4385_p7 }
 0x635   : > { %v8414_v4 = vpop.permute.xlu1 %3217 }
 0x636   : > { %v8416_v22 = vpop.permute.xlu0 %3295  ;;  %p4388_p4 = pnand %p4387_p2, %p4381_p13 }
 0x639   : > { %v8418_v12 = vpop.permute.xlu1 %3281 }
 0x63a   : > { %v8420_v1 = vpop.permute.xlu0 %3420 }
 0x63d   : > { %v8422_v36 = vpop.permute.xlu1 %3297 }
 0x63e   : > { %v8424_v39 = vpop.permute.xlu0 %3436 }
 0x641   : > { %v8426_v51 = vpop.permute.xlu1 %3422 }
 0x642   : > { %v8428_v54 = vpop.permute.xlu0 %3500 }
 0x643   : > { %9761 = vst [vmem:[#allocation71_spill] sm:$0xff] %v8428_v54 }
 0x645   : > { %v8430_v18 = vpop.permute.xlu1 %3438 }
 0x646   : > { %v8432_v52 = vpop.permute.xlu0 %3516 }
 0x647   : > { %9762 = vst [vmem:[#allocation72_spill] sm:$0xff] %v8432_v52 }
 0x649   : > { %v8434_v50 = vpop.permute.xlu1 %3502 }
 0x64a   : > { %9763 = vst [vmem:[#allocation62_spill] sm:$0xff] %v8434_v50  ;;  %v8436_v63 = vpop.permute.xlu0 %3580 }
 0x64b   : > { %9764 = vst [vmem:[#allocation121_spill] sm:$0xff] %v8436_v63  ;;  %v9769_v63 = vld [vmem:[#allocation19_spill] sm:$0xff] }
 0x64d   : > { %v8438_v35 = vpop.permute.xlu1 %3518 }
 0x64e   : > { %9765 = vst [vmem:[#allocation55_spill] sm:$0xff] %v8438_v35  ;;  %v8440_v60 = vpop.permute.xlu0 %3596 }
 0x64f   : > { %9766 = vst [vmem:[#allocation106_spill] sm:$0xff] %v8440_v60 }
 0x651   : > { %v8442_v61 = vpop.permute.xlu1 %3582 }
 0x652   : > { %9767 = vst [vmem:[#allocation43_spill] sm:$0xff] %v8442_v61  ;;  %v3048_v31 = vpop.permute.xlu0 %3047 }
 0x653   : > { %v3077_v54 = vsel %vm349_vm0, %v8296_v46, %v3048_v31  ;;  %v3073_v49 = vsel %vm349_vm0, %v3048_v31, %v8336_v30 }
 0x654   : > { %v3092_v20 = vmul.f32 %v3077_v54, %v9769_v63 }
 0x655   : > { %v8444_v8 = vpop.permute.xlu1 %3598 }
 0x656   : > { %9768 = vst [vmem:[#allocation77_spill] sm:$0xff] %v8444_v8  ;;  %v3064_v23 = vpop.permute.xlu0 %3063 }
 0x657   : > { %v3069_v8 = vsel %vm349_vm0, %v8336_v30, %v3064_v23  ;;  %v3081_v35 = vsel %vm349_vm0, %v3064_v23, %v8296_v46 }
 0x658   : > { %v3091_v38 = vmul.f32 %v3081_v35, %v9695_v56  ;;  %v3094_v62 = vmul.f32 %v3069_v8, %v9770_v5 }
 0x659   : > { %v3050_v41 = vpop.permute.xlu1 %3049 }
 0x65a   : > { %v3078_v50 = vsel %vm349_vm0, %v3042_v43, %v3050_v41  ;;  %v3128_v52 = vpop.permute.xlu0 %3127  ;;  %v3074_v60 = vsel %vm349_vm0, %v3050_v41, %v3058_v16 }
 0x65b   : > { %v3096_v61 = vmul.f32 %v3078_v50, %v9769_v63  ;;  %v3097_v54 = vmul.f32 %v3074_v60, %v9697_v15  ;;  %v3157_v30 = vsel %vm382_vm1, %v8376_v26, %v3128_v52 }
 0x65d   : > { %v3066_v45 = vpop.permute.xlu1 %3065  ;;  %v3104_v3 = vpack.c.bf16 %v3096_v61, %v3092_v20  ;;  %v3093_v20 = vmul.f32 %v3073_v49, %v9697_v15 }
 0x65e   : > { %v3070_v41 = vsel %vm349_vm0, %v3058_v16, %v3066_v45  ;;  %v3082_v63 = vsel %vm349_vm0, %v3066_v45, %v3042_v43  ;;  %v3144_v50 = vpop.permute.xlu0 %3143  ;;  %v9772_v43 = vpack.c.bf16 %v7994_v13, %v7988_v11  ;;  %v9773_v13 = vpack.c.bf16 %v7991_v33, %v7985_v28  ;;  %v9777_v33 = vld [vmem:[#allocation23_spill] sm:$0xff] }
 0x65f   : > { %v3095_v23 = vmul.f32 %v3082_v63, %v9695_v56  ;;  %v3098_v46 = vmul.f32 %v3070_v41, %v9770_v5  ;;  %3840 = vmatprep.subr.bf16.mxu0 %v3104_v3  ;;  %v3105_v45 = vpack.c.bf16 %v3097_v54, %v3093_v20  ;;  %v3172_v56 = vmul.f32 %v3157_v30, %v9698_v17 }
 0x660   : > { %v3161_v15 = vsel %vm382_vm1, %v3144_v50, %v8376_v26  ;;  %v3153_v3 = vsel %vm382_vm1, %v3128_v52, %v8384_v0 }
 0x661   : > { %v3103_v16 = vpack.c.bf16 %v3095_v23, %v3091_v38  ;;  %v3130_v61 = vpop.permute.xlu1 %3129  ;;  %v3106_v31 = vpack.c.bf16 %v3098_v46, %v3094_v62  ;;  %v3149_v38 = vsel %vm382_vm1, %v8384_v0, %v3144_v50  ;;  %v9771_v62 = vpack.c.bf16 %v7959_v44, %v7947_v14  ;;  %v9775_v50 = vld [vmem:[#allocation143_spill] sm:$0xff] }
 0x662   : > { %v3158_v60 = vsel %vm382_vm1, %v8392_v2, %v3130_v61  ;;  %v3208_v8 = vpop.permute.xlu0 %3207  ;;  %v3154_v5 = vsel %vm382_vm1, %v3130_v61, %v8401_v6  ;;  %v3171_v41 = vmul.f32 %v3161_v15, %v9702_v19  ;;  %v3174_v52 = vmul.f32 %v3149_v38, %v9703_v29  ;;  %v9780_v15 = vld [vmem:[#allocation25_spill] sm:$0xff] }
 0x663   : > { %v3176_v49 = vmul.f32 %v3158_v60, %v9698_v17  ;;  %3841 = vmatpush1.bf16.msra.mxu0 %v3103_v16  ;;  %3922 = vmatprep.subr.bf16.mxu1 %v3106_v31  ;;  %v3177_v54 = vmul.f32 %v3154_v5, %v9699_v48  ;;  %v3173_v63 = vmul.f32 %v3153_v3, %v9699_v48  ;;  %v9781_v3 = vld [vmem:[#allocation24_spill] sm:$0xff] }
 0x664   : > { %3842 = vmatprep.subr.bf16.mxu0 %v9771_v62  ;;  %3923 = vmatpush1.bf16.msra.mxu1 %v3105_v45  ;;  %v9778_v60 = vpack.c.bf16 %v8023_v58, %v8017_v55 }
 0x665   : > { %v3146_v17 = vpop.permute.xlu1 %3145  ;;  %3924 = vmatprep.subr.bf16.mxu1 %v9772_v43  ;;  %v3184_v35 = vpack.c.bf16 %v3176_v49, %v3172_v56  ;;  %v3185_v30 = vpack.c.bf16 %v3177_v54, %v3173_v63  ;;  %v3233_v56 = vsel %vm415_vm2, %v3208_v8, %v8403_v27  ;;  %v9779_v49 = vpack.c.bf16 %v8058_v25, %v8052_v47  ;;  %v9783_v25 = vld [vmem:[#allocation132_spill] sm:$0xff] }
 0x666   : > { %v3150_v26 = vsel %vm382_vm1, %v8401_v6, %v3146_v17  ;;  %v3162_v14 = vsel %vm382_vm1, %v3146_v17, %v8392_v2  ;;  %v3224_v44 = vpop.permute.xlu0 %3223  ;;  %v3237_v6 = vsel %vm415_vm2, %v8394_v34, %v3208_v8  ;;  %v9774_v2 = vld [vmem:[#allocation130_spill] sm:$0xff]  ;;  %v3253_v54 = vmul.f32 %v3233_v56, %v9780_v15 }
 0x667   : > { %v3175_v0 = vmul.f32 %v3162_v14, %v9702_v19  ;;  %v3178_v11 = vmul.f32 %v3150_v26, %v9703_v29  ;;  %3843 = vmatpush1.bf16.msra.mxu0 %v9773_v13  ;;  %v9776_v23 = vpack.c.bf16 %v9774_v2, %v9775_v50  ;;  %v3252_v48 = vmul.f32 %v3237_v6, %v9777_v33  ;;  %v9786_v26 = vld [vmem:[#allocation68_spill] sm:$0xff]  ;;  %v9788_v13 = vld [vmem:[#allocation13_spill] sm:$0xff] }
 0x668   : > { %3844 = vmatprep.subr.bf16.mxu0 %v3184_v35  ;;  %v3229_v31 = vsel %vm415_vm2, %v8403_v27, %v3224_v44  ;;  %v3241_v45 = vsel %vm415_vm2, %v3224_v44, %v8394_v34  ;;  %v9782_v27 = vld [vmem:[#allocation26_spill] sm:$0xff]  ;;  %v9784_v35 = vpack.c.bf16 %v8055_v37, %v9783_v25 }
 0x669   : > { %3925 = vmatpush1.bf16.msra.mxu1 %v9776_v23  ;;  %v3183_v46 = vpack.c.bf16 %v3175_v0, %v3171_v41  ;;  %v3210_v20 = vpop.permute.xlu1 %3209  ;;  %v3186_v19 = vpack.c.bf16 %v3178_v11, %v3174_v52  ;;  %v3251_v17 = vmul.f32 %v3241_v45, %v9781_v3  ;;  %v3254_v8 = vmul.f32 %v3229_v31, %v9782_v27  ;;  %v9795_v45 = vld [vmem:[#allocation98_spill] sm:$0xff] }
 0x66a   : > { %v3238_v28 = vsel %vm415_vm2, %v8410_v32, %v3210_v20  ;;  %v3288_v29 = vpop.permute.xlu0 %3287  ;;  %v3234_v16 = vsel %vm415_vm2, %v3210_v20, %v8414_v4 }
 0x66b   : > { %v3256_v61 = vmul.f32 %v3238_v28, %v9777_v33  ;;  %3845 = vmatpush1.bf16.msra.mxu0 %v3183_v46  ;;  %3926 = vmatprep.subr.bf16.mxu1 %v3186_v19  ;;  %v3257_v62 = vmul.f32 %v3234_v16, %v9780_v15  ;;  %v9789_v46 = vpack.c.bf16 %v8087_v53, %v8081_v57  ;;  %v9791_v33 = vld [vmem:[#allocation17_spill] sm:$0xff] }
 0x66c   : > { %3846 = vmatprep.subr.bf16.mxu0 %v9778_v60  ;;  %v3313_v20 = vsel %vm448_vm3, %v3288_v29, %v8416_v22 }
 0x66d   : > { %3927 = vmatpush1.bf16.msra.mxu1 %v3185_v30  ;;  %v3226_v5 = vpop.permute.xlu1 %3225  ;;  %v3264_v38 = vpack.c.bf16 %v3256_v61, %v3252_v48  ;;  %v3265_v0 = vpack.c.bf16 %v3257_v62, %v3253_v54  ;;  %v9790_v30 = vpack.c.bf16 %v8122_v24, %v8116_v42  ;;  %v9792_v42 = vld [vmem:[#allocation141_spill] sm:$0xff]  ;;  %v3333_v31 = vmul.f32 %v3313_v20, %v9791_v33  ;;  %v9803_v54 = vld [vmem:[#allocation162_spill] sm:$0xff]  ;;  %v9813_v20 = vld [vmem:[#allocation28_spill] sm:$0xff] }
 0x66e   : > { %3928 = vmatprep.subr.bf16.mxu1 %v9779_v49  ;;  %v3230_v34 = vsel %vm415_vm2, %v8414_v4, %v3226_v5  ;;  %v3242_v58 = vsel %vm415_vm2, %v3226_v5, %v8410_v32  ;;  %v3304_v55 = vpop.permute.xlu0 %3303  ;;  %v3317_v4 = vsel %vm448_vm3, %v8412_v9, %v3288_v29  ;;  %v9785_v32 = vld [vmem:[#allocation145_spill] sm:$0xff]  ;;  %v9793_v61 = vpack.c.bf16 %v8119_v40, %v9792_v42 }
 0x66f   : > { %v3255_v43 = vmul.f32 %v3242_v58, %v9781_v3  ;;  %v3258_v47 = vmul.f32 %v3230_v34, %v9782_v27  ;;  %3847 = vmatpush1.bf16.msra.mxu0 %v9784_v35  ;;  %v9787_v14 = vpack.c.bf16 %v9785_v32, %v9786_v26  ;;  %v3332_v63 = vmul.f32 %v3317_v4, %v9788_v13  ;;  %v9799_v62 = vld [vmem:[#allocation125_spill] sm:$0xff]  ;;  %v9800_v58 = vld [vmem:[#allocation160_spill] sm:$0xff] }
 0x670   : > { %3848 = vmatprep.subr.bf16.mxu0 %v3264_v38  ;;  %v3309_v50 = vsel %vm448_vm3, %v8416_v22, %v3304_v55  ;;  %v3321_v23 = vsel %vm448_vm3, %v3304_v55, %v8412_v9  ;;  %v9801_v55 = vld [vmem:[#allocation156_spill] sm:$0xff] }
 0x671   : > { %3929 = vmatpush1.bf16.msra.mxu1 %v9787_v14  ;;  %v3263_v44 = vpack.c.bf16 %v3255_v43, %v3251_v17  ;;  %v3290_v41 = vpop.permute.xlu1 %3289  ;;  %v3266_v52 = vpack.c.bf16 %v3258_v47, %v3254_v8  ;;  %v3331_v16 = vmul.f32 %v3321_v23, %v9715_v7  ;;  %v3334_v22 = vmul.f32 %v3309_v50, %v9717_v59  ;;  %v9802_v17 = vld [vmem:[#allocation154_spill] sm:$0xff]  ;;  %v9804_v26 = vld [vmem:[#allocation96_spill] sm:$0xff] }
 0x672   : > { %v3318_v37 = vsel %vm448_vm3, %v8418_v12, %v3290_v41  ;;  %v8568_v11 = vpop.permute.xlu0 %3680  ;;  %v3314_v6 = vsel %vm448_vm3, %v3290_v41, %v8422_v36  ;;  %v9805_v14 = vld [vmem:[#allocation142_spill] sm:$0xff]  ;;  %v9807_v41 = vld [vmem:[#allocation51_spill] sm:$0xff] }
 0x673   : > { %v3336_v2 = vmul.f32 %v3318_v37, %v9788_v13  ;;  %3849 = vmatpush1.bf16.msra.mxu0 %v3263_v44  ;;  %3930 = vmatprep.subr.bf16.mxu1 %v3266_v52  ;;  %v3337_v48 = vmul.f32 %v3314_v6, %v9791_v33  ;;  %v9806_v44 = vpack.c.bf16 %v9804_v26, %v9805_v14  ;;  %v9808_v52 = vld [vmem:[#allocation27_spill] sm:$0xff]  ;;  %v9810_v13 = vld [vmem:[#allocation158_spill] sm:$0xff]  ;;  %v9814_v33 = vld [vmem:[#allocation129_spill] sm:$0xff] }
 0x674   : > { %3850 = vmatprep.subr.bf16.mxu0 %v9789_v46  ;;  %v9812_v23 = vld [vmem:[#allocation30_spill] sm:$0xff]  ;;  %v9833_v14 = vld [vmem:[#allocation36_spill] sm:$0xff] }
 0x675   : > { %3931 = vmatpush1.bf16.msra.mxu1 %v3265_v0  ;;  %v3306_v19 = vpop.permute.xlu1 %3305  ;;  %v3344_v28 = vpack.c.bf16 %v3336_v2, %v3332_v63  ;;  %v3345_v49 = vpack.c.bf16 %v3337_v48, %v3333_v31  ;;  %v9815_v48 = vld [vmem:[#allocation127_spill] sm:$0xff] }
 0x676   : > { %3932 = vmatprep.subr.bf16.mxu1 %v9790_v30  ;;  %v3310_v9 = vsel %vm448_vm3, %v8422_v36, %v3306_v19  ;;  %v3322_v57 = vsel %vm448_vm3, %v3306_v19, %v8418_v12  ;;  %v3429_v53 = vpop.permute.xlu0 %3428  ;;  %v9794_v36 = vld [vmem:[#allocation114_spill] sm:$0xff] }
 0x677   : > { %v3335_v29 = vmul.f32 %v3322_v57, %v9715_v7  ;;  %v3338_v24 = vmul.f32 %v3310_v9, %v9717_v59  ;;  %3851 = vmatpush1.bf16.msra.mxu0 %v9793_v61  ;;  %v9796_v60 = vpack.c.bf16 %v9794_v36, %v9795_v45  ;;  %v9797_v7 = vld [vmem:[#allocation123_spill] sm:$0xff]  ;;  %v9798_v59 = vld [vmem:[#allocation153_spill] sm:$0xff]  ;;  %v3454_v34 = vsel %vm481_vm5, %v3429_v53, %v8424_v39  ;;  %v9817_v57 = vld [vmem:[#allocation72_spill] sm:$0xff] }
 0x678   : > { %3852 = vmatprep.subr.bf16.mxu0 %v3344_v28  ;;  %v3458_v47 = vsel %vm481_vm5, %v8420_v1, %v3429_v53  ;;  %v3473_v25 = vmul.f32 %v3454_v34, %v9586_v10  ;;  %v9816_v9 = vpack.c.bf16 %v9814_v33, %v9815_v48  ;;  %v9818_v53 = vld [vmem:[#allocation155_spill] sm:$0xff]  ;;  %v9822_v36 = vld [vmem:[#allocation62_spill] sm:$0xff] }
 0x679   : > { %3933 = vmatpush1.bf16.msra.mxu1 %v9796_v60  ;;  %v3343_v12 = vpack.c.bf16 %v3335_v29, %v3331_v16  ;;  %v8608_v56 = vpop.permute.xlu1 %3682  ;;  %v3346_v5 = vpack.c.bf16 %v3338_v24, %v3334_v22  ;;  %v9821_v61 = vld [vmem:[#allocation55_spill] sm:$0xff]  ;;  %v9825_v34 = vld [vmem:[#allocation102_spill] sm:$0xff] }
 0x67a   : > { %v3445_v38 = vpop.permute.xlu0 %3444  ;;  %v9843_v48 = vld [vmem:[#allocation43_spill] sm:$0xff] }
 0x67b   : > { %3853 = vmatpush1.bf16.msra.mxu0 %v3343_v12  ;;  %3934 = vmatprep.subr.bf16.mxu1 %v3346_v5  ;;  %v3450_v4 = vsel %vm481_vm5, %v8424_v39, %v3445_v38  ;;  %v3462_v32 = vsel %vm481_vm5, %v3445_v38, %v8420_v1  ;;  %v3472_v39 = vmul.f32 %v3458_v47, %v9808_v52  ;;  %v9823_v12 = vld [vmem:[#allocation71_spill] sm:$0xff] }
 0x67c   : > { %3854 = vmatprep.subr.bf16.mxu0 %v9797_v7  ;;  %v3474_v46 = vmul.f32 %v3450_v4, %v9812_v23  ;;  %v3475_v19 = vmul.f32 %v3462_v32, %v9813_v20  ;;  %v9832_v32 = vld [vmem:[#allocation38_spill] sm:$0xff] }
 0x67d   : > { %3935 = vmatpush1.bf16.msra.mxu1 %v3345_v49  ;;  %v8611_v40 = vpop.permute.xlu1 %3662  ;;  %v9824_v49 = vld [vmem:[#allocation37_spill] sm:$0xff] }
 0x67e   : > { %3936 = vmatprep.subr.bf16.mxu1 %v9798_v59  ;;  %v3509_v15 = vpop.permute.xlu0 %3508 }
 0x67f   : > { %3855 = vmatpush1.bf16.msra.mxu0 %v9799_v62  ;;  %v3538_v5 = vsel %vm514_vm7, %v9823_v12, %v3509_v15 }
 0x680   : > { %3856 = vmatprep.subr.bf16.mxu0 %v9800_v58  ;;  %v9826_v58 = vld [vmem:[#allocation157_spill] sm:$0xff] }
 0x681   : > { %3937 = vmatpush1.bf16.msra.mxu1 %v9801_v55  ;;  %v3431_v3 = vpop.permute.xlu1 %3430  ;;  %v9827_v55 = vpack.c.bf16 %v9825_v34, %v9826_v58  ;;  %v4346_v34 = vld [vmem:[%s8887_s1 + $0x38] ss:$0 sm:$0xff] }
 0x682   : > { %3938 = vmatprep.subr.bf16.mxu1 %v9802_v17  ;;  %v3455_v27 = vsel %vm481_vm5, %v3431_v3, %v8430_v18  ;;  %v3459_v8 = vsel %vm481_vm5, %v8426_v51, %v3431_v3  ;;  %v3525_v43 = vpop.permute.xlu0 %3524 }
 0x683   : > { %v3477_v35 = vmul.f32 %v3455_v27, %v9586_v10  ;;  %3857 = vmatpush1.bf16.msra.mxu0 %v9803_v54  ;;  %v3476_v0 = vmul.f32 %v3459_v8, %v9808_v52  ;;  %v9809_v10 = vld [vmem:[#allocation161_spill] sm:$0xff]  ;;  %v3530_v59 = vsel %vm514_vm7, %v9817_v57, %v3525_v43  ;;  %v3542_v62 = vsel %vm514_vm7, %v3525_v43, %v9823_v12  ;;  %v9829_v27 = vld [vmem:[#allocation147_spill] sm:$0xff]  ;;  %v9830_v8 = vld [vmem:[#allocation80_spill] sm:$0xff] }
 0x684   : > { %3858 = vmatprep.subr.bf16.mxu0 %v9806_v44  ;;  %v9811_v63 = vpack.c.bf16 %v9809_v10, %v9810_v13  ;;  %v9831_v47 = vpack.c.bf16 %v9829_v27, %v9830_v8  ;;  %v3554_v26 = vmul.f32 %v3530_v59, %v9832_v32  ;;  %v3555_v44 = vmul.f32 %v3542_v62, %v9833_v14  ;;  %v9837_v13 = vld [vmem:[#allocation106_spill] sm:$0xff]  ;;  %v9856_v27 = vld [vmem:[#allocation32_spill] sm:$0xff] }
 0x685   : > { %3939 = vmatpush1.bf16.msra.mxu1 %v9807_v41  ;;  %v3447_v37 = vpop.permute.xlu1 %3446  ;;  %v3485_v6 = vpack.c.bf16 %v3477_v35, %v3473_v25  ;;  %v3484_v22 = vpack.c.bf16 %v3476_v0, %v3472_v39  ;;  %v9834_v0 = vld [vmem:[#allocation69_spill] sm:$0xff] }
 0x686   : > { %3940 = vmatprep.subr.bf16.mxu1 %v9811_v63  ;;  %v3451_v1 = vsel %vm481_vm5, %v8430_v18, %v3447_v37  ;;  %v3463_v2 = vsel %vm481_vm5, %v3447_v37, %v8426_v51  ;;  %v3589_v50 = vpop.permute.xlu0 %3588  ;;  %v3534_v18 = vsel %vm514_vm7, %v3509_v15, %v9817_v57  ;;  %v9819_v51 = vld [vmem:[#allocation116_spill] sm:$0xff]  ;;  %v9828_v15 = vld [vmem:[#allocation35_spill] sm:$0xff]  ;;  %v9839_v39 = vld [vmem:[#allocation113_spill] sm:$0xff] }
 0x687   : > { %v3478_v30 = vmul.f32 %v3451_v1, %v9812_v23  ;;  %v3479_v28 = vmul.f32 %v3463_v2, %v9813_v20  ;;  %3859 = vmatpush1.bf16.msra.mxu0 %v9816_v9  ;;  %v9820_v16 = vpack.c.bf16 %v9818_v53, %v9819_v51  ;;  %v3553_v38 = vmul.f32 %v3534_v18, %v9824_v49  ;;  %v9835_v37 = vld [vmem:[#allocation83_spill] sm:$0xff]  ;;  %v9844_v18 = vld [vmem:[#allocation121_spill] sm:$0xff] }
 0x688   : > { %3860 = vmatprep.subr.bf16.mxu0 %v3485_v6  ;;  %v3552_v35 = vmul.f32 %v3538_v5, %v9828_v15  ;;  %v9836_v10 = vpack.c.bf16 %v9834_v0, %v9835_v37  ;;  %v3614_v63 = vsel %vm547_vm6, %v3589_v50, %v9837_v13  ;;  %v9838_v6 = vld [vmem:[#allocation64_spill] sm:$0xff]  ;;  %v3618_v53 = vsel %vm547_vm6, %v9844_v18, %v3589_v50  ;;  %v9845_v51 = vld [vmem:[#allocation33_spill] sm:$0xff]  ;;  %v9849_v50 = vld [vmem:[#allocation66_spill] sm:$0xff] }
 0x689   : > { %3941 = vmatpush1.bf16.msra.mxu1 %v9820_v16  ;;  %v3486_v29 = vpack.c.bf16 %v3478_v30, %v3474_v46  ;;  %v3511_v24 = vpop.permute.xlu1 %3510  ;;  %v3487_v42 = vpack.c.bf16 %v3479_v28, %v3475_v19  ;;  %v9840_v1 = vpack.c.bf16 %v9838_v6, %v9839_v39  ;;  %v9841_v19 = vld [vmem:[#allocation111_spill] sm:$0xff]  ;;  %v9842_v28 = vld [vmem:[#allocation77_spill] sm:$0xff]  ;;  %v3633_v16 = vmul.f32 %v3614_v63, %v9845_v51  ;;  %v4347_v6 = vld [vmem:[%s8887_s1 + $0x30] ss:$0 sm:$0xff] }
 0x68a   : > { %v3535_v31 = vsel %vm514_vm7, %v3511_v24, %v9821_v61  ;;  %v3539_v45 = vsel %vm514_vm7, %v9822_v36, %v3511_v24  ;;  %v3605_v60 = vpop.permute.xlu0 %3604  ;;  %v3701_v30 = vsel %vm580_vm8, %v8608_v56, %v9841_v19  ;;  %v9851_v5 = vld [vmem:[#allocation31_spill] sm:$0xff] }
 0x68b   : > { %v3557_v7 = vmul.f32 %v3535_v31, %v9824_v49  ;;  %3861 = vmatpush1.bf16.msra.mxu0 %v3484_v22  ;;  %3942 = vmatprep.subr.bf16.mxu1 %v3487_v42  ;;  %v3556_v3 = vmul.f32 %v3539_v45, %v9828_v15  ;;  %v3622_v24 = vsel %vm547_vm6, %v3605_v60, %v9844_v18  ;;  %v9846_v42 = vld [vmem:[#allocation136_spill] sm:$0xff]  ;;  %v9850_v45 = vld [vmem:[#allocation93_spill] sm:$0xff] }
 0x68c   : > { %3862 = vmatprep.subr.bf16.mxu0 %v9827_v55  ;;  %v3689_v12 = vsel %vm580_vm8, %v9850_v45, %v8608_v56  ;;  %v3711_v58 = vmul.f32 %v4346_v34, %v3701_v30  ;;  %v3632_v55 = vmul.f32 %v3618_v53, %v9851_v5  ;;  %v3635_v8 = vmul.f32 %v3622_v24, %v9856_v27  ;;  %v9870_v24 = vld [vmem:[#allocation56_spill] sm:$0xff] }
 0x68d   : > { %3943 = vmatpush1.bf16.msra.mxu1 %v3486_v29  ;;  %v3527_v17 = vpop.permute.xlu1 %3526  ;;  %v3565_v25 = vpack.c.bf16 %v3557_v7, %v3553_v38  ;;  %v3564_v2 = vpack.c.bf16 %v3556_v3, %v3552_v35  ;;  %v3610_v29 = vsel %vm547_vm6, %v9837_v13, %v3605_v60  ;;  %v9852_v7 = vld [vmem:[#allocation146_spill] sm:$0xff]  ;;  %v9853_v60 = vld [vmem:[#allocation144_spill] sm:$0xff]  ;;  %v9857_v35 = vld [vmem:[#allocation149_spill] sm:$0xff]  ;;  %v3710_v39 = vmul.f32 %v4347_v6, %v3689_v12 }
 0x68e   : > { %3944 = vmatprep.subr.bf16.mxu1 %v9831_v47  ;;  %v3531_v54 = vsel %vm514_vm7, %v9821_v61, %v3527_v17  ;;  %v3543_v43 = vsel %vm514_vm7, %v3527_v17, %v9822_v36  ;;  %v8698_v4 = vpop.permute.xlu0 %3660  ;;  %v9847_v61 = vld [vmem:[#allocation105_spill] sm:$0xff]  ;;  %v3700_v36 = vsel %vm580_vm8, %v8568_v11, %v9849_v50  ;;  %v9854_v59 = vpack.c.bf16 %v9852_v7, %v9853_v60  ;;  %v9855_v3 = vld [vmem:[#allocation34_spill] sm:$0xff] }
 0x68f   : > { %v3558_v41 = vmul.f32 %v3531_v54, %v9832_v32  ;;  %v3559_v52 = vmul.f32 %v3543_v43, %v9833_v14  ;;  %3863 = vmatpush1.bf16.msra.mxu0 %v9836_v10  ;;  %v9848_v31 = vpack.c.bf16 %v9846_v42, %v9847_v61  ;;  %v3634_v17 = vmul.f32 %v3610_v29, %v9855_v3  ;;  %v9858_v54 = vld [vmem:[#allocation134_spill] sm:$0xff] }
 0x690   : > { %3864 = vmatprep.subr.bf16.mxu0 %v3565_v25  ;;  %v9859_v43 = vpack.c.bf16 %v9857_v35, %v9858_v54  ;;  %v3707_v0 = vmul.f32 %v4346_v34, %v3700_v36  ;;  %v9871_v42 = vld [vmem:[#allocation58_spill] sm:$0xff]  ;;  %v9873_v36 = vmov 0  }
 0x691   : > { %3945 = vmatpush1.bf16.msra.mxu1 %v9840_v1  ;;  %v3566_v23 = vpack.c.bf16 %v3558_v41, %v3554_v26  ;;  %v3591_v46 = vpop.permute.xlu1 %3590  ;;  %v3567_v20 = vpack.c.bf16 %v3559_v52, %v3555_v44  ;;  %v9860_v26 = vld [vmem:[#allocation95_spill] sm:$0xff]  ;;  %v9862_v41 = vld [vmem:[#allocation74_spill] sm:$0xff]  ;;  %v9872_v61 = vpack.c.bf16 %v9870_v24, %v9871_v42 }
 0x692   : > { %v3615_v33 = vsel %vm547_vm6, %v3591_v46, %v9842_v28  ;;  %v3619_v9 = vsel %vm547_vm6, %v9843_v48, %v3591_v46  ;;  %v3669_v57 = vpop.permute.xlu0 %3668  ;;  %v3688_v14 = vsel %vm580_vm8, %v9860_v26, %v8568_v11  ;;  %v9861_v44 = vld [vmem:[#allocation131_spill] sm:$0xff]  ;;  %v3723_v11 = vpack.c.bf16 %v3711_v58, %v3707_v0  ;;  %v9864_v46 = vld [vmem:[#allocation60_spill] sm:$0xff] }
 0x693   : > { %v3637_v22 = vmul.f32 %v3615_v33, %v9845_v51  ;;  %3865 = vmatpush1.bf16.msra.mxu0 %v3564_v2  ;;  %3946 = vmatprep.subr.bf16.mxu1 %v3567_v20  ;;  %v3636_v49 = vmul.f32 %v3619_v9, %v9851_v5  ;;  %v9863_v52 = vpack.c.bf16 %v9861_v44, %v9862_v41  ;;  %v9865_v20 = vld [vmem:[#allocation70_spill] sm:$0xff]  ;;  %v9868_v51 = vld [vmem:[#allocation133_spill] sm:$0xff] }
 0x694   : > { %3866 = vmatprep.subr.bf16.mxu0 %v9848_v31  ;;  %v3698_v1 = vsel %vm580_vm8, %v8698_v4, %v3669_v57  ;;  %v3706_v2 = vmul.f32 %v4347_v6, %v3688_v14  ;;  %v9866_v19 = vpack.c.bf16 %v9864_v46, %v9865_v20 }
 0x695   : > { %3947 = vmatpush1.bf16.msra.mxu1 %v3566_v23  ;;  %v3607_v38 = vpop.permute.xlu1 %3606  ;;  %v3645_v62 = vpack.c.bf16 %v3637_v22, %v3633_v16  ;;  %v3644_v37 = vpack.c.bf16 %v3636_v49, %v3632_v55  ;;  %v9874_v55 = vld [vmem:[#allocation159_spill] sm:$0xff] }
 0x696   : > { %3948 = vmatprep.subr.bf16.mxu1 %v9854_v59  ;;  %v3611_v15 = vsel %vm547_vm6, %v9842_v28, %v3607_v38  ;;  %v3623_v56 = vsel %vm547_vm6, %v3607_v38, %v9843_v48  ;;  %v3677_v32 = vpop.permute.xlu0 %3676  ;;  %v3722_v33 = vpack.c.bf16 %v3710_v39, %v3706_v2  ;;  %v9867_v48 = vld [vmem:[#allocation103_spill] sm:$0xff] }
 0x697   : > { %v3638_v47 = vmul.f32 %v3611_v15, %v9855_v3  ;;  %v3639_v25 = vmul.f32 %v3623_v56, %v9856_v27  ;;  %3867 = vmatpush1.bf16.msra.mxu0 %v9859_v43  ;;  %v3694_v23 = vsel %vm580_vm8, %v3669_v57, %v3677_v32  ;;  %v3712_v9 = vmul.f32 %v9867_v48, %v3698_v1  ;;  %v9869_v57 = vld [vmem:[#allocation78_spill] sm:$0xff]  ;;  %v9875_v56 = vld [vmem:[#allocation39_spill] sm:$0xff] }
 0x698   : > { %3868 = vmatprep.subr.bf16.mxu0 %v3645_v62  ;;  %v3713_v16 = vmul.f32 %v9869_v57, %v3694_v23 }
 0x699   : > { %3949 = vmatpush1.bf16.msra.mxu1 %v9863_v52  ;;  %v3646_v10 = vpack.c.bf16 %v3638_v47, %v3634_v17  ;;  %v3679_v13 = vpop.permute.xlu1 %3678  ;;  %v3647_v63 = vpack.c.bf16 %v3639_v25, %v3635_v8  ;;  %v9877_v17 = vld [vmem:[#allocation40_spill] sm:$0xff] }
 0x69a   : > { %v3685_v30 = vpop.permute.xlu0 %3684 }
 0x69b   : > { %3869 = vmatpush1.bf16.msra.mxu0 %v3644_v37  ;;  %3950 = vmatprep.subr.bf16.mxu1 %v3647_v63  ;;  %v3690_v31 = vsel %vm580_vm8, %v3677_v32, %v3685_v30  ;;  %v3702_v50 = vsel %vm580_vm8, %v3685_v30, %v8698_v4 }
 0x69c   : > { %3879 = vmatprep.subr.bf16.mxu0 %v9866_v19  ;;  %v3714_v7 = vmul.f32 %v4347_v6, %v3690_v31  ;;  %v3715_v60 = vmul.f32 %v4346_v34, %v3702_v50  ;;  %v9879_v19 = vld [vmem:[#allocation94_spill] sm:$0xff] }
 0x69d   : > { %3951 = vmatpush1.bf16.msra.mxu1 %v3646_v10  ;;  %v3671_v28 = vpop.permute.xlu1 %3670 }
 0x69e   : > { %3961 = vmatprep.subr.bf16.mxu1 %v3723_v11  ;;  %v3695_v18 = vsel %vm580_vm8, %v3671_v28, %v3679_v13  ;;  %v3699_v53 = vsel %vm580_vm8, %v8611_v40, %v3671_v28  ;;  %3871 = vmatmul.mubr.bf16.vlgmr.msra.gmra.mrb[32].mxu0 %v9868_v51 }
 0x69f   : > { %v3716_v22 = vmul.f32 %v9867_v48, %v3699_v53  ;;  %v3717_v29 = vmul.f32 %v9869_v57, %v3695_v18  ;;  %3880 = vmatpush1.bf16.msra.mxu0 %v9872_v61  ;;  %3911 = vmatprep.mubr.bf16.mxu0 %v9873_v36  ;;  %v9882_v53 = vld [vmem:[#allocation92_spill] sm:$0xff] }
 0x6a0   : > { %3953 = vmatmul.mubr.bf16.vlgmr.msra.gmra.mrb[32].mxu1 %v9868_v51 }
 0x6a1   : > { %3962 = vmatpush1.bf16.msra.mxu1 %v3722_v33  ;;  %v3724_v45 = vpack.c.bf16 %v3716_v22, %v3712_v9  ;;  %v3687_v12 = vpop.permute.xlu1 %3686  ;;  %v3725_v5 = vpack.c.bf16 %v3717_v29, %v3713_v16  ;;  %3993 = vmatprep.mubr.bf16.mxu1 %v9873_v36  ;;  %v9880_v33 = vld [vmem:[#allocation110_spill] sm:$0xff]  ;;  %v9881_v9 = vld [vmem:[#allocation128_spill] sm:$0xff] }
 0x6a2   : > { %v3691_v49 = vsel %vm580_vm8, %v3679_v13, %v3687_v12  ;;  %v3703_v38 = vsel %vm580_vm8, %v3687_v12, %v8611_v40  ;;  %v9876_v40 = vld [vmem:[#allocation41_spill] sm:$0xff] }
 0x6a3   : > { %v3718_v59 = vmul.f32 %v4347_v6, %v3691_v49  ;;  %v3719_v4 = vmul.f32 %v4346_v34, %v3703_v38  ;;  %3881 = vmatprep.subr.bf16.mxu0 %v3725_v5  ;;  %v9878_v34 = vld [vmem:[#allocation42_spill] sm:$0xff] }
 0x6a4   : > { %3882 = vmatpush1.bf16.msra.mxu0 %v3724_v45 }
 0x6a5   : > { %v3726_v62 = vpack.c.bf16 %v3718_v59, %v3714_v7  ;;  %v3727_v58 = vpack.c.bf16 %v3719_v4, %v3715_v60 }
 0x6a7   : > { %3963 = vmatprep.subr.bf16.mxu1 %v3727_v58 }
 0x6a8   : > { %3964 = vmatpush1.bf16.msra.mxu1 %v3726_v62 }
 0x6aa   : > { %4164 = vmatmul.mubr.msk.bf16.vlgmr.msra.gmra.mrb[32].mxu0 %vm3834_vm13, %v9874_v55 }
 0x6ab   : > { %v3813_v43 = vpop.permute.xlu0 %3812 }
 0x6ac   : > { %4165 = vmatmul.mubr.msk.bf16.vlgmr.msra.gmra.mrb[32].mxu1 %vm3834_vm13, %v9874_v55 }
 0x6b2   : > { %v703_v15 = vpop.permute.xlu1 %702 }
 0x6b3   : > { %v832_v21 = vadd.f32 %v9875_v56, %v703_v15  ;;  %v834_v3 = vadd.f32 %v9876_v40, %v703_v15  ;;  %v913_v27 = vadd.f32 %v9877_v17, %v703_v15  ;;  %v915_v8 = vadd.f32 %v9878_v34, %v703_v15 }
 0x6b5   : > { %v959_v47 = vmax.f32 %v832_v21, 0.0  ;;  %v960_v25 = vmax.f32 %v834_v3, 0.0  ;;  %v961_v35 = vmax.f32 %v913_v27, 0.0  ;;  %v962_v54 = vmax.f32 %v915_v8, 0.0 }
 0x6b7   : > { %995 = vst [vmem:[%s8817_s25] sm:$0xff] %v959_v47  ;;  %996 = vst [vmem:[%s8817_s25 + $0x8] sm:$0xff] %v960_v25 }
 0x6b8   : > { %997 = vst [vmem:[%s8817_s25 + $0x10] sm:$0xff] %v961_v35  ;;  %998 = vst [vmem:[%s8817_s25 + $0x18] sm:$0xff] %v962_v54 }
 0x77d   : > { %v3913_v32 = vpop.f32.mrb[32].mxu0 }
 0x77e   : > { %v4193_v26 = vadd.f32 %v3913_v32, %v3813_v43  ;;  %v3915_v14 = vpop.f32.mrb[33].mxu0 }
 0x77f   : > { %v3995_v44 = vpop.f32.mrb[32].mxu1  ;;  %v4194_v41 = vadd.f32 %v3915_v14, %v3813_v43  ;;  %v3917_v0 = vpop.f32.mrb[34].mxu0 }
 0x780   : > { %v4195_v52 = vadd.f32 %v3995_v44, %v3813_v43  ;;  %v3997_v37 = vpop.f32.mrb[33].mxu1  ;;  %v4002_v10 = vmax.f32 %v4193_v26, 0.0  ;;  %v3918_v63 = vpop.f32.mrb[35].mxu0 }
 0x781   : > { %v4196_v13 = vadd.f32 %v3997_v37, %v3813_v43  ;;  %v3999_v6 = vpop.f32.mrb[34].mxu1  ;;  %v4003_v39 = vmax.f32 %v4194_v41, 0.0 }
 0x782   : > { %v4004_v1 = vmax.f32 %v4195_v52, 0.0  ;;  %v4000_v11 = vpop.f32.mrb[35].mxu1  ;;  %v4010_v2 = vrot.slane %v4002_v10, 4 }
 0x783   : > { %v4005_v23 = vmax.f32 %v4196_v13, 0.0  ;;  %v4011_v46 = vrot.slane %v4003_v39, 4 }
 0x784   : > { %v4012_v20 = vrot.slane %v4004_v1, 4  ;;  %v4018_v30 = vsel %vm653_vm4, %v9879_v19, %v4010_v2 }
 0x785   : > { %v4013_v28 = vrot.slane %v4005_v23, 4  ;;  %4022 = vst [vmem:[%s8817_s25 + $0x20] sm:$0xff] %v4018_v30  ;;  %v4019_v48 = vsel %vm653_vm4, %v9880_v33, %v4011_v46 }
 0x786   : > { %v4020_v18 = vsel %vm653_vm4, %v9881_v9, %v4012_v20  ;;  %4023 = vst [vmem:[%s8817_s25 + $0x28] sm:$0xff] %v4019_v48 }
 0x787   : > { %4024 = vst [vmem:[%s8817_s25 + $0x30] sm:$0xff] %v4020_v18  ;;  %v4021_v51 = vsel %vm653_vm4, %v9882_v53, %v4013_v28 }
 0x788   : > { %4025 = vst [vmem:[%s8817_s25 + $0x38] sm:$0xff] %v4021_v51 }
 0x789   : > { %4391 = shalt.err (!%p4388_p4)
}
 0x78a   : > { %s4392_s23 = scalar_lea.hbm %s8830_s26, 1024  ;;  %s4396_s20 = scalar_lea.hbm %s8894_s8, 2048 }
 0x78b   : > { %p4393_p5 = scmp.ne.s32.totalorder %s8830_s26, %s4392_s23  ;;  %p4397_p0 = scmp.lt.u32.totalorder %s8830_s26, %s8894_s8 }
 0x78c   : > { %p4398_p1 = scmp.lt.u32.totalorder %s4396_s20, %s4392_s23  ;;  %p4400_p6 = scmp.lt.u32.totalorder %s4392_s23, %s8830_s26 }
 0x78d   : > { %p4394_p8 = pnand %p4393_p5, %p9883_p11 }
 0x78e   : > { %p4399_p3 = por %p4398_p1, %p4397_p0 }
 0x78f   : > { %p4395_p9 = pneg %p4394_p8 }
 0x790   : > { %p4401_p12 = por %p4400_p6, %p4399_p3 }
 0x792   : > { %p4402_p13 = pnand %p4401_p12, %p4395_p9 }
 0x794   : > { %4405 = shalt.err (!%p4402_p13)
}
 0x795   : > { %s4458_s16 = smov 512   ;;  %s4459_s15 = smov 32  }
 0x796   : > { %4255 = dma.vmem_to_hbm [thread:$0]  (%p9883_p11), %s8832_s21, 1024, %s8830_s26, %s4027_s9, %s4458_s16, %s4458_s16, %s4459_s15  }
 0x797 PF: > { %s4055_s10 = sand.u32 1, %s4432_s27   ;;  %p9884_p7 = scmp.ne.s32.totalorder %s9258_s18, 0 }
 0x798   : > { %p9885_p10 = scmp.ge.s32.totalorder %s4444_s30, 2  ;;  %s4056_s22 = scalar_lea.sflag [#allocation6], %s4055_s10 }
 0x79a   : > { %p4262_p2 = pnand %p9885_p10, %p9884_p7 }
 0x79c   : > { %4427 = dma.done.wait (!%p4262_p2), %s4056_s22, 1024  }
 0x79d   : > { %4429 = vsyncadd (!%p4262_p2), %s4056_s22, 4294966272  ;;  %p21_p4 = scmp.ge.s32.totalorder %s4530_s11, 4   ;;  %s9886_s27 = smov %s4436_s28 }
 0x79e   : > { %s9887_s28 = smov %s4440_s29  ;;  %s9888_s29 = smov %s4542_s14 }
 0x79f   : > { %s9889_s30 = smov %s4530_s11  ;;  %23 = sbr.rel (!%p21_p4) target bundleno = 5 (0x5), region = 97 }
 0x7a6   :  { %4061 = vsyncpa [#allocation5], 1 }
 0x7a7   :  { %4063 = vsyncpa [#allocation5 + $0x1], 1 }
 0x7a8   :  { %4064 = vsyncpa [#allocation6], 1 }
 0x7a9   :  { %4066 = vsyncpa [#allocation6 + $0x1], 1 }

</bundles_post_ra>
